<compile_context>
chip_gen: v7x
topology: tpu7x:2x2x1
jax: 0.10.0
libtpu: 0.0.40
codegen_flags: <defaults>
</compile_context>

<pallas_src>
import functools

import jax
import jax.numpy as jnp
from jax import lax
from jax.experimental import pallas as pl
from jax.experimental.pallas import tpu as pltpu


# ----------------------------- config ("opt") -------------------------------
class Opt:
    emb_size = 32
    z_dim = 32            # LSTM hidden size (encoder & generator)
    n_z = 16              # latent size
    max_words = 60        # vocab = max_words + 4 = 64
    n_highway_layers = 2
    n_layers_G = 2
    feature_dim = 48      # emb_size + COND_DIM


COND_DIM = Opt.feature_dim - Opt.emb_size   # 16
VOCAB = Opt.max_words + 4                   # 64


# ------------------------------- LSTM cell -----------------------------------
def _lstm_cell_update(gates, c, W):
    """Gate columns in (i, f, o, g) order, each of width W == hidden width of
    `c`; all elementwise math in f32.  One sigmoid pass covers i|f|o."""
    sig = jax.nn.sigmoid(gates[:, :3 * W])
    g_g = jnp.tanh(gates[:, 3 * W:])
    i_g = sig[:, :W]
    f_g = sig[:, W:2 * W]
    o_g = sig[:, 2 * W:]
    c_new = f_g * c + i_g * g_g
    h_new = o_g * jnp.tanh(c_new)
    return h_new, c_new


# ------------------------------ fused kernel ---------------------------------
def _cvae_kernel(B, Bp, S, Z, nz,
                 tok_ref, y_ref, eps_ref,
                 emb_ref, encfc_wx_ref, encfc_wy_ref, encfc_b_ref,
                 hw_w_ref, hw_b_ref,
                 bi_wi_ref, bi_b_ref, bi_whh_ref,
                 mulv_w_ref, mulv_b_ref,
                 g_wx0_ref, g_wyz0_ref, g_b0_ref,
                 g_comb_ref, g_b1_ref,
                 gfc_w_ref, gfc_b_ref,
                 logits_ref, hn_ref, cn_ref, kld_ref):
    f32 = jnp.float32
    bf16 = jnp.bfloat16
    V, E = emb_ref.shape
    n_hw = hw_w_ref.shape[0]

    def mm(a, w_bf16):          # weights are pre-cast to bf16 on the host
        return jnp.dot(a.astype(bf16), w_bf16, preferred_element_type=f32)

    emb = emb_ref[...]
    encfc_wx = encfc_wx_ref[...]
    encfc_wy = encfc_wy_ref[...]
    encfc_b = encfc_b_ref[...]
    hw_w = hw_w_ref[...]
    hw_b = hw_b_ref[...]
    bi_wi = bi_wi_ref[...]
    bi_b = bi_b_ref[...]
    bi_whh = bi_whh_ref[...]
    mulv_w = mulv_w_ref[...]
    mulv_b = mulv_b_ref[...]
    g_wx0 = g_wx0_ref[...]
    g_wyz0 = g_wyz0_ref[...]
    g_b0 = g_b0_ref[...]
    g_comb = g_comb_ref[...]
    g_b1 = g_b1_ref[...]
    gfc_w = gfc_w_ref[...]
    gfc_b = gfc_b_ref[...]

    # --- embedding via one-hot matmul (time-major rows: row = t*Bp + b) ------
    tok = tok_ref[...]                                            # (S*Bp, 1) i32
    iota = lax.broadcasted_iota(jnp.int32, (S * Bp, V), 1)
    onehot = (tok == iota).astype(bf16)
    x_emb = jnp.dot(onehot, emb, preferred_element_type=f32)      # (S*Bp, E)

    y = y_ref[...]                                                # (Bp, COND)

    # --- encoder fc: y folded into a per-batch bias (no lane concat) ---------
    y_bias = mm(y, encfc_wy) + encfc_b                            # (Bp, E)
    y_bias_tm = jnp.concatenate([y_bias] * S, axis=0)             # (S*Bp, E)
    h = mm(x_emb, encfc_wx) + y_bias_tm

    # --- highway (fused [gate | nonlinear | linear] weight per layer) --------
    for l in range(n_hw):
        g3 = mm(h, hw_w[l]) + hw_b[l]                             # (S*Bp, 3E)
        gate = jax.nn.sigmoid(g3[:, :E])
        h = gate * jax.nn.relu(g3[:, E:2 * E]) + (1.0 - gate) * g3[:, 2 * E:]

    # --- encoder bidirectional LSTM ------------------------------------------
    # Single (Bp, 2Z) state [hf | hb]; gate columns per-gate fwd/bwd interleaved
    # so ONE cell update handles both directions.  Input projection hoisted over
    # all timesteps; fwd slab uses rows of time t, bwd slab rows of time S-1-t.
    xpe = mm(h, bi_wi) + bi_b                                     # (S*Bp, 16Z)
    h2 = jnp.zeros((Bp, 2 * Z), f32)
    c2 = jnp.zeros((Bp, 2 * Z), f32)
    for t in range(S):
        tb = S - 1 - t
        gx = (xpe[t * Bp:(t + 1) * Bp, :8 * Z]
              + xpe[tb * Bp:(tb + 1) * Bp, 8 * Z:])               # (Bp, 8Z)
        gates = gx + mm(h2, bi_whh)
        h2, c2 = _lstm_cell_update(gates, c2, 2 * Z)
    e_hidden = h2                    # (Bp, 2Z), layout [hf | hb] == PyTorch cat

    # --- mu / logvar (fused), reparameterize, KLD (valid rows only) ----------
    mulv = mm(e_hidden, mulv_w) + mulv_b                          # (Bp, 2*nz)
    mu = mulv[:, :nz]
    lv = mulv[:, nz:]
    z = mu + eps_ref[...] * jnp.exp(0.5 * lv)                     # (Bp, nz)
    mu_v = mu[:B]
    lv_v = lv[:B]
    # kld = -0.5 * sum_dim1(logvar - mu^2 - exp(logvar) + 1).mean_over_batch
    term = lv_v - mu_v * mu_v - jnp.exp(lv_v) + 1.0
    row = jnp.sum(term, axis=1, keepdims=True)                    # (B, 1)
    kld_ref[...] = (-0.5 / B) * jnp.sum(row, axis=0, keepdims=True)

    # --- generator 2-layer LSTM -----------------------------------------------
    # Layer-0 input projection hoisted over ALL timesteps; the time-invariant
    # (y, z) contribution is a per-batch bias computed once.
    yz = jnp.concatenate([y, z], axis=1)                          # (Bp, COND+nz)
    yz_bias = mm(yz, g_wyz0) + g_b0                               # (Bp, 4Z)
    xp0 = mm(x_emb, g_wx0) + jnp.concatenate([yz_bias] * S, axis=0)  # (S*Bp, 4Z)

    h0 = jnp.zeros((Bp, Z), f32)
    c0 = jnp.zeros((Bp, Z), f32)
    h1 = jnp.zeros((Bp, Z), f32)
    c1 = jnp.zeros((Bp, Z), f32)
    rec0 = jnp.zeros((Bp, 4 * Z), f32)     # layer-0 recurrent proj (h0_{-1}=0)
    h_top = []
    for t in range(S):
        g0 = xp0[t * Bp:(t + 1) * Bp] + rec0
        h0, c0 = _lstm_cell_update(g0, c0, Z)
        # Fused: layer-1 gates for step t  +  layer-0 recurrent proj for t+1,
        # one MXU push per step on the serial critical path.
        comb = mm(jnp.concatenate([h0, h1], axis=1), g_comb)      # (Bp, 8Z)
        g1 = comb[:, :4 * Z] + g_b1
        rec0 = comb[:, 4 * Z:]
        h1, c1 = _lstm_cell_update(g1, c1, Z)
        h_top.append(h1)

    # Output FC once over all timesteps -> single writeback.
    h_all = jnp.concatenate(h_top, axis=0)                        # (S*Bp, Z)
    logits_ref[...] = mm(h_all, gfc_w) + gfc_b                    # (S*Bp, V)
    hn_ref[...] = jnp.concatenate([h0[:B][None], h1[:B][None]], axis=0)
    cn_ref[...] = jnp.concatenate([c0[:B][None], c1[:B][None]], axis=0)


# ----------------------------- parameter packing ------------------------------
def _ifgo_to_ifog(m, Z):
    """Permute PyTorch LSTM gate columns (i,f,g,o) -> kernel order (i,f,o,g)."""
    i, f, g, o = (m[..., k * Z:(k + 1) * Z] for k in range(4))
    return jnp.concatenate([i, f, o, g], axis=-1)


def _interleave_dirs(m_f, m_b, Z):
    """Per-direction (..., 4Z) in (i,f,o,g) order -> (..., 8Z) per-gate
    interleaved [i_f i_b | f_f f_b | o_f o_b | g_f g_b]."""
    cols = []
    for g in range(4):
        cols.append(m_f[..., g * Z:(g + 1) * Z])
        cols.append(m_b[..., g * Z:(g + 1) * Z])
    return jnp.concatenate(cols, axis=-1)


def pack_params(raw):
    """Pack PyTorch-convention weights into the fused kernel layout.
    MXU weights are pre-cast to bf16 on the host; biases stay f32."""
    E, Z, nz = Opt.emb_size, Opt.z_dim, Opt.n_z
    assert Opt.n_layers_G == 2, "fused generator path assumes n_layers_G == 2"
    bf16 = jnp.bfloat16
    p = {}
    p['emb'] = raw['emb'].astype(bf16)

    # encoder fc: split x / y rows so y folds into a per-batch bias
    p['enc_fc_wx'] = raw['enc_fc_w'][:E].astype(bf16)             # (E, E)
    p['enc_fc_wy'] = raw['enc_fc_w'][E:].astype(bf16)             # (COND, E)
    p['enc_fc_b'] = raw['enc_fc_b']                               # (1, E)

    # highway: fuse [gate | nonlinear | linear] -> one (E, 3E) matmul per layer
    p['hw_w'] = jnp.concatenate([raw['hw_wg'], raw['hw_wn'], raw['hw_wl']],
                                axis=-1).astype(bf16)             # (L, E, 3E)
    p['hw_b'] = jnp.concatenate([raw['hw_bg'], raw['hw_bn'], raw['hw_bl']],
                                axis=-1)                          # (L, 1, 3E)

    # encoder biLSTM: per-gate fwd/bwd column interleave (single cell update)
    wif = _ifgo_to_ifog(raw['bi_wif'], Z); whf = _ifgo_to_ifog(raw['bi_whf'], Z)
    bf_ = _ifgo_to_ifog(raw['bi_bf'], Z)
    wib = _ifgo_to_ifog(raw['bi_wib'], Z); whb = _ifgo_to_ifog(raw['bi_whb'], Z)
    bb_ = _ifgo_to_ifog(raw['bi_bb'], Z)
    zE = jnp.zeros_like(wif)
    zZ = jnp.zeros_like(whf)
    zb = jnp.zeros_like(bf_)
    p['bi_wi'] = jnp.concatenate(
        [_interleave_dirs(wif, zE, Z), _interleave_dirs(zE, wib, Z)],
        axis=1).astype(bf16)                                      # (E, 16Z)
    p['bi_b'] = jnp.concatenate(
        [_interleave_dirs(bf_, zb, Z), _interleave_dirs(zb, bb_, Z)], axis=1)  # (1, 16Z)
    p['bi_whh'] = jnp.concatenate(
        [_interleave_dirs(whf, zZ, Z), _interleave_dirs(zZ, whb, Z)],
        axis=0).astype(bf16)                                      # (2Z, 8Z)

    # mu / logvar fused (e_hidden layout [hf|hb] already matches PyTorch)
    p['mulv_w'] = jnp.concatenate([raw['mu_w'], raw['lv_w']], axis=1).astype(bf16)
    p['mulv_b'] = jnp.concatenate([raw['mu_b'], raw['lv_b']], axis=1)

    # generator layer 0: split x / [y,z] rows; combined per-step weight fusing
    # layer-1 gates with layer-0's recurrent projection for the next step.
    wi0 = _ifgo_to_ifog(raw['g_wi'][0], Z)                        # (F+nz, 4Z)
    p['g_wx0'] = wi0[:E].astype(bf16)                             # (E, 4Z)
    p['g_wyz0'] = wi0[E:].astype(bf16)                            # (COND+nz, 4Z)
    p['g_b0'] = _ifgo_to_ifog(raw['g_b'][0], Z)                   # (1, 4Z)
    wh0 = _ifgo_to_ifog(raw['g_wh'][0], Z)                        # (Z, 4Z)
    wi1 = _ifgo_to_ifog(raw['g_wi'][1], Z)                        # (Z, 4Z)
    wh1 = _ifgo_to_ifog(raw['g_wh'][1], Z)                        # (Z, 4Z)
    p['g_comb'] = jnp.concatenate(
        [jnp.concatenate([wi1, wh1], axis=0),                     # layer-1 gates
         jnp.concatenate([wh0, jnp.zeros_like(wh0)], axis=0)],    # layer-0 recur
        axis=1).astype(bf16)                                      # (2Z, 8Z)
    p['g_b1'] = _ifgo_to_ifog(raw['g_b'][1], Z)                   # (1, 4Z)

    p['gfc_w'] = raw['gfc_w'].astype(bf16)
    p['gfc_b'] = raw['gfc_b']
    return p


def init_params(key):
    keys = iter(jax.random.split(key, 48))

    def w(shape, scale=0.1):
        return (scale * jax.random.normal(next(keys), shape)).astype(jnp.float32)

    E, Z, nz = Opt.emb_size, Opt.z_dim, Opt.n_z
    L, Lg = Opt.n_highway_layers, Opt.n_layers_G
    F = Opt.feature_dim
    Din0 = F + nz

    raw = {}
    raw['emb'] = w((VOCAB, E))
    raw['enc_fc_w'] = w((F, E)); raw['enc_fc_b'] = w((1, E))
    raw['hw_wg'] = w((L, E, E)); raw['hw_bg'] = w((L, 1, E))
    raw['hw_wn'] = w((L, E, E)); raw['hw_bn'] = w((L, 1, E))
    raw['hw_wl'] = w((L, E, E)); raw['hw_bl'] = w((L, 1, E))
    # encoder bidirectional LSTM, PyTorch gate order (i,f,g,o); b = b_ih + b_hh
    raw['bi_wif'] = w((E, 4 * Z)); raw['bi_whf'] = w((Z, 4 * Z)); raw['bi_bf'] = w((1, 4 * Z))
    raw['bi_wib'] = w((E, 4 * Z)); raw['bi_whb'] = w((Z, 4 * Z)); raw['bi_bb'] = w((1, 4 * Z))
    raw['mu_w'] = w((2 * Z, nz)); raw['mu_b'] = w((1, nz))
    raw['lv_w'] = w((2 * Z, nz)); raw['lv_b'] = w((1, nz))
    # generator LSTM (Lg layers) + output fc
    raw['g_wi'] = [w((Din0, 4 * Z))] + [w((Z, 4 * Z)) for _ in range(Lg - 1)]
    raw['g_wh'] = [w((Z, 4 * Z)) for _ in range(Lg)]
    raw['g_b'] = [w((1, 4 * Z)) for _ in range(Lg)]
    raw['gfc_w'] = w((Z, VOCAB)); raw['gfc_b'] = w((1, VOCAB))
    return pack_params(raw)


# ------------------------------ CVAE forward ---------------------------------
def cvae_forward(params, x_tokens, y, rng_key):
    B, S = x_tokens.shape
    Z, nz = Opt.z_dim, Opt.n_z
    Lg = Opt.n_layers_G
    Bp = ((B + 7) // 8) * 8          # pad batch rows to a sublane tile

    eps = jax.random.normal(rng_key, (B, nz), dtype=jnp.float32)   # == T.randn

    # time-major padded token column: row = t*Bp + b (tiny int ops in glue)
    tok_tm = jnp.pad(jnp.transpose(x_tokens).astype(jnp.int32),
                     ((0, 0), (0, Bp - B))).reshape(S * Bp, 1)
    y_p = jnp.pad(y.astype(jnp.float32), ((0, Bp - B), (0, 0)))
    eps_p = jnp.pad(eps, ((0, Bp - B), (0, 0)))

    args = (tok_tm, y_p, eps_p,
            params['emb'], params['enc_fc_wx'], params['enc_fc_wy'], params['enc_fc_b'],
            params['hw_w'], params['hw_b'],
            params['bi_wi'], params['bi_b'], params['bi_whh'],
            params['mulv_w'], params['mulv_b'],
            params['g_wx0'], params['g_wyz0'], params['g_b0'],
            params['g_comb'], params['g_b1'],
            params['gfc_w'], params['gfc_b'])

    out_shape = [jax.ShapeDtypeStruct((S * Bp, VOCAB), jnp.float32),
                 jax.ShapeDtypeStruct((Lg, B, Z), jnp.float32),
                 jax.ShapeDtypeStruct((Lg, B, Z), jnp.float32),
                 jax.ShapeDtypeStruct((1, 1), jnp.float32)]

    vmem = pl.BlockSpec(memory_space=pltpu.MemorySpace.VMEM)
    logits_tm, h_n, c_n, kld = pl.pallas_call(
        functools.partial(_cvae_kernel, B, Bp, S, Z, nz),
        out_shape=out_shape,
        in_specs=[vmem] * len(args),
        out_specs=[vmem] * len(out_shape),
        cost_estimate=pl.CostEstimate(flops=9_000_000,
                                      transcendentals=60_000,
                                      bytes_accessed=250_000),
    )(*args)

    # back to PyTorch batch_first convention (tiny slice/transpose in glue)
    logits = logits_tm.reshape(S, Bp, VOCAB)[:, :B, :].transpose(1, 0, 2)
    return logits, (h_n, c_n), kld[0, 0]


# ---------------------------------- main --------------------------------------
if __name__ == "__main__":
    # TODO(synk): only the training forward (z=None) is implemented here; the
    # autoregressive sampling loop / loss wrappers stay in host JAX.
    key = jax.random.PRNGKey(0)
    pkey, xkey, ykey, ekey = jax.random.split(key, 4)

    params = init_params(pkey)
    B, S = 2, 8
    x_tokens = jax.random.randint(xkey, (B, S), 0, VOCAB, dtype=jnp.int32)
    y = jax.random.normal(ykey, (B, COND_DIM), dtype=jnp.float32)

    fwd = jax.jit(cvae_forward)
    logits, (h_n, c_n), kld = fwd(params, x_tokens, y, ekey)
    jax.block_until_ready((logits, h_n, c_n, kld))

    assert logits.shape == (B, S, VOCAB)
    assert h_n.shape == (Opt.n_layers_G, B, Opt.z_dim)
    assert c_n.shape == (Opt.n_layers_G, B, Opt.z_dim)
    assert kld.shape == ()
    assert bool(jnp.all(jnp.isfinite(logits))) and bool(jnp.isfinite(kld))
    print("KERNEL_OK")
</pallas_src>

<mosaic_0001>
module attributes {stable_mosaic.version = 11 : i64} {
  func.func @_cvae_kernel(%arg0: memref<64x1xi32, #tpu.memory_space<vmem>>, %arg1: memref<8x16xf32, #tpu.memory_space<vmem>>, %arg2: memref<8x16xf32, #tpu.memory_space<vmem>>, %arg3: memref<64x32xbf16, #tpu.memory_space<vmem>>, %arg4: memref<32x32xbf16, #tpu.memory_space<vmem>>, %arg5: memref<16x32xbf16, #tpu.memory_space<vmem>>, %arg6: memref<1x32xf32, #tpu.memory_space<vmem>>, %arg7: memref<2x32x96xbf16, #tpu.memory_space<vmem>>, %arg8: memref<2x1x96xf32, #tpu.memory_space<vmem>>, %arg9: memref<32x512xbf16, #tpu.memory_space<vmem>>, %arg10: memref<1x512xf32, #tpu.memory_space<vmem>>, %arg11: memref<64x256xbf16, #tpu.memory_space<vmem>>, %arg12: memref<64x32xbf16, #tpu.memory_space<vmem>>, %arg13: memref<1x32xf32, #tpu.memory_space<vmem>>, %arg14: memref<32x128xbf16, #tpu.memory_space<vmem>>, %arg15: memref<32x128xbf16, #tpu.memory_space<vmem>>, %arg16: memref<1x128xf32, #tpu.memory_space<vmem>>, %arg17: memref<64x256xbf16, #tpu.memory_space<vmem>>, %arg18: memref<1x128xf32, #tpu.memory_space<vmem>>, %arg19: memref<32x64xbf16, #tpu.memory_space<vmem>>, %arg20: memref<1x64xf32, #tpu.memory_space<vmem>>, %arg21: memref<64x64xf32, #tpu.memory_space<vmem>>, %arg22: memref<2x2x32xf32, #tpu.memory_space<vmem>>, %arg23: memref<2x2x32xf32, #tpu.memory_space<vmem>>, %arg24: memref<1x1xf32, #tpu.memory_space<vmem>>) attributes {dimension_semantics = [], scalar_prefetch = 0 : i64, scratch_operands = 0 : i64, tpu.core_type = #tpu.core_type<tc>} {
    %c0 = arith.constant 0 : index
    %c0_0 = arith.constant 0 : index
    %0 = vector.load %arg3[%c0, %c0_0] : memref<64x32xbf16, #tpu.memory_space<vmem>>, vector<64x32xbf16>
    %c0_1 = arith.constant 0 : index
    %c0_2 = arith.constant 0 : index
    %1 = vector.load %arg4[%c0_1, %c0_2] : memref<32x32xbf16, #tpu.memory_space<vmem>>, vector<32x32xbf16>
    %c0_3 = arith.constant 0 : index
    %c0_4 = arith.constant 0 : index
    %2 = vector.load %arg5[%c0_3, %c0_4] : memref<16x32xbf16, #tpu.memory_space<vmem>>, vector<16x32xbf16>
    %c0_5 = arith.constant 0 : index
    %c0_6 = arith.constant 0 : index
    %3 = vector.load %arg6[%c0_5, %c0_6] : memref<1x32xf32, #tpu.memory_space<vmem>>, vector<1x32xf32>
    %c0_7 = arith.constant 0 : index
    %c0_8 = arith.constant 0 : index
    %c0_9 = arith.constant 0 : index
    %4 = vector.load %arg7[%c0_7, %c0_8, %c0_9] : memref<2x32x96xbf16, #tpu.memory_space<vmem>>, vector<2x32x96xbf16>
    %c0_10 = arith.constant 0 : index
    %c0_11 = arith.constant 0 : index
    %c0_12 = arith.constant 0 : index
    %5 = vector.load %arg8[%c0_10, %c0_11, %c0_12] : memref<2x1x96xf32, #tpu.memory_space<vmem>>, vector<2x1x96xf32>
    %c0_13 = arith.constant 0 : index
    %c0_14 = arith.constant 0 : index
    %6 = vector.load %arg9[%c0_13, %c0_14] : memref<32x512xbf16, #tpu.memory_space<vmem>>, vector<32x512xbf16>
    %c0_15 = arith.constant 0 : index
    %c0_16 = arith.constant 0 : index
    %7 = vector.load %arg10[%c0_15, %c0_16] : memref<1x512xf32, #tpu.memory_space<vmem>>, vector<1x512xf32>
    %c0_17 = arith.constant 0 : index
    %c0_18 = arith.constant 0 : index
    %8 = vector.load %arg11[%c0_17, %c0_18] : memref<64x256xbf16, #tpu.memory_space<vmem>>, vector<64x256xbf16>
    %c0_19 = arith.constant 0 : index
    %c0_20 = arith.constant 0 : index
    %9 = vector.load %arg12[%c0_19, %c0_20] : memref<64x32xbf16, #tpu.memory_space<vmem>>, vector<64x32xbf16>
    %c0_21 = arith.constant 0 : index
    %c0_22 = arith.constant 0 : index
    %10 = vector.load %arg13[%c0_21, %c0_22] : memref<1x32xf32, #tpu.memory_space<vmem>>, vector<1x32xf32>
    %c0_23 = arith.constant 0 : index
    %c0_24 = arith.constant 0 : index
    %11 = vector.load %arg14[%c0_23, %c0_24] : memref<32x128xbf16, #tpu.memory_space<vmem>>, vector<32x128xbf16>
    %c0_25 = arith.constant 0 : index
    %c0_26 = arith.constant 0 : index
    %12 = vector.load %arg15[%c0_25, %c0_26] : memref<32x128xbf16, #tpu.memory_space<vmem>>, vector<32x128xbf16>
    %c0_27 = arith.constant 0 : index
    %c0_28 = arith.constant 0 : index
    %13 = vector.load %arg16[%c0_27, %c0_28] : memref<1x128xf32, #tpu.memory_space<vmem>>, vector<1x128xf32>
    %c0_29 = arith.constant 0 : index
    %c0_30 = arith.constant 0 : index
    %14 = vector.load %arg17[%c0_29, %c0_30] : memref<64x256xbf16, #tpu.memory_space<vmem>>, vector<64x256xbf16>
    %c0_31 = arith.constant 0 : index
    %c0_32 = arith.constant 0 : index
    %15 = vector.load %arg18[%c0_31, %c0_32] : memref<1x128xf32, #tpu.memory_space<vmem>>, vector<1x128xf32>
    %c0_33 = arith.constant 0 : index
    %c0_34 = arith.constant 0 : index
    %16 = vector.load %arg19[%c0_33, %c0_34] : memref<32x64xbf16, #tpu.memory_space<vmem>>, vector<32x64xbf16>
    %c0_35 = arith.constant 0 : index
    %c0_36 = arith.constant 0 : index
    %17 = vector.load %arg20[%c0_35, %c0_36] : memref<1x64xf32, #tpu.memory_space<vmem>>, vector<1x64xf32>
    %c0_37 = arith.constant 0 : index
    %c0_38 = arith.constant 0 : index
    %18 = vector.load %arg0[%c0_37, %c0_38] : memref<64x1xi32, #tpu.memory_space<vmem>>, vector<64x1xi32>
    %19 = tpu.iota {dimensions = array<i32: 1>} : vector<64x64xi32>
    %20 = vector.broadcast %18 : vector<64x1xi32> to vector<64x64xi32>
    %21 = arith.cmpi eq, %20, %19 : vector<64x64xi32>
    %22 = arith.extui %21 : vector<64x64xi1> to vector<64x64xi32>
    %23 = arith.sitofp %22 : vector<64x64xi32> to vector<64x64xf32>
    %24 = arith.truncf %23 : vector<64x64xf32> to vector<64x64xbf16>
    %cst = arith.constant dense<0.000000e+00> : vector<64x32xf32>
    %25 = tpu.matmul %24, %0, %cst {dimension_numbers = #tpu.dot_dimension_numbers<[1], [0], [0], [1], [0, 0, 1, 1], [], []>} : vector<64x64xbf16>, vector<64x32xbf16>, vector<64x32xf32> -> vector<64x32xf32>
    %c0_39 = arith.constant 0 : index
    %c0_40 = arith.constant 0 : index
    %26 = vector.load %arg1[%c0_39, %c0_40] : memref<8x16xf32, #tpu.memory_space<vmem>>, vector<8x16xf32>
    %27 = arith.truncf %26 : vector<8x16xf32> to vector<8x16xbf16>
    %cst_41 = arith.constant dense<0.000000e+00> : vector<8x32xf32>
    %28 = tpu.matmul %27, %2, %cst_41 {dimension_numbers = #tpu.dot_dimension_numbers<[1], [0], [0], [1], [0, 0, 1, 1], [], []>} : vector<8x16xbf16>, vector<16x32xbf16>, vector<8x32xf32> -> vector<8x32xf32>
    %29 = vector.broadcast %3 : vector<1x32xf32> to vector<8x32xf32>
    %30 = arith.addf %28, %29 : vector<8x32xf32>
    %31 = tpu.concatenate %30, %30, %30, %30, %30, %30, %30, %30 in 0 : vector<8x32xf32>, vector<8x32xf32>, vector<8x32xf32>, vector<8x32xf32>, vector<8x32xf32>, vector<8x32xf32>, vector<8x32xf32>, vector<8x32xf32> -> vector<64x32xf32>
    %32 = arith.truncf %25 : vector<64x32xf32> to vector<64x32xbf16>
    %cst_42 = arith.constant dense<0.000000e+00> : vector<64x32xf32>
    %33 = tpu.matmul %32, %1, %cst_42 {dimension_numbers = #tpu.dot_dimension_numbers<[1], [0], [0], [1], [0, 0, 1, 1], [], []>} : vector<64x32xbf16>, vector<32x32xbf16>, vector<64x32xf32> -> vector<64x32xf32>
    %34 = arith.addf %33, %31 : vector<64x32xf32>
    %35 = vector.extract_strided_slice %4 {offsets = [0, 0, 0], sizes = [1, 32, 96], strides = [1, 1, 1]} : vector<2x32x96xbf16> to vector<1x32x96xbf16>
    %36 = vector.shape_cast %35 : vector<1x32x96xbf16> to vector<32x96xbf16>
    %37 = arith.truncf %34 : vector<64x32xf32> to vector<64x32xbf16>
    %cst_43 = arith.constant dense<0.000000e+00> : vector<64x96xf32>
    %38 = tpu.matmul %37, %36, %cst_43 {dimension_numbers = #tpu.dot_dimension_numbers<[1], [0], [0], [1], [0, 0, 1, 1], [], []>} : vector<64x32xbf16>, vector<32x96xbf16>, vector<64x96xf32> -> vector<64x96xf32>
    %39 = vector.extract_strided_slice %5 {offsets = [0, 0, 0], sizes = [1, 1, 96], strides = [1, 1, 1]} : vector<2x1x96xf32> to vector<1x1x96xf32>
    %40 = vector.shape_cast %39 : vector<1x1x96xf32> to vector<1x96xf32>
    %41 = vector.broadcast %40 : vector<1x96xf32> to vector<64x96xf32>
    %42 = arith.addf %38, %41 : vector<64x96xf32>
    %43 = vector.extract_strided_slice %42 {offsets = [0, 0], sizes = [64, 32], strides = [1, 1]} : vector<64x96xf32> to vector<64x32xf32>
    %44 = arith.negf %43 : vector<64x32xf32>
    %45 = math.exp %44 : vector<64x32xf32>
    %cst_44 = arith.constant 1.000000e+00 : f32
    %46 = vector.broadcast %cst_44 : f32 to vector<64x32xf32>
    %47 = arith.addf %46, %45 : vector<64x32xf32>
    %48 = arith.divf %46, %47 : vector<64x32xf32>
    %49 = vector.extract_strided_slice %42 {offsets = [0, 32], sizes = [64, 32], strides = [1, 1]} : vector<64x96xf32> to vector<64x32xf32>
    %cst_45 = arith.constant 0.000000e+00 : f32
    %50 = vector.broadcast %cst_45 : f32 to vector<64x32xf32>
    %51 = arith.maximumf %49, %50 : vector<64x32xf32>
    %52 = arith.mulf %48, %51 : vector<64x32xf32>
    %cst_46 = arith.constant 1.000000e+00 : f32
    %53 = vector.broadcast %cst_46 : f32 to vector<64x32xf32>
    %54 = arith.subf %53, %48 : vector<64x32xf32>
    %55 = vector.extract_strided_slice %42 {offsets = [0, 64], sizes = [64, 32], strides = [1, 1]} : vector<64x96xf32> to vector<64x32xf32>
    %56 = arith.mulf %54, %55 : vector<64x32xf32>
    %57 = arith.addf %52, %56 : vector<64x32xf32>
    %58 = vector.extract_strided_slice %4 {offsets = [1, 0, 0], sizes = [1, 32, 96], strides = [1, 1, 1]} : vector<2x32x96xbf16> to vector<1x32x96xbf16>
    %59 = vector.shape_cast %58 : vector<1x32x96xbf16> to vector<32x96xbf16>
    %60 = arith.truncf %57 : vector<64x32xf32> to vector<64x32xbf16>
    %cst_47 = arith.constant dense<0.000000e+00> : vector<64x96xf32>
    %61 = tpu.matmul %60, %59, %cst_47 {dimension_numbers = #tpu.dot_dimension_numbers<[1], [0], [0], [1], [0, 0, 1, 1], [], []>} : vector<64x32xbf16>, vector<32x96xbf16>, vector<64x96xf32> -> vector<64x96xf32>
    %62 = vector.extract_strided_slice %5 {offsets = [1, 0, 0], sizes = [1, 1, 96], strides = [1, 1, 1]} : vector<2x1x96xf32> to vector<1x1x96xf32>
    %63 = vector.shape_cast %62 : vector<1x1x96xf32> to vector<1x96xf32>
    %64 = vector.broadcast %63 : vector<1x96xf32> to vector<64x96xf32>
    %65 = arith.addf %61, %64 : vector<64x96xf32>
    %66 = vector.extract_strided_slice %65 {offsets = [0, 0], sizes = [64, 32], strides = [1, 1]} : vector<64x96xf32> to vector<64x32xf32>
    %67 = arith.negf %66 : vector<64x32xf32>
    %68 = math.exp %67 : vector<64x32xf32>
    %cst_48 = arith.constant 1.000000e+00 : f32
    %69 = vector.broadcast %cst_48 : f32 to vector<64x32xf32>
    %70 = arith.addf %69, %68 : vector<64x32xf32>
    %71 = arith.divf %69, %70 : vector<64x32xf32>
    %72 = vector.extract_strided_slice %65 {offsets = [0, 32], sizes = [64, 32], strides = [1, 1]} : vector<64x96xf32> to vector<64x32xf32>
    %cst_49 = arith.constant 0.000000e+00 : f32
    %73 = vector.broadcast %cst_49 : f32 to vector<64x32xf32>
    %74 = arith.maximumf %72, %73 : vector<64x32xf32>
    %75 = arith.mulf %71, %74 : vector<64x32xf32>
    %cst_50 = arith.constant 1.000000e+00 : f32
    %76 = vector.broadcast %cst_50 : f32 to vector<64x32xf32>
    %77 = arith.subf %76, %71 : vector<64x32xf32>
    %78 = vector.extract_strided_slice %65 {offsets = [0, 64], sizes = [64, 32], strides = [1, 1]} : vector<64x96xf32> to vector<64x32xf32>
    %79 = arith.mulf %77, %78 : vector<64x32xf32>
    %80 = arith.addf %75, %79 : vector<64x32xf32>
    %81 = arith.truncf %80 : vector<64x32xf32> to vector<64x32xbf16>
    %cst_51 = arith.constant dense<0.000000e+00> : vector<64x512xf32>
    %82 = tpu.matmul %81, %6, %cst_51 {dimension_numbers = #tpu.dot_dimension_numbers<[1], [0], [0], [1], [0, 0, 1, 1], [], []>} : vector<64x32xbf16>, vector<32x512xbf16>, vector<64x512xf32> -> vector<64x512xf32>
    %83 = vector.broadcast %7 : vector<1x512xf32> to vector<64x512xf32>
    %84 = arith.addf %82, %83 : vector<64x512xf32>
    %cst_52 = arith.constant 0.000000e+00 : f32
    %85 = vector.broadcast %cst_52 : f32 to vector<8x64xf32>
    %cst_53 = arith.constant 0.000000e+00 : f32
    %86 = vector.broadcast %cst_53 : f32 to vector<8x64xf32>
    %87 = vector.extract_strided_slice %84 {offsets = [0, 0], sizes = [8, 256], strides = [1, 1]} : vector<64x512xf32> to vector<8x256xf32>
    %88 = vector.extract_strided_slice %84 {offsets = [56, 256], sizes = [8, 256], strides = [1, 1]} : vector<64x512xf32> to vector<8x256xf32>
    %89 = arith.addf %87, %88 : vector<8x256xf32>
    %90 = arith.truncf %85 : vector<8x64xf32> to vector<8x64xbf16>
    %cst_54 = arith.constant dense<0.000000e+00> : vector<8x256xf32>
    %91 = tpu.matmul %90, %8, %cst_54 {dimension_numbers = #tpu.dot_dimension_numbers<[1], [0], [0], [1], [0, 0, 1, 1], [], []>} : vector<8x64xbf16>, vector<64x256xbf16>, vector<8x256xf32> -> vector<8x256xf32>
    %92 = arith.addf %89, %91 : vector<8x256xf32>
    %93 = vector.extract_strided_slice %92 {offsets = [0, 0], sizes = [8, 192], strides = [1, 1]} : vector<8x256xf32> to vector<8x192xf32>
    %94 = arith.negf %93 : vector<8x192xf32>
    %95 = math.exp %94 : vector<8x192xf32>
    %cst_55 = arith.constant 1.000000e+00 : f32
    %96 = vector.broadcast %cst_55 : f32 to vector<8x192xf32>
    %97 = arith.addf %96, %95 : vector<8x192xf32>
    %98 = arith.divf %96, %97 : vector<8x192xf32>
    %99 = vector.extract_strided_slice %92 {offsets = [0, 192], sizes = [8, 64], strides = [1, 1]} : vector<8x256xf32> to vector<8x64xf32>
    %100 = math.tanh %99 : vector<8x64xf32>
    %101 = vector.extract_strided_slice %98 {offsets = [0, 0], sizes = [8, 64], strides = [1, 1]} : vector<8x192xf32> to vector<8x64xf32>
    %102 = vector.extract_strided_slice %98 {offsets = [0, 64], sizes = [8, 64], strides = [1, 1]} : vector<8x192xf32> to vector<8x64xf32>
    %103 = vector.extract_strided_slice %98 {offsets = [0, 128], sizes = [8, 64], strides = [1, 1]} : vector<8x192xf32> to vector<8x64xf32>
    %104 = arith.mulf %102, %86 : vector<8x64xf32>
    %105 = arith.mulf %101, %100 : vector<8x64xf32>
    %106 = arith.addf %104, %105 : vector<8x64xf32>
    %107 = math.tanh %106 : vector<8x64xf32>
    %108 = arith.mulf %103, %107 : vector<8x64xf32>
    %109 = vector.extract_strided_slice %84 {offsets = [8, 0], sizes = [8, 256], strides = [1, 1]} : vector<64x512xf32> to vector<8x256xf32>
    %110 = vector.extract_strided_slice %84 {offsets = [48, 256], sizes = [8, 256], strides = [1, 1]} : vector<64x512xf32> to vector<8x256xf32>
    %111 = arith.addf %109, %110 : vector<8x256xf32>
    %112 = arith.truncf %108 : vector<8x64xf32> to vector<8x64xbf16>
    %cst_56 = arith.constant dense<0.000000e+00> : vector<8x256xf32>
    %113 = tpu.matmul %112, %8, %cst_56 {dimension_numbers = #tpu.dot_dimension_numbers<[1], [0], [0], [1], [0, 0, 1, 1], [], []>} : vector<8x64xbf16>, vector<64x256xbf16>, vector<8x256xf32> -> vector<8x256xf32>
    %114 = arith.addf %111, %113 : vector<8x256xf32>
    %115 = vector.extract_strided_slice %114 {offsets = [0, 0], sizes = [8, 192], strides = [1, 1]} : vector<8x256xf32> to vector<8x192xf32>
    %116 = arith.negf %115 : vector<8x192xf32>
    %117 = math.exp %116 : vector<8x192xf32>
    %cst_57 = arith.constant 1.000000e+00 : f32
    %118 = vector.broadcast %cst_57 : f32 to vector<8x192xf32>
    %119 = arith.addf %118, %117 : vector<8x192xf32>
    %120 = arith.divf %118, %119 : vector<8x192xf32>
    %121 = vector.extract_strided_slice %114 {offsets = [0, 192], sizes = [8, 64], strides = [1, 1]} : vector<8x256xf32> to vector<8x64xf32>
    %122 = math.tanh %121 : vector<8x64xf32>
    %123 = vector.extract_strided_slice %120 {offsets = [0, 0], sizes = [8, 64], strides = [1, 1]} : vector<8x192xf32> to vector<8x64xf32>
    %124 = vector.extract_strided_slice %120 {offsets = [0, 64], sizes = [8, 64], strides = [1, 1]} : vector<8x192xf32> to vector<8x64xf32>
    %125 = vector.extract_strided_slice %120 {offsets = [0, 128], sizes = [8, 64], strides = [1, 1]} : vector<8x192xf32> to vector<8x64xf32>
    %126 = arith.mulf %124, %106 : vector<8x64xf32>
    %127 = arith.mulf %123, %122 : vector<8x64xf32>
    %128 = arith.addf %126, %127 : vector<8x64xf32>
    %129 = math.tanh %128 : vector<8x64xf32>
    %130 = arith.mulf %125, %129 : vector<8x64xf32>
    %131 = vector.extract_strided_slice %84 {offsets = [16, 0], sizes = [8, 256], strides = [1, 1]} : vector<64x512xf32> to vector<8x256xf32>
    %132 = vector.extract_strided_slice %84 {offsets = [40, 256], sizes = [8, 256], strides = [1, 1]} : vector<64x512xf32> to vector<8x256xf32>
    %133 = arith.addf %131, %132 : vector<8x256xf32>
    %134 = arith.truncf %130 : vector<8x64xf32> to vector<8x64xbf16>
    %cst_58 = arith.constant dense<0.000000e+00> : vector<8x256xf32>
    %135 = tpu.matmul %134, %8, %cst_58 {dimension_numbers = #tpu.dot_dimension_numbers<[1], [0], [0], [1], [0, 0, 1, 1], [], []>} : vector<8x64xbf16>, vector<64x256xbf16>, vector<8x256xf32> -> vector<8x256xf32>
    %136 = arith.addf %133, %135 : vector<8x256xf32>
    %137 = vector.extract_strided_slice %136 {offsets = [0, 0], sizes = [8, 192], strides = [1, 1]} : vector<8x256xf32> to vector<8x192xf32>
    %138 = arith.negf %137 : vector<8x192xf32>
    %139 = math.exp %138 : vector<8x192xf32>
    %cst_59 = arith.constant 1.000000e+00 : f32
    %140 = vector.broadcast %cst_59 : f32 to vector<8x192xf32>
    %141 = arith.addf %140, %139 : vector<8x192xf32>
    %142 = arith.divf %140, %141 : vector<8x192xf32>
    %143 = vector.extract_strided_slice %136 {offsets = [0, 192], sizes = [8, 64], strides = [1, 1]} : vector<8x256xf32> to vector<8x64xf32>
    %144 = math.tanh %143 : vector<8x64xf32>
    %145 = vector.extract_strided_slice %142 {offsets = [0, 0], sizes = [8, 64], strides = [1, 1]} : vector<8x192xf32> to vector<8x64xf32>
    %146 = vector.extract_strided_slice %142 {offsets = [0, 64], sizes = [8, 64], strides = [1, 1]} : vector<8x192xf32> to vector<8x64xf32>
    %147 = vector.extract_strided_slice %142 {offsets = [0, 128], sizes = [8, 64], strides = [1, 1]} : vector<8x192xf32> to vector<8x64xf32>
    %148 = arith.mulf %146, %128 : vector<8x64xf32>
    %149 = arith.mulf %145, %144 : vector<8x64xf32>
    %150 = arith.addf %148, %149 : vector<8x64xf32>
    %151 = math.tanh %150 : vector<8x64xf32>
    %152 = arith.mulf %147, %151 : vector<8x64xf32>
    %153 = vector.extract_strided_slice %84 {offsets = [24, 0], sizes = [8, 256], strides = [1, 1]} : vector<64x512xf32> to vector<8x256xf32>
    %154 = vector.extract_strided_slice %84 {offsets = [32, 256], sizes = [8, 256], strides = [1, 1]} : vector<64x512xf32> to vector<8x256xf32>
    %155 = arith.addf %153, %154 : vector<8x256xf32>
    %156 = arith.truncf %152 : vector<8x64xf32> to vector<8x64xbf16>
    %cst_60 = arith.constant dense<0.000000e+00> : vector<8x256xf32>
    %157 = tpu.matmul %156, %8, %cst_60 {dimension_numbers = #tpu.dot_dimension_numbers<[1], [0], [0], [1], [0, 0, 1, 1], [], []>} : vector<8x64xbf16>, vector<64x256xbf16>, vector<8x256xf32> -> vector<8x256xf32>
    %158 = arith.addf %155, %157 : vector<8x256xf32>
    %159 = vector.extract_strided_slice %158 {offsets = [0, 0], sizes = [8, 192], strides = [1, 1]} : vector<8x256xf32> to vector<8x192xf32>
    %160 = arith.negf %159 : vector<8x192xf32>
    %161 = math.exp %160 : vector<8x192xf32>
    %cst_61 = arith.constant 1.000000e+00 : f32
    %162 = vector.broadcast %cst_61 : f32 to vector<8x192xf32>
    %163 = arith.addf %162, %161 : vector<8x192xf32>
    %164 = arith.divf %162, %163 : vector<8x192xf32>
    %165 = vector.extract_strided_slice %158 {offsets = [0, 192], sizes = [8, 64], strides = [1, 1]} : vector<8x256xf32> to vector<8x64xf32>
    %166 = math.tanh %165 : vector<8x64xf32>
    %167 = vector.extract_strided_slice %164 {offsets = [0, 0], sizes = [8, 64], strides = [1, 1]} : vector<8x192xf32> to vector<8x64xf32>
    %168 = vector.extract_strided_slice %164 {offsets = [0, 64], sizes = [8, 64], strides = [1, 1]} : vector<8x192xf32> to vector<8x64xf32>
    %169 = vector.extract_strided_slice %164 {offsets = [0, 128], sizes = [8, 64], strides = [1, 1]} : vector<8x192xf32> to vector<8x64xf32>
    %170 = arith.mulf %168, %150 : vector<8x64xf32>
    %171 = arith.mulf %167, %166 : vector<8x64xf32>
    %172 = arith.addf %170, %171 : vector<8x64xf32>
    %173 = math.tanh %172 : vector<8x64xf32>
    %174 = arith.mulf %169, %173 : vector<8x64xf32>
    %175 = vector.extract_strided_slice %84 {offsets = [32, 0], sizes = [8, 256], strides = [1, 1]} : vector<64x512xf32> to vector<8x256xf32>
    %176 = vector.extract_strided_slice %84 {offsets = [24, 256], sizes = [8, 256], strides = [1, 1]} : vector<64x512xf32> to vector<8x256xf32>
    %177 = arith.addf %175, %176 : vector<8x256xf32>
    %178 = arith.truncf %174 : vector<8x64xf32> to vector<8x64xbf16>
    %cst_62 = arith.constant dense<0.000000e+00> : vector<8x256xf32>
    %179 = tpu.matmul %178, %8, %cst_62 {dimension_numbers = #tpu.dot_dimension_numbers<[1], [0], [0], [1], [0, 0, 1, 1], [], []>} : vector<8x64xbf16>, vector<64x256xbf16>, vector<8x256xf32> -> vector<8x256xf32>
    %180 = arith.addf %177, %179 : vector<8x256xf32>
    %181 = vector.extract_strided_slice %180 {offsets = [0, 0], sizes = [8, 192], strides = [1, 1]} : vector<8x256xf32> to vector<8x192xf32>
    %182 = arith.negf %181 : vector<8x192xf32>
    %183 = math.exp %182 : vector<8x192xf32>
    %cst_63 = arith.constant 1.000000e+00 : f32
    %184 = vector.broadcast %cst_63 : f32 to vector<8x192xf32>
    %185 = arith.addf %184, %183 : vector<8x192xf32>
    %186 = arith.divf %184, %185 : vector<8x192xf32>
    %187 = vector.extract_strided_slice %180 {offsets = [0, 192], sizes = [8, 64], strides = [1, 1]} : vector<8x256xf32> to vector<8x64xf32>
    %188 = math.tanh %187 : vector<8x64xf32>
    %189 = vector.extract_strided_slice %186 {offsets = [0, 0], sizes = [8, 64], strides = [1, 1]} : vector<8x192xf32> to vector<8x64xf32>
    %190 = vector.extract_strided_slice %186 {offsets = [0, 64], sizes = [8, 64], strides = [1, 1]} : vector<8x192xf32> to vector<8x64xf32>
    %191 = vector.extract_strided_slice %186 {offsets = [0, 128], sizes = [8, 64], strides = [1, 1]} : vector<8x192xf32> to vector<8x64xf32>
    %192 = arith.mulf %190, %172 : vector<8x64xf32>
    %193 = arith.mulf %189, %188 : vector<8x64xf32>
    %194 = arith.addf %192, %193 : vector<8x64xf32>
    %195 = math.tanh %194 : vector<8x64xf32>
    %196 = arith.mulf %191, %195 : vector<8x64xf32>
    %197 = vector.extract_strided_slice %84 {offsets = [40, 0], sizes = [8, 256], strides = [1, 1]} : vector<64x512xf32> to vector<8x256xf32>
    %198 = vector.extract_strided_slice %84 {offsets = [16, 256], sizes = [8, 256], strides = [1, 1]} : vector<64x512xf32> to vector<8x256xf32>
    %199 = arith.addf %197, %198 : vector<8x256xf32>
    %200 = arith.truncf %196 : vector<8x64xf32> to vector<8x64xbf16>
    %cst_64 = arith.constant dense<0.000000e+00> : vector<8x256xf32>
    %201 = tpu.matmul %200, %8, %cst_64 {dimension_numbers = #tpu.dot_dimension_numbers<[1], [0], [0], [1], [0, 0, 1, 1], [], []>} : vector<8x64xbf16>, vector<64x256xbf16>, vector<8x256xf32> -> vector<8x256xf32>
    %202 = arith.addf %199, %201 : vector<8x256xf32>
    %203 = vector.extract_strided_slice %202 {offsets = [0, 0], sizes = [8, 192], strides = [1, 1]} : vector<8x256xf32> to vector<8x192xf32>
    %204 = arith.negf %203 : vector<8x192xf32>
    %205 = math.exp %204 : vector<8x192xf32>
    %cst_65 = arith.constant 1.000000e+00 : f32
    %206 = vector.broadcast %cst_65 : f32 to vector<8x192xf32>
    %207 = arith.addf %206, %205 : vector<8x192xf32>
    %208 = arith.divf %206, %207 : vector<8x192xf32>
    %209 = vector.extract_strided_slice %202 {offsets = [0, 192], sizes = [8, 64], strides = [1, 1]} : vector<8x256xf32> to vector<8x64xf32>
    %210 = math.tanh %209 : vector<8x64xf32>
    %211 = vector.extract_strided_slice %208 {offsets = [0, 0], sizes = [8, 64], strides = [1, 1]} : vector<8x192xf32> to vector<8x64xf32>
    %212 = vector.extract_strided_slice %208 {offsets = [0, 64], sizes = [8, 64], strides = [1, 1]} : vector<8x192xf32> to vector<8x64xf32>
    %213 = vector.extract_strided_slice %208 {offsets = [0, 128], sizes = [8, 64], strides = [1, 1]} : vector<8x192xf32> to vector<8x64xf32>
    %214 = arith.mulf %212, %194 : vector<8x64xf32>
    %215 = arith.mulf %211, %210 : vector<8x64xf32>
    %216 = arith.addf %214, %215 : vector<8x64xf32>
    %217 = math.tanh %216 : vector<8x64xf32>
    %218 = arith.mulf %213, %217 : vector<8x64xf32>
    %219 = vector.extract_strided_slice %84 {offsets = [48, 0], sizes = [8, 256], strides = [1, 1]} : vector<64x512xf32> to vector<8x256xf32>
    %220 = vector.extract_strided_slice %84 {offsets = [8, 256], sizes = [8, 256], strides = [1, 1]} : vector<64x512xf32> to vector<8x256xf32>
    %221 = arith.addf %219, %220 : vector<8x256xf32>
    %222 = arith.truncf %218 : vector<8x64xf32> to vector<8x64xbf16>
    %cst_66 = arith.constant dense<0.000000e+00> : vector<8x256xf32>
    %223 = tpu.matmul %222, %8, %cst_66 {dimension_numbers = #tpu.dot_dimension_numbers<[1], [0], [0], [1], [0, 0, 1, 1], [], []>} : vector<8x64xbf16>, vector<64x256xbf16>, vector<8x256xf32> -> vector<8x256xf32>
    %224 = arith.addf %221, %223 : vector<8x256xf32>
    %225 = vector.extract_strided_slice %224 {offsets = [0, 0], sizes = [8, 192], strides = [1, 1]} : vector<8x256xf32> to vector<8x192xf32>
    %226 = arith.negf %225 : vector<8x192xf32>
    %227 = math.exp %226 : vector<8x192xf32>
    %cst_67 = arith.constant 1.000000e+00 : f32
    %228 = vector.broadcast %cst_67 : f32 to vector<8x192xf32>
    %229 = arith.addf %228, %227 : vector<8x192xf32>
    %230 = arith.divf %228, %229 : vector<8x192xf32>
    %231 = vector.extract_strided_slice %224 {offsets = [0, 192], sizes = [8, 64], strides = [1, 1]} : vector<8x256xf32> to vector<8x64xf32>
    %232 = math.tanh %231 : vector<8x64xf32>
    %233 = vector.extract_strided_slice %230 {offsets = [0, 0], sizes = [8, 64], strides = [1, 1]} : vector<8x192xf32> to vector<8x64xf32>
    %234 = vector.extract_strided_slice %230 {offsets = [0, 64], sizes = [8, 64], strides = [1, 1]} : vector<8x192xf32> to vector<8x64xf32>
    %235 = vector.extract_strided_slice %230 {offsets = [0, 128], sizes = [8, 64], strides = [1, 1]} : vector<8x192xf32> to vector<8x64xf32>
    %236 = arith.mulf %234, %216 : vector<8x64xf32>
    %237 = arith.mulf %233, %232 : vector<8x64xf32>
    %238 = arith.addf %236, %237 : vector<8x64xf32>
    %239 = math.tanh %238 : vector<8x64xf32>
    %240 = arith.mulf %235, %239 : vector<8x64xf32>
    %241 = vector.extract_strided_slice %84 {offsets = [56, 0], sizes = [8, 256], strides = [1, 1]} : vector<64x512xf32> to vector<8x256xf32>
    %242 = vector.extract_strided_slice %84 {offsets = [0, 256], sizes = [8, 256], strides = [1, 1]} : vector<64x512xf32> to vector<8x256xf32>
    %243 = arith.addf %241, %242 : vector<8x256xf32>
    %244 = arith.truncf %240 : vector<8x64xf32> to vector<8x64xbf16>
    %cst_68 = arith.constant dense<0.000000e+00> : vector<8x256xf32>
    %245 = tpu.matmul %244, %8, %cst_68 {dimension_numbers = #tpu.dot_dimension_numbers<[1], [0], [0], [1], [0, 0, 1, 1], [], []>} : vector<8x64xbf16>, vector<64x256xbf16>, vector<8x256xf32> -> vector<8x256xf32>
    %246 = arith.addf %243, %245 : vector<8x256xf32>
    %247 = vector.extract_strided_slice %246 {offsets = [0, 0], sizes = [8, 192], strides = [1, 1]} : vector<8x256xf32> to vector<8x192xf32>
    %248 = arith.negf %247 : vector<8x192xf32>
    %249 = math.exp %248 : vector<8x192xf32>
    %cst_69 = arith.constant 1.000000e+00 : f32
    %250 = vector.broadcast %cst_69 : f32 to vector<8x192xf32>
    %251 = arith.addf %250, %249 : vector<8x192xf32>
    %252 = arith.divf %250, %251 : vector<8x192xf32>
    %253 = vector.extract_strided_slice %246 {offsets = [0, 192], sizes = [8, 64], strides = [1, 1]} : vector<8x256xf32> to vector<8x64xf32>
    %254 = math.tanh %253 : vector<8x64xf32>
    %255 = vector.extract_strided_slice %252 {offsets = [0, 0], sizes = [8, 64], strides = [1, 1]} : vector<8x192xf32> to vector<8x64xf32>
    %256 = vector.extract_strided_slice %252 {offsets = [0, 64], sizes = [8, 64], strides = [1, 1]} : vector<8x192xf32> to vector<8x64xf32>
    %257 = vector.extract_strided_slice %252 {offsets = [0, 128], sizes = [8, 64], strides = [1, 1]} : vector<8x192xf32> to vector<8x64xf32>
    %258 = arith.mulf %256, %238 : vector<8x64xf32>
    %259 = arith.mulf %255, %254 : vector<8x64xf32>
    %260 = arith.addf %258, %259 : vector<8x64xf32>
    %261 = math.tanh %260 : vector<8x64xf32>
    %262 = arith.mulf %257, %261 : vector<8x64xf32>
    %263 = arith.truncf %262 : vector<8x64xf32> to vector<8x64xbf16>
    %cst_70 = arith.constant dense<0.000000e+00> : vector<8x32xf32>
    %264 = tpu.matmul %263, %9, %cst_70 {dimension_numbers = #tpu.dot_dimension_numbers<[1], [0], [0], [1], [0, 0, 1, 1], [], []>} : vector<8x64xbf16>, vector<64x32xbf16>, vector<8x32xf32> -> vector<8x32xf32>
    %265 = vector.broadcast %10 : vector<1x32xf32> to vector<8x32xf32>
    %266 = arith.addf %264, %265 : vector<8x32xf32>
    %267 = vector.extract_strided_slice %266 {offsets = [0, 0], sizes = [8, 16], strides = [1, 1]} : vector<8x32xf32> to vector<8x16xf32>
    %268 = vector.extract_strided_slice %266 {offsets = [0, 16], sizes = [8, 16], strides = [1, 1]} : vector<8x32xf32> to vector<8x16xf32>
    %c0_71 = arith.constant 0 : index
    %c0_72 = arith.constant 0 : index
    %269 = vector.load %arg2[%c0_71, %c0_72] : memref<8x16xf32, #tpu.memory_space<vmem>>, vector<8x16xf32>
    %cst_73 = arith.constant 5.000000e-01 : f32
    %270 = vector.broadcast %cst_73 : f32 to vector<8x16xf32>
    %271 = arith.mulf %270, %268 : vector<8x16xf32>
    %272 = math.exp %271 : vector<8x16xf32>
    %273 = arith.mulf %269, %272 : vector<8x16xf32>
    %274 = arith.addf %267, %273 : vector<8x16xf32>
    %275 = vector.extract_strided_slice %267 {offsets = [0, 0], sizes = [2, 16], strides = [1, 1]} : vector<8x16xf32> to vector<2x16xf32>
    %276 = vector.extract_strided_slice %268 {offsets = [0, 0], sizes = [2, 16], strides = [1, 1]} : vector<8x16xf32> to vector<2x16xf32>
    %277 = arith.mulf %275, %275 : vector<2x16xf32>
    %278 = arith.subf %276, %277 : vector<2x16xf32>
    %279 = math.exp %276 : vector<2x16xf32>
    %280 = arith.subf %278, %279 : vector<2x16xf32>
    %cst_74 = arith.constant 1.000000e+00 : f32
    %281 = vector.broadcast %cst_74 : f32 to vector<2x16xf32>
    %282 = arith.addf %280, %281 : vector<2x16xf32>
    %cst_75 = arith.constant dense<0.000000e+00> : vector<2xf32>
    %283 = vector.multi_reduction <add>, %282, %cst_75 [1] : vector<2x16xf32> to vector<2xf32>
    %284 = vector.shape_cast %283 : vector<2xf32> to vector<2x1xf32>
    %cst_76 = arith.constant dense<0.000000e+00> : vector<1xf32>
    %285 = vector.multi_reduction <add>, %284, %cst_76 [0] : vector<2x1xf32> to vector<1xf32>
    %286 = vector.shape_cast %285 : vector<1xf32> to vector<1x1xf32>
    %cst_77 = arith.constant -2.500000e-01 : f32
    %287 = vector.broadcast %cst_77 : f32 to vector<1x1xf32>
    %288 = arith.mulf %287, %286 : vector<1x1xf32>
    %c0_78 = arith.constant 0 : index
    %c0_79 = arith.constant 0 : index
    %289 = vector.load %arg24[%c0_78, %c0_79] : memref<1x1xf32, #tpu.memory_space<vmem>>, vector<1x1xf32>
    tpu.vector_store %arg24[%c0_78, %c0_79], %288 {strides = array<i32>} : memref<1x1xf32, #tpu.memory_space<vmem>>, vector<1x1xf32>,
    %290 = tpu.concatenate %26, %274 in 1 : vector<8x16xf32>, vector<8x16xf32> -> vector<8x32xf32>
    %291 = arith.truncf %290 : vector<8x32xf32> to vector<8x32xbf16>
    %cst_80 = arith.constant dense<0.000000e+00> : vector<8x128xf32>
    %292 = tpu.matmul %291, %12, %cst_80 {dimension_numbers = #tpu.dot_dimension_numbers<[1], [0], [0], [1], [0, 0, 1, 1], [], []>} : vector<8x32xbf16>, vector<32x128xbf16>, vector<8x128xf32> -> vector<8x128xf32>
    %293 = vector.broadcast %13 : vector<1x128xf32> to vector<8x128xf32>
    %294 = arith.addf %292, %293 : vector<8x128xf32>
    %295 = arith.truncf %25 : vector<64x32xf32> to vector<64x32xbf16>
    %cst_81 = arith.constant dense<0.000000e+00> : vector<64x128xf32>
    %296 = tpu.matmul %295, %11, %cst_81 {dimension_numbers = #tpu.dot_dimension_numbers<[1], [0], [0], [1], [0, 0, 1, 1], [], []>} : vector<64x32xbf16>, vector<32x128xbf16>, vector<64x128xf32> -> vector<64x128xf32>
    %297 = tpu.concatenate %294, %294, %294, %294, %294, %294, %294, %294 in 0 : vector<8x128xf32>, vector<8x128xf32>, vector<8x128xf32>, vector<8x128xf32>, vector<8x128xf32>, vector<8x128xf32>, vector<8x128xf32>, vector<8x128xf32> -> vector<64x128xf32>
    %298 = arith.addf %296, %297 : vector<64x128xf32>
    %cst_82 = arith.constant 0.000000e+00 : f32
    %299 = vector.broadcast %cst_82 : f32 to vector<8x32xf32>
    %cst_83 = arith.constant 0.000000e+00 : f32
    %300 = vector.broadcast %cst_83 : f32 to vector<8x32xf32>
    %cst_84 = arith.constant 0.000000e+00 : f32
    %301 = vector.broadcast %cst_84 : f32 to vector<8x32xf32>
    %cst_85 = arith.constant 0.000000e+00 : f32
    %302 = vector.broadcast %cst_85 : f32 to vector<8x128xf32>
    %303 = vector.extract_strided_slice %298 {offsets = [0, 0], sizes = [8, 128], strides = [1, 1]} : vector<64x128xf32> to vector<8x128xf32>
    %304 = arith.addf %303, %302 : vector<8x128xf32>
    %305 = vector.extract_strided_slice %304 {offsets = [0, 0], sizes = [8, 96], strides = [1, 1]} : vector<8x128xf32> to vector<8x96xf32>
    %306 = arith.negf %305 : vector<8x96xf32>
    %307 = math.exp %306 : vector<8x96xf32>
    %cst_86 = arith.constant 1.000000e+00 : f32
    %308 = vector.broadcast %cst_86 : f32 to vector<8x96xf32>
    %309 = arith.addf %308, %307 : vector<8x96xf32>
    %310 = arith.divf %308, %309 : vector<8x96xf32>
    %311 = vector.extract_strided_slice %304 {offsets = [0, 96], sizes = [8, 32], strides = [1, 1]} : vector<8x128xf32> to vector<8x32xf32>
    %312 = math.tanh %311 : vector<8x32xf32>
    %313 = vector.extract_strided_slice %310 {offsets = [0, 0], sizes = [8, 32], strides = [1, 1]} : vector<8x96xf32> to vector<8x32xf32>
    %314 = vector.extract_strided_slice %310 {offsets = [0, 32], sizes = [8, 32], strides = [1, 1]} : vector<8x96xf32> to vector<8x32xf32>
    %315 = vector.extract_strided_slice %310 {offsets = [0, 64], sizes = [8, 32], strides = [1, 1]} : vector<8x96xf32> to vector<8x32xf32>
    %316 = arith.mulf %314, %299 : vector<8x32xf32>
    %317 = arith.mulf %313, %312 : vector<8x32xf32>
    %318 = arith.addf %316, %317 : vector<8x32xf32>
    %319 = math.tanh %318 : vector<8x32xf32>
    %320 = arith.mulf %315, %319 : vector<8x32xf32>
    %321 = tpu.concatenate %320, %300 in 1 : vector<8x32xf32>, vector<8x32xf32> -> vector<8x64xf32>
    %322 = arith.truncf %321 : vector<8x64xf32> to vector<8x64xbf16>
    %cst_87 = arith.constant dense<0.000000e+00> : vector<8x256xf32>
    %323 = tpu.matmul %322, %14, %cst_87 {dimension_numbers = #tpu.dot_dimension_numbers<[1], [0], [0], [1], [0, 0, 1, 1], [], []>} : vector<8x64xbf16>, vector<64x256xbf16>, vector<8x256xf32> -> vector<8x256xf32>
    %324 = vector.extract_strided_slice %323 {offsets = [0, 0], sizes = [8, 128], strides = [1, 1]} : vector<8x256xf32> to vector<8x128xf32>
    %325 = vector.broadcast %15 : vector<1x128xf32> to vector<8x128xf32>
    %326 = arith.addf %324, %325 : vector<8x128xf32>
    %327 = vector.extract_strided_slice %323 {offsets = [0, 128], sizes = [8, 128], strides = [1, 1]} : vector<8x256xf32> to vector<8x128xf32>
    %328 = vector.extract_strided_slice %326 {offsets = [0, 0], sizes = [8, 96], strides = [1, 1]} : vector<8x128xf32> to vector<8x96xf32>
    %329 = arith.negf %328 : vector<8x96xf32>
    %330 = math.exp %329 : vector<8x96xf32>
    %cst_88 = arith.constant 1.000000e+00 : f32
    %331 = vector.broadcast %cst_88 : f32 to vector<8x96xf32>
    %332 = arith.addf %331, %330 : vector<8x96xf32>
    %333 = arith.divf %331, %332 : vector<8x96xf32>
    %334 = vector.extract_strided_slice %326 {offsets = [0, 96], sizes = [8, 32], strides = [1, 1]} : vector<8x128xf32> to vector<8x32xf32>
    %335 = math.tanh %334 : vector<8x32xf32>
    %336 = vector.extract_strided_slice %333 {offsets = [0, 0], sizes = [8, 32], strides = [1, 1]} : vector<8x96xf32> to vector<8x32xf32>
    %337 = vector.extract_strided_slice %333 {offsets = [0, 32], sizes = [8, 32], strides = [1, 1]} : vector<8x96xf32> to vector<8x32xf32>
    %338 = vector.extract_strided_slice %333 {offsets = [0, 64], sizes = [8, 32], strides = [1, 1]} : vector<8x96xf32> to vector<8x32xf32>
    %339 = arith.mulf %337, %301 : vector<8x32xf32>
    %340 = arith.mulf %336, %335 : vector<8x32xf32>
    %341 = arith.addf %339, %340 : vector<8x32xf32>
    %342 = math.tanh %341 : vector<8x32xf32>
    %343 = arith.mulf %338, %342 : vector<8x32xf32>
    %344 = vector.extract_strided_slice %298 {offsets = [8, 0], sizes = [8, 128], strides = [1, 1]} : vector<64x128xf32> to vector<8x128xf32>
    %345 = arith.addf %344, %327 : vector<8x128xf32>
    %346 = vector.extract_strided_slice %345 {offsets = [0, 0], sizes = [8, 96], strides = [1, 1]} : vector<8x128xf32> to vector<8x96xf32>
    %347 = arith.negf %346 : vector<8x96xf32>
    %348 = math.exp %347 : vector<8x96xf32>
    %cst_89 = arith.constant 1.000000e+00 : f32
    %349 = vector.broadcast %cst_89 : f32 to vector<8x96xf32>
    %350 = arith.addf %349, %348 : vector<8x96xf32>
    %351 = arith.divf %349, %350 : vector<8x96xf32>
    %352 = vector.extract_strided_slice %345 {offsets = [0, 96], sizes = [8, 32], strides = [1, 1]} : vector<8x128xf32> to vector<8x32xf32>
    %353 = math.tanh %352 : vector<8x32xf32>
    %354 = vector.extract_strided_slice %351 {offsets = [0, 0], sizes = [8, 32], strides = [1, 1]} : vector<8x96xf32> to vector<8x32xf32>
    %355 = vector.extract_strided_slice %351 {offsets = [0, 32], sizes = [8, 32], strides = [1, 1]} : vector<8x96xf32> to vector<8x32xf32>
    %356 = vector.extract_strided_slice %351 {offsets = [0, 64], sizes = [8, 32], strides = [1, 1]} : vector<8x96xf32> to vector<8x32xf32>
    %357 = arith.mulf %355, %318 : vector<8x32xf32>
    %358 = arith.mulf %354, %353 : vector<8x32xf32>
    %359 = arith.addf %357, %358 : vector<8x32xf32>
    %360 = math.tanh %359 : vector<8x32xf32>
    %361 = arith.mulf %356, %360 : vector<8x32xf32>
    %362 = tpu.concatenate %361, %343 in 1 : vector<8x32xf32>, vector<8x32xf32> -> vector<8x64xf32>
    %363 = arith.truncf %362 : vector<8x64xf32> to vector<8x64xbf16>
    %cst_90 = arith.constant dense<0.000000e+00> : vector<8x256xf32>
    %364 = tpu.matmul %363, %14, %cst_90 {dimension_numbers = #tpu.dot_dimension_numbers<[1], [0], [0], [1], [0, 0, 1, 1], [], []>} : vector<8x64xbf16>, vector<64x256xbf16>, vector<8x256xf32> -> vector<8x256xf32>
    %365 = vector.extract_strided_slice %364 {offsets = [0, 0], sizes = [8, 128], strides = [1, 1]} : vector<8x256xf32> to vector<8x128xf32>
    %366 = vector.broadcast %15 : vector<1x128xf32> to vector<8x128xf32>
    %367 = arith.addf %365, %366 : vector<8x128xf32>
    %368 = vector.extract_strided_slice %364 {offsets = [0, 128], sizes = [8, 128], strides = [1, 1]} : vector<8x256xf32> to vector<8x128xf32>
    %369 = vector.extract_strided_slice %367 {offsets = [0, 0], sizes = [8, 96], strides = [1, 1]} : vector<8x128xf32> to vector<8x96xf32>
    %370 = arith.negf %369 : vector<8x96xf32>
    %371 = math.exp %370 : vector<8x96xf32>
    %cst_91 = arith.constant 1.000000e+00 : f32
    %372 = vector.broadcast %cst_91 : f32 to vector<8x96xf32>
    %373 = arith.addf %372, %371 : vector<8x96xf32>
    %374 = arith.divf %372, %373 : vector<8x96xf32>
    %375 = vector.extract_strided_slice %367 {offsets = [0, 96], sizes = [8, 32], strides = [1, 1]} : vector<8x128xf32> to vector<8x32xf32>
    %376 = math.tanh %375 : vector<8x32xf32>
    %377 = vector.extract_strided_slice %374 {offsets = [0, 0], sizes = [8, 32], strides = [1, 1]} : vector<8x96xf32> to vector<8x32xf32>
    %378 = vector.extract_strided_slice %374 {offsets = [0, 32], sizes = [8, 32], strides = [1, 1]} : vector<8x96xf32> to vector<8x32xf32>
    %379 = vector.extract_strided_slice %374 {offsets = [0, 64], sizes = [8, 32], strides = [1, 1]} : vector<8x96xf32> to vector<8x32xf32>
    %380 = arith.mulf %378, %341 : vector<8x32xf32>
    %381 = arith.mulf %377, %376 : vector<8x32xf32>
    %382 = arith.addf %380, %381 : vector<8x32xf32>
    %383 = math.tanh %382 : vector<8x32xf32>
    %384 = arith.mulf %379, %383 : vector<8x32xf32>
    %385 = vector.extract_strided_slice %298 {offsets = [16, 0], sizes = [8, 128], strides = [1, 1]} : vector<64x128xf32> to vector<8x128xf32>
    %386 = arith.addf %385, %368 : vector<8x128xf32>
    %387 = vector.extract_strided_slice %386 {offsets = [0, 0], sizes = [8, 96], strides = [1, 1]} : vector<8x128xf32> to vector<8x96xf32>
    %388 = arith.negf %387 : vector<8x96xf32>
    %389 = math.exp %388 : vector<8x96xf32>
    %cst_92 = arith.constant 1.000000e+00 : f32
    %390 = vector.broadcast %cst_92 : f32 to vector<8x96xf32>
    %391 = arith.addf %390, %389 : vector<8x96xf32>
    %392 = arith.divf %390, %391 : vector<8x96xf32>
    %393 = vector.extract_strided_slice %386 {offsets = [0, 96], sizes = [8, 32], strides = [1, 1]} : vector<8x128xf32> to vector<8x32xf32>
    %394 = math.tanh %393 : vector<8x32xf32>
    %395 = vector.extract_strided_slice %392 {offsets = [0, 0], sizes = [8, 32], strides = [1, 1]} : vector<8x96xf32> to vector<8x32xf32>
    %396 = vector.extract_strided_slice %392 {offsets = [0, 32], sizes = [8, 32], strides = [1, 1]} : vector<8x96xf32> to vector<8x32xf32>
    %397 = vector.extract_strided_slice %392 {offsets = [0, 64], sizes = [8, 32], strides = [1, 1]} : vector<8x96xf32> to vector<8x32xf32>
    %398 = arith.mulf %396, %359 : vector<8x32xf32>
    %399 = arith.mulf %395, %394 : vector<8x32xf32>
    %400 = arith.addf %398, %399 : vector<8x32xf32>
    %401 = math.tanh %400 : vector<8x32xf32>
    %402 = arith.mulf %397, %401 : vector<8x32xf32>
    %403 = tpu.concatenate %402, %384 in 1 : vector<8x32xf32>, vector<8x32xf32> -> vector<8x64xf32>
    %404 = arith.truncf %403 : vector<8x64xf32> to vector<8x64xbf16>
    %cst_93 = arith.constant dense<0.000000e+00> : vector<8x256xf32>
    %405 = tpu.matmul %404, %14, %cst_93 {dimension_numbers = #tpu.dot_dimension_numbers<[1], [0], [0], [1], [0, 0, 1, 1], [], []>} : vector<8x64xbf16>, vector<64x256xbf16>, vector<8x256xf32> -> vector<8x256xf32>
    %406 = vector.extract_strided_slice %405 {offsets = [0, 0], sizes = [8, 128], strides = [1, 1]} : vector<8x256xf32> to vector<8x128xf32>
    %407 = vector.broadcast %15 : vector<1x128xf32> to vector<8x128xf32>
    %408 = arith.addf %406, %407 : vector<8x128xf32>
    %409 = vector.extract_strided_slice %405 {offsets = [0, 128], sizes = [8, 128], strides = [1, 1]} : vector<8x256xf32> to vector<8x128xf32>
    %410 = vector.extract_strided_slice %408 {offsets = [0, 0], sizes = [8, 96], strides = [1, 1]} : vector<8x128xf32> to vector<8x96xf32>
    %411 = arith.negf %410 : vector<8x96xf32>
    %412 = math.exp %411 : vector<8x96xf32>
    %cst_94 = arith.constant 1.000000e+00 : f32
    %413 = vector.broadcast %cst_94 : f32 to vector<8x96xf32>
    %414 = arith.addf %413, %412 : vector<8x96xf32>
    %415 = arith.divf %413, %414 : vector<8x96xf32>
    %416 = vector.extract_strided_slice %408 {offsets = [0, 96], sizes = [8, 32], strides = [1, 1]} : vector<8x128xf32> to vector<8x32xf32>
    %417 = math.tanh %416 : vector<8x32xf32>
    %418 = vector.extract_strided_slice %415 {offsets = [0, 0], sizes = [8, 32], strides = [1, 1]} : vector<8x96xf32> to vector<8x32xf32>
    %419 = vector.extract_strided_slice %415 {offsets = [0, 32], sizes = [8, 32], strides = [1, 1]} : vector<8x96xf32> to vector<8x32xf32>
    %420 = vector.extract_strided_slice %415 {offsets = [0, 64], sizes = [8, 32], strides = [1, 1]} : vector<8x96xf32> to vector<8x32xf32>
    %421 = arith.mulf %419, %382 : vector<8x32xf32>
    %422 = arith.mulf %418, %417 : vector<8x32xf32>
    %423 = arith.addf %421, %422 : vector<8x32xf32>
    %424 = math.tanh %423 : vector<8x32xf32>
    %425 = arith.mulf %420, %424 : vector<8x32xf32>
    %426 = vector.extract_strided_slice %298 {offsets = [24, 0], sizes = [8, 128], strides = [1, 1]} : vector<64x128xf32> to vector<8x128xf32>
    %427 = arith.addf %426, %409 : vector<8x128xf32>
    %428 = vector.extract_strided_slice %427 {offsets = [0, 0], sizes = [8, 96], strides = [1, 1]} : vector<8x128xf32> to vector<8x96xf32>
    %429 = arith.negf %428 : vector<8x96xf32>
    %430 = math.exp %429 : vector<8x96xf32>
    %cst_95 = arith.constant 1.000000e+00 : f32
    %431 = vector.broadcast %cst_95 : f32 to vector<8x96xf32>
    %432 = arith.addf %431, %430 : vector<8x96xf32>
    %433 = arith.divf %431, %432 : vector<8x96xf32>
    %434 = vector.extract_strided_slice %427 {offsets = [0, 96], sizes = [8, 32], strides = [1, 1]} : vector<8x128xf32> to vector<8x32xf32>
    %435 = math.tanh %434 : vector<8x32xf32>
    %436 = vector.extract_strided_slice %433 {offsets = [0, 0], sizes = [8, 32], strides = [1, 1]} : vector<8x96xf32> to vector<8x32xf32>
    %437 = vector.extract_strided_slice %433 {offsets = [0, 32], sizes = [8, 32], strides = [1, 1]} : vector<8x96xf32> to vector<8x32xf32>
    %438 = vector.extract_strided_slice %433 {offsets = [0, 64], sizes = [8, 32], strides = [1, 1]} : vector<8x96xf32> to vector<8x32xf32>
    %439 = arith.mulf %437, %400 : vector<8x32xf32>
    %440 = arith.mulf %436, %435 : vector<8x32xf32>
    %441 = arith.addf %439, %440 : vector<8x32xf32>
    %442 = math.tanh %441 : vector<8x32xf32>
    %443 = arith.mulf %438, %442 : vector<8x32xf32>
    %444 = tpu.concatenate %443, %425 in 1 : vector<8x32xf32>, vector<8x32xf32> -> vector<8x64xf32>
    %445 = arith.truncf %444 : vector<8x64xf32> to vector<8x64xbf16>
    %cst_96 = arith.constant dense<0.000000e+00> : vector<8x256xf32>
    %446 = tpu.matmul %445, %14, %cst_96 {dimension_numbers = #tpu.dot_dimension_numbers<[1], [0], [0], [1], [0, 0, 1, 1], [], []>} : vector<8x64xbf16>, vector<64x256xbf16>, vector<8x256xf32> -> vector<8x256xf32>
    %447 = vector.extract_strided_slice %446 {offsets = [0, 0], sizes = [8, 128], strides = [1, 1]} : vector<8x256xf32> to vector<8x128xf32>
    %448 = vector.broadcast %15 : vector<1x128xf32> to vector<8x128xf32>
    %449 = arith.addf %447, %448 : vector<8x128xf32>
    %450 = vector.extract_strided_slice %446 {offsets = [0, 128], sizes = [8, 128], strides = [1, 1]} : vector<8x256xf32> to vector<8x128xf32>
    %451 = vector.extract_strided_slice %449 {offsets = [0, 0], sizes = [8, 96], strides = [1, 1]} : vector<8x128xf32> to vector<8x96xf32>
    %452 = arith.negf %451 : vector<8x96xf32>
    %453 = math.exp %452 : vector<8x96xf32>
    %cst_97 = arith.constant 1.000000e+00 : f32
    %454 = vector.broadcast %cst_97 : f32 to vector<8x96xf32>
    %455 = arith.addf %454, %453 : vector<8x96xf32>
    %456 = arith.divf %454, %455 : vector<8x96xf32>
    %457 = vector.extract_strided_slice %449 {offsets = [0, 96], sizes = [8, 32], strides = [1, 1]} : vector<8x128xf32> to vector<8x32xf32>
    %458 = math.tanh %457 : vector<8x32xf32>
    %459 = vector.extract_strided_slice %456 {offsets = [0, 0], sizes = [8, 32], strides = [1, 1]} : vector<8x96xf32> to vector<8x32xf32>
    %460 = vector.extract_strided_slice %456 {offsets = [0, 32], sizes = [8, 32], strides = [1, 1]} : vector<8x96xf32> to vector<8x32xf32>
    %461 = vector.extract_strided_slice %456 {offsets = [0, 64], sizes = [8, 32], strides = [1, 1]} : vector<8x96xf32> to vector<8x32xf32>
    %462 = arith.mulf %460, %423 : vector<8x32xf32>
    %463 = arith.mulf %459, %458 : vector<8x32xf32>
    %464 = arith.addf %462, %463 : vector<8x32xf32>
    %465 = math.tanh %464 : vector<8x32xf32>
    %466 = arith.mulf %461, %465 : vector<8x32xf32>
    %467 = vector.extract_strided_slice %298 {offsets = [32, 0], sizes = [8, 128], strides = [1, 1]} : vector<64x128xf32> to vector<8x128xf32>
    %468 = arith.addf %467, %450 : vector<8x128xf32>
    %469 = vector.extract_strided_slice %468 {offsets = [0, 0], sizes = [8, 96], strides = [1, 1]} : vector<8x128xf32> to vector<8x96xf32>
    %470 = arith.negf %469 : vector<8x96xf32>
    %471 = math.exp %470 : vector<8x96xf32>
    %cst_98 = arith.constant 1.000000e+00 : f32
    %472 = vector.broadcast %cst_98 : f32 to vector<8x96xf32>
    %473 = arith.addf %472, %471 : vector<8x96xf32>
    %474 = arith.divf %472, %473 : vector<8x96xf32>
    %475 = vector.extract_strided_slice %468 {offsets = [0, 96], sizes = [8, 32], strides = [1, 1]} : vector<8x128xf32> to vector<8x32xf32>
    %476 = math.tanh %475 : vector<8x32xf32>
    %477 = vector.extract_strided_slice %474 {offsets = [0, 0], sizes = [8, 32], strides = [1, 1]} : vector<8x96xf32> to vector<8x32xf32>
    %478 = vector.extract_strided_slice %474 {offsets = [0, 32], sizes = [8, 32], strides = [1, 1]} : vector<8x96xf32> to vector<8x32xf32>
    %479 = vector.extract_strided_slice %474 {offsets = [0, 64], sizes = [8, 32], strides = [1, 1]} : vector<8x96xf32> to vector<8x32xf32>
    %480 = arith.mulf %478, %441 : vector<8x32xf32>
    %481 = arith.mulf %477, %476 : vector<8x32xf32>
    %482 = arith.addf %480, %481 : vector<8x32xf32>
    %483 = math.tanh %482 : vector<8x32xf32>
    %484 = arith.mulf %479, %483 : vector<8x32xf32>
    %485 = tpu.concatenate %484, %466 in 1 : vector<8x32xf32>, vector<8x32xf32> -> vector<8x64xf32>
    %486 = arith.truncf %485 : vector<8x64xf32> to vector<8x64xbf16>
    %cst_99 = arith.constant dense<0.000000e+00> : vector<8x256xf32>
    %487 = tpu.matmul %486, %14, %cst_99 {dimension_numbers = #tpu.dot_dimension_numbers<[1], [0], [0], [1], [0, 0, 1, 1], [], []>} : vector<8x64xbf16>, vector<64x256xbf16>, vector<8x256xf32> -> vector<8x256xf32>
    %488 = vector.extract_strided_slice %487 {offsets = [0, 0], sizes = [8, 128], strides = [1, 1]} : vector<8x256xf32> to vector<8x128xf32>
    %489 = vector.broadcast %15 : vector<1x128xf32> to vector<8x128xf32>
    %490 = arith.addf %488, %489 : vector<8x128xf32>
    %491 = vector.extract_strided_slice %487 {offsets = [0, 128], sizes = [8, 128], strides = [1, 1]} : vector<8x256xf32> to vector<8x128xf32>
    %492 = vector.extract_strided_slice %490 {offsets = [0, 0], sizes = [8, 96], strides = [1, 1]} : vector<8x128xf32> to vector<8x96xf32>
    %493 = arith.negf %492 : vector<8x96xf32>
    %494 = math.exp %493 : vector<8x96xf32>
    %cst_100 = arith.constant 1.000000e+00 : f32
    %495 = vector.broadcast %cst_100 : f32 to vector<8x96xf32>
    %496 = arith.addf %495, %494 : vector<8x96xf32>
    %497 = arith.divf %495, %496 : vector<8x96xf32>
    %498 = vector.extract_strided_slice %490 {offsets = [0, 96], sizes = [8, 32], strides = [1, 1]} : vector<8x128xf32> to vector<8x32xf32>
    %499 = math.tanh %498 : vector<8x32xf32>
    %500 = vector.extract_strided_slice %497 {offsets = [0, 0], sizes = [8, 32], strides = [1, 1]} : vector<8x96xf32> to vector<8x32xf32>
    %501 = vector.extract_strided_slice %497 {offsets = [0, 32], sizes = [8, 32], strides = [1, 1]} : vector<8x96xf32> to vector<8x32xf32>
    %502 = vector.extract_strided_slice %497 {offsets = [0, 64], sizes = [8, 32], strides = [1, 1]} : vector<8x96xf32> to vector<8x32xf32>
    %503 = arith.mulf %501, %464 : vector<8x32xf32>
    %504 = arith.mulf %500, %499 : vector<8x32xf32>
    %505 = arith.addf %503, %504 : vector<8x32xf32>
    %506 = math.tanh %505 : vector<8x32xf32>
    %507 = arith.mulf %502, %506 : vector<8x32xf32>
    %508 = vector.extract_strided_slice %298 {offsets = [40, 0], sizes = [8, 128], strides = [1, 1]} : vector<64x128xf32> to vector<8x128xf32>
    %509 = arith.addf %508, %491 : vector<8x128xf32>
    %510 = vector.extract_strided_slice %509 {offsets = [0, 0], sizes = [8, 96], strides = [1, 1]} : vector<8x128xf32> to vector<8x96xf32>
    %511 = arith.negf %510 : vector<8x96xf32>
    %512 = math.exp %511 : vector<8x96xf32>
    %cst_101 = arith.constant 1.000000e+00 : f32
    %513 = vector.broadcast %cst_101 : f32 to vector<8x96xf32>
    %514 = arith.addf %513, %512 : vector<8x96xf32>
    %515 = arith.divf %513, %514 : vector<8x96xf32>
    %516 = vector.extract_strided_slice %509 {offsets = [0, 96], sizes = [8, 32], strides = [1, 1]} : vector<8x128xf32> to vector<8x32xf32>
    %517 = math.tanh %516 : vector<8x32xf32>
    %518 = vector.extract_strided_slice %515 {offsets = [0, 0], sizes = [8, 32], strides = [1, 1]} : vector<8x96xf32> to vector<8x32xf32>
    %519 = vector.extract_strided_slice %515 {offsets = [0, 32], sizes = [8, 32], strides = [1, 1]} : vector<8x96xf32> to vector<8x32xf32>
    %520 = vector.extract_strided_slice %515 {offsets = [0, 64], sizes = [8, 32], strides = [1, 1]} : vector<8x96xf32> to vector<8x32xf32>
    %521 = arith.mulf %519, %482 : vector<8x32xf32>
    %522 = arith.mulf %518, %517 : vector<8x32xf32>
    %523 = arith.addf %521, %522 : vector<8x32xf32>
    %524 = math.tanh %523 : vector<8x32xf32>
    %525 = arith.mulf %520, %524 : vector<8x32xf32>
    %526 = tpu.concatenate %525, %507 in 1 : vector<8x32xf32>, vector<8x32xf32> -> vector<8x64xf32>
    %527 = arith.truncf %526 : vector<8x64xf32> to vector<8x64xbf16>
    %cst_102 = arith.constant dense<0.000000e+00> : vector<8x256xf32>
    %528 = tpu.matmul %527, %14, %cst_102 {dimension_numbers = #tpu.dot_dimension_numbers<[1], [0], [0], [1], [0, 0, 1, 1], [], []>} : vector<8x64xbf16>, vector<64x256xbf16>, vector<8x256xf32> -> vector<8x256xf32>
    %529 = vector.extract_strided_slice %528 {offsets = [0, 0], sizes = [8, 128], strides = [1, 1]} : vector<8x256xf32> to vector<8x128xf32>
    %530 = vector.broadcast %15 : vector<1x128xf32> to vector<8x128xf32>
    %531 = arith.addf %529, %530 : vector<8x128xf32>
    %532 = vector.extract_strided_slice %528 {offsets = [0, 128], sizes = [8, 128], strides = [1, 1]} : vector<8x256xf32> to vector<8x128xf32>
    %533 = vector.extract_strided_slice %531 {offsets = [0, 0], sizes = [8, 96], strides = [1, 1]} : vector<8x128xf32> to vector<8x96xf32>
    %534 = arith.negf %533 : vector<8x96xf32>
    %535 = math.exp %534 : vector<8x96xf32>
    %cst_103 = arith.constant 1.000000e+00 : f32
    %536 = vector.broadcast %cst_103 : f32 to vector<8x96xf32>
    %537 = arith.addf %536, %535 : vector<8x96xf32>
    %538 = arith.divf %536, %537 : vector<8x96xf32>
    %539 = vector.extract_strided_slice %531 {offsets = [0, 96], sizes = [8, 32], strides = [1, 1]} : vector<8x128xf32> to vector<8x32xf32>
    %540 = math.tanh %539 : vector<8x32xf32>
    %541 = vector.extract_strided_slice %538 {offsets = [0, 0], sizes = [8, 32], strides = [1, 1]} : vector<8x96xf32> to vector<8x32xf32>
    %542 = vector.extract_strided_slice %538 {offsets = [0, 32], sizes = [8, 32], strides = [1, 1]} : vector<8x96xf32> to vector<8x32xf32>
    %543 = vector.extract_strided_slice %538 {offsets = [0, 64], sizes = [8, 32], strides = [1, 1]} : vector<8x96xf32> to vector<8x32xf32>
    %544 = arith.mulf %542, %505 : vector<8x32xf32>
    %545 = arith.mulf %541, %540 : vector<8x32xf32>
    %546 = arith.addf %544, %545 : vector<8x32xf32>
    %547 = math.tanh %546 : vector<8x32xf32>
    %548 = arith.mulf %543, %547 : vector<8x32xf32>
    %549 = vector.extract_strided_slice %298 {offsets = [48, 0], sizes = [8, 128], strides = [1, 1]} : vector<64x128xf32> to vector<8x128xf32>
    %550 = arith.addf %549, %532 : vector<8x128xf32>
    %551 = vector.extract_strided_slice %550 {offsets = [0, 0], sizes = [8, 96], strides = [1, 1]} : vector<8x128xf32> to vector<8x96xf32>
    %552 = arith.negf %551 : vector<8x96xf32>
    %553 = math.exp %552 : vector<8x96xf32>
    %cst_104 = arith.constant 1.000000e+00 : f32
    %554 = vector.broadcast %cst_104 : f32 to vector<8x96xf32>
    %555 = arith.addf %554, %553 : vector<8x96xf32>
    %556 = arith.divf %554, %555 : vector<8x96xf32>
    %557 = vector.extract_strided_slice %550 {offsets = [0, 96], sizes = [8, 32], strides = [1, 1]} : vector<8x128xf32> to vector<8x32xf32>
    %558 = math.tanh %557 : vector<8x32xf32>
    %559 = vector.extract_strided_slice %556 {offsets = [0, 0], sizes = [8, 32], strides = [1, 1]} : vector<8x96xf32> to vector<8x32xf32>
    %560 = vector.extract_strided_slice %556 {offsets = [0, 32], sizes = [8, 32], strides = [1, 1]} : vector<8x96xf32> to vector<8x32xf32>
    %561 = vector.extract_strided_slice %556 {offsets = [0, 64], sizes = [8, 32], strides = [1, 1]} : vector<8x96xf32> to vector<8x32xf32>
    %562 = arith.mulf %560, %523 : vector<8x32xf32>
    %563 = arith.mulf %559, %558 : vector<8x32xf32>
    %564 = arith.addf %562, %563 : vector<8x32xf32>
    %565 = math.tanh %564 : vector<8x32xf32>
    %566 = arith.mulf %561, %565 : vector<8x32xf32>
    %567 = tpu.concatenate %566, %548 in 1 : vector<8x32xf32>, vector<8x32xf32> -> vector<8x64xf32>
    %568 = arith.truncf %567 : vector<8x64xf32> to vector<8x64xbf16>
    %cst_105 = arith.constant dense<0.000000e+00> : vector<8x256xf32>
    %569 = tpu.matmul %568, %14, %cst_105 {dimension_numbers = #tpu.dot_dimension_numbers<[1], [0], [0], [1], [0, 0, 1, 1], [], []>} : vector<8x64xbf16>, vector<64x256xbf16>, vector<8x256xf32> -> vector<8x256xf32>
    %570 = vector.extract_strided_slice %569 {offsets = [0, 0], sizes = [8, 128], strides = [1, 1]} : vector<8x256xf32> to vector<8x128xf32>
    %571 = vector.broadcast %15 : vector<1x128xf32> to vector<8x128xf32>
    %572 = arith.addf %570, %571 : vector<8x128xf32>
    %573 = vector.extract_strided_slice %569 {offsets = [0, 128], sizes = [8, 128], strides = [1, 1]} : vector<8x256xf32> to vector<8x128xf32>
    %574 = vector.extract_strided_slice %572 {offsets = [0, 0], sizes = [8, 96], strides = [1, 1]} : vector<8x128xf32> to vector<8x96xf32>
    %575 = arith.negf %574 : vector<8x96xf32>
    %576 = math.exp %575 : vector<8x96xf32>
    %cst_106 = arith.constant 1.000000e+00 : f32
    %577 = vector.broadcast %cst_106 : f32 to vector<8x96xf32>
    %578 = arith.addf %577, %576 : vector<8x96xf32>
    %579 = arith.divf %577, %578 : vector<8x96xf32>
    %580 = vector.extract_strided_slice %572 {offsets = [0, 96], sizes = [8, 32], strides = [1, 1]} : vector<8x128xf32> to vector<8x32xf32>
    %581 = math.tanh %580 : vector<8x32xf32>
    %582 = vector.extract_strided_slice %579 {offsets = [0, 0], sizes = [8, 32], strides = [1, 1]} : vector<8x96xf32> to vector<8x32xf32>
    %583 = vector.extract_strided_slice %579 {offsets = [0, 32], sizes = [8, 32], strides = [1, 1]} : vector<8x96xf32> to vector<8x32xf32>
    %584 = vector.extract_strided_slice %579 {offsets = [0, 64], sizes = [8, 32], strides = [1, 1]} : vector<8x96xf32> to vector<8x32xf32>
    %585 = arith.mulf %583, %546 : vector<8x32xf32>
    %586 = arith.mulf %582, %581 : vector<8x32xf32>
    %587 = arith.addf %585, %586 : vector<8x32xf32>
    %588 = math.tanh %587 : vector<8x32xf32>
    %589 = arith.mulf %584, %588 : vector<8x32xf32>
    %590 = vector.extract_strided_slice %298 {offsets = [56, 0], sizes = [8, 128], strides = [1, 1]} : vector<64x128xf32> to vector<8x128xf32>
    %591 = arith.addf %590, %573 : vector<8x128xf32>
    %592 = vector.extract_strided_slice %591 {offsets = [0, 0], sizes = [8, 96], strides = [1, 1]} : vector<8x128xf32> to vector<8x96xf32>
    %593 = arith.negf %592 : vector<8x96xf32>
    %594 = math.exp %593 : vector<8x96xf32>
    %cst_107 = arith.constant 1.000000e+00 : f32
    %595 = vector.broadcast %cst_107 : f32 to vector<8x96xf32>
    %596 = arith.addf %595, %594 : vector<8x96xf32>
    %597 = arith.divf %595, %596 : vector<8x96xf32>
    %598 = vector.extract_strided_slice %591 {offsets = [0, 96], sizes = [8, 32], strides = [1, 1]} : vector<8x128xf32> to vector<8x32xf32>
    %599 = math.tanh %598 : vector<8x32xf32>
    %600 = vector.extract_strided_slice %597 {offsets = [0, 0], sizes = [8, 32], strides = [1, 1]} : vector<8x96xf32> to vector<8x32xf32>
    %601 = vector.extract_strided_slice %597 {offsets = [0, 32], sizes = [8, 32], strides = [1, 1]} : vector<8x96xf32> to vector<8x32xf32>
    %602 = vector.extract_strided_slice %597 {offsets = [0, 64], sizes = [8, 32], strides = [1, 1]} : vector<8x96xf32> to vector<8x32xf32>
    %603 = arith.mulf %601, %564 : vector<8x32xf32>
    %604 = arith.mulf %600, %599 : vector<8x32xf32>
    %605 = arith.addf %603, %604 : vector<8x32xf32>
    %606 = math.tanh %605 : vector<8x32xf32>
    %607 = arith.mulf %602, %606 : vector<8x32xf32>
    %608 = tpu.concatenate %607, %589 in 1 : vector<8x32xf32>, vector<8x32xf32> -> vector<8x64xf32>
    %609 = arith.truncf %608 : vector<8x64xf32> to vector<8x64xbf16>
    %cst_108 = arith.constant dense<0.000000e+00> : vector<8x256xf32>
    %610 = tpu.matmul %609, %14, %cst_108 {dimension_numbers = #tpu.dot_dimension_numbers<[1], [0], [0], [1], [0, 0, 1, 1], [], []>} : vector<8x64xbf16>, vector<64x256xbf16>, vector<8x256xf32> -> vector<8x256xf32>
    %611 = vector.extract_strided_slice %610 {offsets = [0, 0], sizes = [8, 128], strides = [1, 1]} : vector<8x256xf32> to vector<8x128xf32>
    %612 = vector.broadcast %15 : vector<1x128xf32> to vector<8x128xf32>
    %613 = arith.addf %611, %612 : vector<8x128xf32>
    %614 = vector.extract_strided_slice %613 {offsets = [0, 0], sizes = [8, 96], strides = [1, 1]} : vector<8x128xf32> to vector<8x96xf32>
    %615 = arith.negf %614 : vector<8x96xf32>
    %616 = math.exp %615 : vector<8x96xf32>
    %cst_109 = arith.constant 1.000000e+00 : f32
    %617 = vector.broadcast %cst_109 : f32 to vector<8x96xf32>
    %618 = arith.addf %617, %616 : vector<8x96xf32>
    %619 = arith.divf %617, %618 : vector<8x96xf32>
    %620 = vector.extract_strided_slice %613 {offsets = [0, 96], sizes = [8, 32], strides = [1, 1]} : vector<8x128xf32> to vector<8x32xf32>
    %621 = math.tanh %620 : vector<8x32xf32>
    %622 = vector.extract_strided_slice %619 {offsets = [0, 0], sizes = [8, 32], strides = [1, 1]} : vector<8x96xf32> to vector<8x32xf32>
    %623 = vector.extract_strided_slice %619 {offsets = [0, 32], sizes = [8, 32], strides = [1, 1]} : vector<8x96xf32> to vector<8x32xf32>
    %624 = vector.extract_strided_slice %619 {offsets = [0, 64], sizes = [8, 32], strides = [1, 1]} : vector<8x96xf32> to vector<8x32xf32>
    %625 = arith.mulf %623, %587 : vector<8x32xf32>
    %626 = arith.mulf %622, %621 : vector<8x32xf32>
    %627 = arith.addf %625, %626 : vector<8x32xf32>
    %628 = math.tanh %627 : vector<8x32xf32>
    %629 = arith.mulf %624, %628 : vector<8x32xf32>
    %630 = tpu.concatenate %343, %384, %425, %466, %507, %548, %589, %629 in 0 : vector<8x32xf32>, vector<8x32xf32>, vector<8x32xf32>, vector<8x32xf32>, vector<8x32xf32>, vector<8x32xf32>, vector<8x32xf32>, vector<8x32xf32> -> vector<64x32xf32>
    %631 = arith.truncf %630 : vector<64x32xf32> to vector<64x32xbf16>
    %cst_110 = arith.constant dense<0.000000e+00> : vector<64x64xf32>
    %632 = tpu.matmul %631, %16, %cst_110 {dimension_numbers = #tpu.dot_dimension_numbers<[1], [0], [0], [1], [0, 0, 1, 1], [], []>} : vector<64x32xbf16>, vector<32x64xbf16>, vector<64x64xf32> -> vector<64x64xf32>
    %633 = vector.broadcast %17 : vector<1x64xf32> to vector<64x64xf32>
    %634 = arith.addf %632, %633 : vector<64x64xf32>
    %c0_111 = arith.constant 0 : index
    %c0_112 = arith.constant 0 : index
    %635 = vector.load %arg21[%c0_111, %c0_112] : memref<64x64xf32, #tpu.memory_space<vmem>>, vector<64x64xf32>
    tpu.vector_store %arg21[%c0_111, %c0_112], %634 {strides = array<i32>} : memref<64x64xf32, #tpu.memory_space<vmem>>, vector<64x64xf32>,
    %636 = vector.extract_strided_slice %607 {offsets = [0, 0], sizes = [2, 32], strides = [1, 1]} : vector<8x32xf32> to vector<2x32xf32>
    %637 = vector.shape_cast %636 : vector<2x32xf32> to vector<1x2x32xf32>
    %638 = vector.extract_strided_slice %629 {offsets = [0, 0], sizes = [2, 32], strides = [1, 1]} : vector<8x32xf32> to vector<2x32xf32>
    %639 = vector.shape_cast %638 : vector<2x32xf32> to vector<1x2x32xf32>
    %640 = tpu.concatenate %637, %639 in 0 : vector<1x2x32xf32>, vector<1x2x32xf32> -> vector<2x2x32xf32>
    %c0_113 = arith.constant 0 : index
    %c0_114 = arith.constant 0 : index
    %c0_115 = arith.constant 0 : index
    %641 = vector.load %arg22[%c0_113, %c0_114, %c0_115] : memref<2x2x32xf32, #tpu.memory_space<vmem>>, vector<2x2x32xf32>
    tpu.vector_store %arg22[%c0_113, %c0_114, %c0_115], %640 {strides = array<i32>} : memref<2x2x32xf32, #tpu.memory_space<vmem>>, vector<2x2x32xf32>,
    %642 = vector.extract_strided_slice %605 {offsets = [0, 0], sizes = [2, 32], strides = [1, 1]} : vector<8x32xf32> to vector<2x32xf32>
    %643 = vector.shape_cast %642 : vector<2x32xf32> to vector<1x2x32xf32>
    %644 = vector.extract_strided_slice %627 {offsets = [0, 0], sizes = [2, 32], strides = [1, 1]} : vector<8x32xf32> to vector<2x32xf32>
    %645 = vector.shape_cast %644 : vector<2x32xf32> to vector<1x2x32xf32>
    %646 = tpu.concatenate %643, %645 in 0 : vector<1x2x32xf32>, vector<1x2x32xf32> -> vector<2x2x32xf32>
    %c0_116 = arith.constant 0 : index
    %c0_117 = arith.constant 0 : index
    %c0_118 = arith.constant 0 : index
    %647 = vector.load %arg23[%c0_116, %c0_117, %c0_118] : memref<2x2x32xf32, #tpu.memory_space<vmem>>, vector<2x2x32xf32>
    tpu.vector_store %arg23[%c0_116, %c0_117, %c0_118], %646 {strides = array<i32>} : memref<2x2x32xf32, #tpu.memory_space<vmem>>, vector<2x2x32xf32>,
    return
  }
}

</mosaic_0001>

<bundles_post_ra>
// kernel: cvae_forward.1
= control target key start
LH: loop header
LB: loop body
LE: loop exit
PB: predicated region body
PF: predicated region fallthrough
CT: control target
= control target key end

     0   :  { %s5095_s0 = inlined_call_operand.vmem [shape: s32[64,1], index: 0, kind: input, shape index: {}]   ;;  %s5096_s1 = inlined_call_operand.vmem [shape: f32[8,16], index: 1, kind: input, shape index: {}]   ;;  %s5097_s2 = inlined_call_operand.vmem [shape: f32[8,16], index: 2, kind: input, shape index: {}]   ;;  %s5098_s3 = inlined_call_operand.vmem [shape: bf16[64,32], index: 3, kind: input, shape index: {}]   ;;  %s5099_s4 = inlined_call_operand.vmem [shape: bf16[32,32], index: 4, kind: input, shape index: {}]   ;;  %s5100_s5 = inlined_call_operand.hbm [shape: bf16[16,32], index: 5, kind: input, shape index: {}]   ;;  %s5101_s6 = inlined_call_operand.hbm [shape: f32[1,32], index: 6, kind: input, shape index: {}]   ;;  %s5102_s7 = inlined_call_operand.vmem [shape: bf16[2,32,96], index: 7, kind: input, shape index: {}]   ;;  %s5103_s8 = inlined_call_operand.hbm [shape: f32[2,1,96], index: 8, kind: input, shape index: {}]   ;;  %s5104_s9 = inlined_call_operand.vmem [shape: bf16[32,512], index: 9, kind: input, shape index: {}]   ;;  %s5105_s10 = inlined_call_operand.hbm [shape: f32[1,512], index: 10, kind: input, shape index: {}]   ;;  %s5106_s11 = inlined_call_operand.vmem [shape: bf16[64,256], index: 11, kind: input, shape index: {}]   ;;  %s5107_s12 = inlined_call_operand.vmem [shape: bf16[64,32], index: 12, kind: input, shape index: {}]   ;;  %s5108_s13 = inlined_call_operand.vmem [shape: f32[1,32], index: 13, kind: input, shape index: {}]   ;;  %s5109_s14 = inlined_call_operand.vmem [shape: bf16[32,128], index: 14, kind: input, shape index: {}]   ;;  %s5110_s15 = inlined_call_operand.vmem [shape: bf16[32,128], index: 15, kind: input, shape index: {}]   ;;  %s5111_s16 = inlined_call_operand.vmem [shape: f32[1,128], index: 16, kind: input, shape index: {}]   ;;  %s5112_s17 = inlined_call_operand.vmem [shape: bf16[64,256], index: 17, kind: input, shape index: {}]   ;;  %s5113_s18 = inlined_call_operand.vmem [shape: f32[1,128], index: 18, kind: input, shape index: {}]   ;;  %s5114_s19 = inlined_call_operand.vmem [shape: bf16[32,64], index: 19, kind: input, shape index: {}]   ;;  %s5115_s20 = inlined_call_operand.vmem [shape: f32[1,64], index: 20, kind: input, shape index: {}]   ;;  %s5116_s21 = inlined_call_operand.vmem [shape: f32[64,64], index: 21, kind: output, shape index: {0}]   ;;  %s5117_s22 = inlined_call_operand.hbm [shape: f32[2,2,32], index: 22, kind: output, shape index: {1}]   ;;  %s5118_s23 = inlined_call_operand.hbm [shape: f32[2,2,32], index: 23, kind: output, shape index: {2}]   ;;  %s5119_s24 = inlined_call_operand.hbm [shape: f32[1,1], index: 24, kind: output, shape index: {3}]  }
   0x1   :  { %5130 = sst [smem:[#allocation19_spill]] %s5095_s0 }
   0x2   :  { %5131 = sst [smem:[#allocation20_spill]] %s5096_s1 }
   0x3   :  { %5132 = sst [smem:[#allocation21_spill]] %s5097_s2 }
   0x4   :  { %5133 = sst [smem:[#allocation22_spill]] %s5098_s3 }
   0x5   :  { %5134 = sst [smem:[#allocation23_spill]] %s5099_s4 }
   0x6   :  { %5135 = sst [smem:[#allocation24_spill]] %s5100_s5 }
   0x7   :  { %5136 = sst [smem:[#allocation25_spill]] %s5101_s6 }
   0x8   :  { %5137 = sst [smem:[#allocation26_spill]] %s5102_s7 }
   0x9   :  { %5138 = sst [smem:[#allocation27_spill]] %s5103_s8 }
   0xa   :  { %5139 = sst [smem:[#allocation28_spill]] %s5116_s21 }
   0xb   :  { %5140 = sst [smem:[#allocation29_spill]] %s5119_s24 }
   0xc   :  { %30 = vsyncpa [#allocation3], 0 }
   0xd   :  { %31 = vsyncpa [#allocation6], 0 }
   0xe   :  { %32 = vsyncpa [#allocation9], 0 }
   0xf   :  { %33 = vsyncpa [#allocation4], 0 }
  0x10   :  { %34 = vsyncpa [#allocation12], 0  ;;  %s4072_s5 = smov [#allocation5]   ;;  %s4073_s27 = smov [#allocation2]  }
  0x11   :  { %s63_s26 = sshll.u32 %s4072_s5, 4  ;;  %s50_s28 = sshll.u32 %s4073_s27, 4  ;;  %s64_s26 = int_to_ptr.vmem [resolvable:$true] %s63_s26  ;;  %s4215_s28 = int_to_ptr.vmem [resolvable:$true] %s50_s28 }
  0x12   :  { %s5141_s29 = sld [smem:[#allocation25_spill]] }
  0x18   :  { %s3908_s0 = scalar_lea.hbm %s5141_s29, 16 }
  0x19   :  { %p3909_p0 = scmp.ne.s32.totalorder %s5141_s29, %s3908_s0  ;;  %p3912_p1 = scmp.lt.u32.totalorder %s3908_s0, %s5141_s29 }
  0x1b   :  { %p3914_p2 = pnand %p3912_p1, %p3909_p0 }
  0x1d   :  { %3917 = shalt.err (!%p3914_p2)
}
  0x1e   :  { %s3918_s8 = scalar_lea.vmem %s64_s26, 16  ;;  %s3922_s4 = scalar_lea.vmem %s64_s26, 32 }
  0x1f   :  { %p3919_p3 = scmp.ne.s32.totalorder %s64_s26, %s3918_s8  ;;  %p3923_p4 = scmp.lt.s32.totalorder %s64_s26, %s64_s26 }
  0x20   :  { %p3924_p5 = scmp.lt.s32.totalorder %s3922_s4, %s3918_s8 }
  0x22   :  { %p3925_p6 = por %p3924_p5, %p3923_p4 }
  0x24   :  { %p3926_p7 = pnand %p3925_p6, %p3919_p3 }
  0x26   :  { %3929 = shalt.err (!%p3926_p7)
}
  0x27   :  { %66 = dma.hbm_to_vmem [thread:$0]  %s5141_s29, 16, %s64_s26, [#allocation6]  }
  0x28   :  { %s5142_s2 = sld [smem:[#allocation24_spill]] }
  0x2e   :  { %s3930_s7 = scalar_lea.hbm %s5142_s2, 128 }
  0x2f   :  { %p3931_p8 = scmp.ne.s32.totalorder %s5142_s2, %s3930_s7  ;;  %p3934_p9 = scmp.lt.u32.totalorder %s3930_s7, %s5142_s2 }
  0x31   :  { %p3936_p10 = pnand %p3934_p9, %p3931_p8 }
  0x33   :  { %3939 = shalt.err (!%p3936_p10)
}
  0x34   :  { %s3940_s8 = scalar_lea.vmem %s4215_s28, 128  ;;  %p3945_p12 = scmp.lt.s32.totalorder %s4215_s28, %s4215_s28 }
  0x35   :  { %p3941_p11 = scmp.ne.s32.totalorder %s4215_s28, %s3940_s8  ;;  %p3946_p13 = scmp.lt.s32.totalorder %s3940_s8, %s3940_s8 }
  0x37   :  { %p3947_p0 = por %p3946_p13, %p3945_p12 }
  0x39   :  { %p3948_p1 = pnand %p3947_p0, %p3941_p11 }
  0x3b   :  { %3951 = shalt.err (!%p3948_p1)
}
  0x3c   :  { %s4074_s26 = smov 64   ;;  %s4075_s29 = smov 4  }
  0x3d   :  { %56 = dma.hbm_to_vmem [thread:$0]  %s5142_s2, 128, %s4215_s28, [#allocation3], %s4074_s26, %s4074_s26, %s4075_s29  }
  0x3e   :  { %s4076_s5 = smov [#allocation7]   ;;  %s5143_s30 = sld [smem:[#allocation27_spill]] }
  0x3f   :  { %s74_s27 = sshll.u32 %s4076_s5, 4  ;;  %s75_s27 = int_to_ptr.vmem [resolvable:$true] %s74_s27 }
  0x44   :  { %s3952_s0 = scalar_lea.hbm %s5143_s30, 32 }
  0x45   :  { %p3953_p2 = scmp.ne.s32.totalorder %s5143_s30, %s3952_s0  ;;  %p3956_p3 = scmp.lt.u32.totalorder %s3952_s0, %s5143_s30 }
  0x47   :  { %p3958_p4 = pnand %p3956_p3, %p3953_p2 }
  0x49   :  { %3961 = shalt.err (!%p3958_p4)
}
  0x4a   :  { %s3962_s21 = scalar_lea.vmem %s75_s27, 32  ;;  %p3967_p6 = scmp.lt.s32.totalorder %s75_s27, %s75_s27 }
  0x4b   :  { %p3963_p5 = scmp.ne.s32.totalorder %s75_s27, %s3962_s21  ;;  %p3968_p7 = scmp.lt.s32.totalorder %s3962_s21, %s3962_s21 }
  0x4d   :  { %p3969_p8 = por %p3968_p7, %p3967_p6 }
  0x4f   :  { %p3970_p9 = pnand %p3969_p8, %p3963_p5 }
  0x51   :  { %3973 = shalt.err (!%p3970_p9)
}
  0x52   :  { %s4077_s28 = smov 16   ;;  %s4078_s2 = smov 1  }
  0x53   :  { %80 = dma.hbm_to_vmem [thread:$0]  %s5143_s30, 32, %s75_s27, [#allocation6], %s4077_s28, %s4077_s28, %s4078_s2  }
  0x54   :  { %s4079_s1 = smov [#allocation8]   ;;  %s3974_s7 = scalar_lea.hbm %s5105_s10, 64 }
  0x55   :  { %s89_s24 = sshll.u32 %s4079_s1, 4  ;;  %p3975_p10 = scmp.ne.s32.totalorder %s5105_s10, %s3974_s7  ;;  %s90_s24 = int_to_ptr.vmem [resolvable:$true] %s89_s24 }
  0x56   :  { %p3978_p11 = scmp.lt.u32.totalorder %s3974_s7, %s5105_s10 }
  0x58   :  { %p3980_p12 = pnand %p3978_p11, %p3975_p10 }
  0x5a   :  { %3983 = shalt.err (!%p3980_p12)
}
  0x5b   :  { %s3984_s8 = scalar_lea.vmem %s90_s24, 64  ;;  %p3989_p0 = scmp.lt.s32.totalorder %s90_s24, %s90_s24 }
  0x5c   :  { %p3985_p13 = scmp.ne.s32.totalorder %s90_s24, %s3984_s8  ;;  %p3990_p1 = scmp.lt.s32.totalorder %s3984_s8, %s3984_s8 }
  0x5e   :  { %p3991_p2 = por %p3990_p1, %p3989_p0 }
  0x60   :  { %p3992_p3 = pnand %p3991_p2, %p3985_p13 }
  0x62   :  { %3995 = shalt.err (!%p3992_p3)
}
  0x63   :  { %92 = dma.hbm_to_vmem [thread:$0]  %s5105_s10, 64, %s90_s24, [#allocation9]  }
  0x64   :  { %4062 = dma.done.wait [#allocation3], 128  }
  0x65   :  { %4063 = vsyncadd [#allocation3], 4294967168 }
  0x66   :  { %4064 = dma.done.wait [#allocation6], 48  }
  0x67   :  { %4065 = vsyncadd [#allocation6], 4294967248 }
  0x68   :  { %4066 = dma.done.wait [#allocation9], 64  }
  0x69   :  { %4067 = vsyncadd [#allocation9], 4294967232  ;;  %v4080_v0 = vmov 0   ;;  %s5144_s4 = sld [smem:[#allocation19_spill]]  ;;  %s5145_s3 = sld [smem:[#allocation22_spill]]  ;;  %v4081_v14 = vmov 0.0   ;;  %v208_v15 = vlaneseq }
  0x6a   :  { %3557 = vset.pattern.permute.xlu1 %v4080_v0  ;;  %3556 = vset.pattern.permute.xlu0 %v4080_v0  ;;  %s5146_s27 = sld [smem:[#allocation23_spill]]  ;;  %vm286_vm4 = vcmask 523264   ;;  %v3562_v27 = vld [vmem:[#allocation2] sm:$0xff]   ;;  %s5147_s29 = sld [smem:[#allocation20_spill]]  ;;  %vm4082_vm9 = vmmov 0   ;;  %vm378_vm10 = vcmask 130048  }
  0x6b   :  { %v209_v16 = vand.u32 127, %v208_v15  ;;  %s5148_s10 = sld [smem:[#allocation26_spill]]  ;;  %vm438_vm11 = vcmask 261120   ;;  %v3246_v59 = vld [vmem:[#allocation5] ss:$0 sm:$0xff]  ;;  %s4083_s8 = smov 96  }
  0x6c   :  { %s5149_s30 = sld [smem:[#allocation21_spill]]  ;;  %vm3165_vm12 = vcmask 254976   ;;  %vm2010_vm13 = vcmask 123904  }
  0x6f   :  { %v202_v1 = vld [vmem:[%s5144_s4 + $0x10] sm:$0xff]  ;;  %v200_v2 = vld [vmem:[%s5144_s4] sm:$0xff]  ;;  %v203_v3 = vld [vmem:[%s5144_s4 + $0x18] sm:$0xff] }
  0x70   :  { %217 = vperm.xlu1 %3557, %v202_v1   ;;  %211 = vperm.xlu0 %3556, %v200_v2   ;;  %v201_v4 = vld [vmem:[%s5144_s4 + $0x8] sm:$0xff]  ;;  %v3558_v5 = vld [vmem:[%s5145_s3] sm:$0xff]   ;;  %v3560_v9 = vld [vmem:[%s5145_s3 + $0x10] sm:$0xff]  }
  0x71   :  { %v205_v6 = vld [vmem:[%s5144_s4 + $0x28] sm:$0xff]  ;;  %v204_v8 = vld [vmem:[%s5144_s4 + $0x20] sm:$0xff]  ;;  %3436 = vmatprep.subr.bf16.mxu0 %v3558_v5  ;;  %v207_v10 = vld [vmem:[%s5144_s4 + $0x38] sm:$0xff] }
  0x72   :  { %v3559_v7 = vld [vmem:[%s5145_s3 + $0x8] sm:$0xff]   ;;  %3437 = vmatpush3.bf16.msra.mxu0 %v3558_v5  ;;  %v206_v11 = vld [vmem:[%s5144_s4 + $0x30] sm:$0xff]  ;;  %v3561_v12 = vld [vmem:[%s5145_s3 + $0x18] sm:$0xff]  }
  0x73   :  { %3438 = vmatprep.subr.bf16.mxu0 %v3559_v7  ;;  %v3563_v13 = vld [vmem:[%s5146_s27] sm:$0xff]   ;;  %v3564_v38 = vld [vmem:[%s5146_s27 + $0x8] sm:$0xff]  }
  0x74   :  { %220 = vperm.xlu1 %3557, %v203_v3   ;;  %214 = vperm.xlu0 %3556, %v201_v4   ;;  %v364_v39 = vld [vmem:[%s5147_s29] sm:$0xff]  ;;  %v3566_v57 = vld [vmem:[%s5148_s10 + $0x8] sm:$0xff]  }
  0x75   :  { %3458 = vmatprep.subr.bf16.mxu1 %v3563_v13  ;;  %v365_v40 = vpack.c.bf16 %v364_v39, %v364_v39  ;;  %v3565_v41 = vld [vmem:[%s5148_s10] sm:$0xff]  }
  0x76   :  { %3439 = vmatpush3.bf16.msra.mxu0 %v3559_v7  ;;  %3459 = vmatpush3.bf16.msra.mxu1 %v3563_v13 }
  0x77   :  { %3440 = vmatprep.subr.bf16.mxu0 %v3560_v9  ;;  %3460 = vmatprep.subr.bf16.mxu1 %v3564_v38 }
  0x78   :  { %226 = vperm.xlu1 %3557, %v205_v6   ;;  %223 = vperm.xlu0 %3556, %v204_v8  }
  0x7a   :  { %3441 = vmatpush3.bf16.msra.mxu0 %v3560_v9  ;;  %3461 = vmatpush3.bf16.msra.mxu1 %v3564_v38 }
  0x7b   :  { %3442 = vmatprep.subr.bf16.mxu0 %v3561_v12  ;;  %3470 = vmatprep.subr.bf16.mxu1 %v3565_v41 }
  0x7c   :  { %232 = vperm.xlu1 %3557, %v207_v10   ;;  %229 = vperm.xlu0 %3556, %v206_v11  }
  0x7e   :  { %3443 = vmatpush3.bf16.msra.mxu0 %v3561_v12 }
  0x7f   :  { %3452 = vmatprep.subr.bf16.mxu0 %v4081_v14 }
  0xef   :  { %v218_v17 = vpop.permute.xlu1 %217  ;;  %v212_v18 = vpop.permute.xlu0 %211 }
  0xf0   :  { %vm236_vm0 = vcmp.eq.s32.totalorder %v218_v17, %v209_v16  ;;  %vm234_vm1 = vcmp.eq.s32.totalorder %v212_v18, %v209_v16 }
  0xf1   :  { %v3232_v21 = vsel %vm236_vm0, 1.0, %v4081_v14  ;;  %v3230_v23 = vsel %vm234_vm1, 1.0, %v4081_v14 }
  0xf3   :  { %v221_v19 = vpop.permute.xlu1 %220  ;;  %v215_v20 = vpop.permute.xlu0 %214 }
  0xf4   :  { %vm237_vm2 = vcmp.eq.s32.totalorder %v221_v19, %v209_v16  ;;  %vm235_vm3 = vcmp.eq.s32.totalorder %v215_v20, %v209_v16  ;;  %v3255_v20 = vld [vmem:[#allocation7] ss:$0 sm:$0xff] }
  0xf5   :  { %v3233_v22 = vsel %vm237_vm2, 1.0, %v4081_v14  ;;  %v3231_v24 = vsel %vm235_vm3, 1.0, %v4081_v14 }
  0xf6   :  { %v259_v25 = vpack.c.bf16 %v3233_v22, %v3232_v21  ;;  %v258_v26 = vpack.c.bf16 %v3231_v24, %v3230_v23  ;;  %v3567_v23 = vld [vmem:[%s5148_s10 + $0x10] sm:$0xff]  }
  0xf7   :  { %v227_v28 = vpop.permute.xlu1 %226  ;;  %v224_v29 = vpop.permute.xlu0 %223 }
  0xf8   :  { %vm239_vm5 = vcmp.eq.s32.totalorder %v227_v28, %v209_v16  ;;  %vm238_vm6 = vcmp.eq.s32.totalorder %v224_v29, %v209_v16  ;;  %3444 = vmatprep.mubr.msk.bf16.mxu0 %vm286_vm4, %v258_v26 }
  0xf9   :  { %v3235_v30 = vsel %vm239_vm5, 1.0, %v4081_v14  ;;  %v3234_v31 = vsel %vm238_vm6, 1.0, %v4081_v14  ;;  %3445 = vmatmul.mubr.msk.bf16.vlgmr.msra.gmra.mrb[0].mxu0 %vm286_vm4, %v259_v25 }
  0xfa   :  { %v260_v32 = vpack.c.bf16 %v3235_v30, %v3234_v31  ;;  %3453 = vmatpush3.bf16.msra.mxu0 %v3562_v27  ;;  %v3568_v30 = vld [vmem:[%s5148_s10 + $0x18] sm:$0xff]  }
  0xfb   :  { %v233_v33 = vpop.permute.xlu1 %232  ;;  %v230_v34 = vpop.permute.xlu0 %229  ;;  %3482 = vmatprep.subr.bf16.mxu0 %v3567_v23 }
  0xfc   :  { %vm241_vm7 = vcmp.eq.s32.totalorder %v233_v33, %v209_v16  ;;  %vm240_vm8 = vcmp.eq.s32.totalorder %v230_v34, %v209_v16  ;;  %3448 = vmatprep.mubr.msk.bf16.mxu0 %vm286_vm4, %v260_v32 }
  0xfd   :  { %v3237_v35 = vsel %vm241_vm7, 1.0, %v4081_v14  ;;  %v3236_v36 = vsel %vm240_vm8, 1.0, %v4081_v14 }
  0xfe   :  { %v261_v37 = vpack.c.bf16 %v3237_v35, %v3236_v36 }
 0x101   :  { %3449 = vmatmul.mubr.msk.bf16.gmra.mrb[4].mxu0 %vm286_vm4, %v261_v37 }
 0x102   :  { %3454 = vmatprep.mubr.msk.bf16.mxu0 %vm4082_vm9, %v4081_v14 }
 0x109   :  { %3455 = vmatmul.mubr.msk.bf16.vlgmr.msra.gmra.mrb[8].mxu0 %vm378_vm10, %v365_v40 }
 0x10a   :  { %3483 = vmatpush3.bf16.msra.mxu0 %v3567_v23 }
 0x10b   :  { %3484 = vmatprep.subr.bf16.mxu0 %v3568_v30 }
 0x10e   :  { %3485 = vmatpush3.bf16.msra.mxu0 %v3568_v30 }
 0x1cc   :  { %v3446_v42 = vpop.f32.mrb[0].mxu0 }
 0x1cd   :  { %v333_v43 = vpop.f32.mrb[1].mxu0 }
 0x1ce   :  { %v3447_v44 = vpop.f32.mrb[2].mxu0 }
 0x1cf   :  { %v4341_v45 = vpack.c.bf16 %v3447_v44, %v3446_v42  ;;  %v336_v46 = vpop.f32.mrb[3].mxu0 }
 0x1d0   :  { %v4343_v47 = vpack.c.bf16 %v336_v46, %v333_v43 }
 0x1d2   :  { %3462 = vmatprep.mubr.msk.bf16.mxu1 %vm438_vm11, %v4343_v47 }
 0x1d3   :  { %3463 = vmatmul.mubr.msk.bf16.vlgmr.msra.gmra.mrb[0].mxu1 %vm438_vm11, %v4341_v45 }
 0x1d4   :  { %v3450_v48 = vpop.f32.mrb[4].mxu0  ;;  %3471 = vmatpush3.bf16.msra.mxu1 %v3565_v41 }
 0x1d5   :  { %v349_v49 = vpop.f32.mrb[5].mxu0  ;;  %3472 = vmatprep.subr.bf16.mxu1 %v3566_v57 }
 0x1d6   :  { %v3451_v50 = vpop.f32.mrb[6].mxu0 }
 0x1d7   :  { %v4349_v51 = vpack.c.bf16 %v3451_v50, %v3450_v48  ;;  %v352_v52 = vpop.f32.mrb[7].mxu0 }
 0x1d8   :  { %v4351_v53 = vpack.c.bf16 %v352_v52, %v349_v49  ;;  %3473 = vmatpush3.bf16.msra.mxu1 %v3566_v57 }
 0x1da   :  { %3466 = vmatprep.mubr.msk.bf16.mxu1 %vm438_vm11, %v4351_v53 }
 0x1db   :  { %3467 = vmatmul.mubr.msk.bf16.gmra.mrb[4].mxu1 %vm438_vm11, %v4349_v51 }
 0x1dc   :  { %v416_v54 = vpop.f32.mrb[8].mxu0 }
 0x1dd   :  { %v3456_v55 = vpop.f32.mrb[9].mxu0  ;;  %v417_v60 = vadd.f32 %v3246_v59, %v416_v54 }
 0x1de   :  { %v419_v56 = vpop.f32.mrb[10].mxu0 }
 0x1df   :  { %v3457_v58 = vpop.f32.mrb[11].mxu0 }
 0x2a6   :  { %v3464_v61 = vpop.f32.mrb[0].mxu1 }
 0x2a7   :  { %v494_v62 = vadd.f32 %v3464_v61, %v417_v60  ;;  %v485_v63 = vpop.f32.mrb[1].mxu1 }
 0x2a8   :  { %v486_v1 = vadd.f32 %v485_v63, %v417_v60  ;;  %v3465_v2 = vpop.f32.mrb[2].mxu1 }
 0x2a9   :  { %v497_v3 = vadd.f32 %v3465_v2, %v417_v60  ;;  %v488_v4 = vpop.f32.mrb[3].mxu1 }
 0x2aa   :  { %v489_v5 = vadd.f32 %v488_v4, %v417_v60 }
 0x2ab   :  { %v517_v6 = vpack.c.bf16 %v497_v3, %v494_v62 }
 0x2ac   :  { %v516_v7 = vpack.c.bf16 %v489_v5, %v486_v1 }
 0x2ae   :  { %v3468_v8 = vpop.f32.mrb[4].mxu1  ;;  %3474 = vmatprep.mubr.msk.bf16.mxu1 %vm438_vm11, %v516_v7 }
 0x2af   :  { %v510_v9 = vadd.f32 %v3468_v8, %v417_v60  ;;  %v501_v10 = vpop.f32.mrb[5].mxu1  ;;  %3475 = vmatmul.mubr.msk.bf16.vlgmr.msra.gmra.mrb[8].mxu1 %vm438_vm11, %v517_v6 }
 0x2b0   :  { %v502_v11 = vadd.f32 %v501_v10, %v417_v60  ;;  %v3469_v12 = vpop.f32.mrb[6].mxu1 }
 0x2b1   :  { %v513_v13 = vadd.f32 %v3469_v12, %v417_v60  ;;  %v504_v16 = vpop.f32.mrb[7].mxu1 }
 0x2b2   :  { %v505_v17 = vadd.f32 %v504_v16, %v417_v60 }
 0x2b3   :  { %v519_v18 = vpack.c.bf16 %v513_v13, %v510_v9 }
 0x2b4   :  { %v518_v19 = vpack.c.bf16 %v505_v17, %v502_v11 }
 0x2b6   :  { %3478 = vmatprep.mubr.msk.bf16.mxu1 %vm438_vm11, %v518_v19 }
 0x2b7   :  { %3479 = vmatmul.mubr.msk.bf16.gmra.mrb[12].mxu1 %vm438_vm11, %v519_v18 }
 0x2b8   :  { %1127 = vmatprep.mubr.bf16.mxu1 %v4080_v0 }
 0x382   :  { %v3476_v21 = vpop.f32.mrb[8].mxu1 }
 0x383   :  { %v584_v22 = vpop.f32.mrb[9].mxu1  ;;  %v593_v24 = vadd.f32 %v3476_v21, %v3255_v20 }
 0x384   :  { %v585_v25 = vadd.f32 %v3255_v20, %v584_v22  ;;  %v3477_v26 = vpop.f32.mrb[10].mxu1 }
 0x385   :  { %v587_v27 = vpop.f32.mrb[11].mxu1  ;;  %v596_v28 = vadd.f32 %v3477_v26, %v3255_v20  ;;  %v665_v31 = vmax.f32 %v593_v24, 0.0  ;;  %v3264_v52 = vmul.f32 -1.442695, %v593_v24 }
 0x386   :  { %v588_v29 = vadd.f32 %v3255_v20, %v587_v27  ;;  %727 = vrot.lane.b32.xlu0 %v585_v25, %s4074_s26  ;;  %v663_v36 = vmax.f32 %v585_v25, 0.0  ;;  %v3262_v49 = vmul.f32 -1.442695, %v585_v25 }
 0x387   :  { %v666_v33 = vmax.f32 %v596_v28, 0.0  ;;  %v3265_v54 = vmul.f32 -1.442695, %v596_v28 }
 0x388   :  { %729 = vrot.lane.b32.xlu1 %v588_v29, %s4074_s26  ;;  %v664_v38 = vmax.f32 %v588_v29, 0.0  ;;  %v3263_v50 = vmul.f32 -1.442695, %v588_v29  ;;  %3615 = vpow2.f32 %v3262_v49 }
 0x38a   :  { %v3480_v32 = vpop.f32.mrb[12].mxu1  ;;  %683 = vrot.lane.b32.xlu0 %v665_v31, %s4083_s8  ;;  %3617 = vpow2.f32 %v3263_v50 }
 0x38b   :  { %v600_v34 = vpop.f32.mrb[13].mxu1  ;;  %v609_v39 = vadd.f32 %v3480_v32, %v3255_v20  ;;  %3619 = vpow2.f32 %v3264_v52 }
 0x38c   :  { %v3481_v35 = vpop.f32.mrb[14].mxu1  ;;  %685 = vrot.lane.b32.xlu1 %v666_v33, %s4083_s8  ;;  %v601_v40 = vadd.f32 %v3255_v20, %v600_v34  ;;  %3621 = vpow2.f32 %v3265_v54 }
 0x38d   :  { %v603_v37 = vpop.f32.mrb[15].mxu1  ;;  %v612_v41 = vadd.f32 %v3481_v35, %v3255_v20  ;;  %v669_v43 = vmax.f32 %v609_v39, 0.0  ;;  %v3268_v63 = vmul.f32 -1.442695, %v609_v39 }
 0x38e   :  { %679 = vrot.lane.b32.xlu0 %v663_v36, %s4083_s8  ;;  %v604_v42 = vadd.f32 %v3255_v20, %v603_v37  ;;  %v667_v46 = vmax.f32 %v601_v40, 0.0  ;;  %v3266_v57 = vmul.f32 -1.442695, %v601_v40 }
 0x38f   :  { %v670_v44 = vmax.f32 %v612_v41, 0.0  ;;  %v3269_v2 = vmul.f32 -1.442695, %v612_v41 }
 0x390   :  { %681 = vrot.lane.b32.xlu1 %v664_v38, %s4083_s8  ;;  %v668_v48 = vmax.f32 %v604_v42, 0.0  ;;  %v3267_v58 = vmul.f32 -1.442695, %v604_v42  ;;  %3623 = vpow2.f32 %v3266_v57 }
 0x392   :  { %731 = vrot.lane.b32.xlu0 %v593_v24, %s4074_s26  ;;  %v3616_v55 = vpop.eup %3615  ;;  %3625 = vpow2.f32 %v3267_v58 }
 0x393   :  { %v639_v60 = vadd.f32 1.0, %v3616_v55 }
 0x394   :  { %733 = vrot.lane.b32.xlu1 %v596_v28, %s4074_s26  ;;  %v3618_v56 = vpop.eup %3617 }
 0x395   :  { %v3620_v59 = vpop.eup %3619  ;;  %v640_v61 = vadd.f32 1.0, %v3618_v56  ;;  %3627 = vrcp.f32 %v639_v60 }
 0x396   :  { %735 = vrot.lane.b32.xlu0 %v601_v40, %s4074_s26  ;;  %v3622_v62 = vpop.eup %3621  ;;  %v641_v1 = vadd.f32 1.0, %v3620_v59 }
 0x397   :  { %v642_v3 = vadd.f32 1.0, %v3622_v62  ;;  %3629 = vrcp.f32 %v640_v61 }
 0x398   :  { %737 = vrot.lane.b32.xlu1 %v604_v42, %s4074_s26  ;;  %3631 = vpow2.f32 %v3268_v63 }
 0x399   :  { %3633 = vrcp.f32 %v641_v1 }
 0x39a   :  { %691 = vrot.lane.b32.xlu0 %v669_v43, %s4083_s8  ;;  %3635 = vpow2.f32 %v3269_v2  ;;  %v3624_v6 = vpop.eup %3623 }
 0x39b   :  { %3637 = vrcp.f32 %v642_v3  ;;  %v643_v11 = vadd.f32 1.0, %v3624_v6 }
 0x39c   :  { %693 = vrot.lane.b32.xlu1 %v670_v44, %s4083_s8  ;;  %v3626_v7 = vpop.eup %3625 }
 0x39d   :  { %v644_v17 = vadd.f32 1.0, %v3626_v7  ;;  %3639 = vrcp.f32 %v643_v11 }
 0x39e   :  { %687 = vrot.lane.b32.xlu0 %v667_v46, %s4083_s8 }
 0x39f   :  { %v3628_v9 = vpop.eup %3627  ;;  %3641 = vrcp.f32 %v644_v17  ;;  %v3569_v17 = vld [vmem:[%s5104_s9] ss:$16 sps:$4 sm:$0xff]  }
 0x3a0   :  { %689 = vrot.lane.b32.xlu1 %v668_v48, %s4083_s8  ;;  %v711_v20 = vsub.f32 1.0, %v3628_v9 }
 0x3a1   :  { %v3630_v10 = vpop.eup %3629 }
 0x3a2   :  { %739 = vrot.lane.b32.xlu0 %v609_v39, %s4074_s26  ;;  %v3632_v13 = vpop.eup %3631  ;;  %v712_v21 = vsub.f32 1.0, %v3630_v10 }
 0x3a3   :  { %v3634_v16 = vpop.eup %3633  ;;  %v645_v24 = vadd.f32 1.0, %v3632_v13 }
 0x3a4   :  { %741 = vrot.lane.b32.xlu1 %v612_v41, %s4074_s26  ;;  %v3636_v19 = vpop.eup %3635  ;;  %v713_v29 = vsub.f32 1.0, %v3634_v16 }
 0x3a5   :  { %v3638_v23 = vpop.eup %3637  ;;  %v646_v30 = vadd.f32 1.0, %v3636_v19  ;;  %3643 = vrcp.f32 %v645_v24  ;;  %v3572_v19 = vld [vmem:[%s5104_s9 + $0x8] ss:$16 sps:$4 sm:$0xff]   ;;  %v3580_v24 = vld [vmem:[%s5104_s9 + $0x2c] ss:$16 sps:$4 sm:$0xff]  }
 0x3a6   :  { %v714_v35 = vsub.f32 1.0, %v3638_v23 }
 0x3a7   :  { %3645 = vrcp.f32 %v646_v30  ;;  %v3640_v48 = vpop.eup %3639 }
 0x3a8   :  { %v715_v56 = vsub.f32 1.0, %v3640_v48 }
 0x3a9   :  { %v3642_v50 = vpop.eup %3641 }
 0x3aa   :  { %v716_v57 = vsub.f32 1.0, %v3642_v50 }
 0x3af   :  { %v3644_v54 = vpop.eup %3643 }
 0x3b0   :  { %v717_v1 = vsub.f32 1.0, %v3644_v54 }
 0x3b1   :  { %v3646_v59 = vpop.eup %3645 }
 0x3b2   :  { %v718_v6 = vsub.f32 1.0, %v3646_v59 }
 0x3f8   :  { %v728_v4 = vpop.permute.xlu0 %727 }
 0x3f9   :  { %v751_v26 = vmul.f32 %v728_v4, %v711_v20  ;;  %v3574_v20 = vld [vmem:[%s5104_s9 + $0xc] ss:$16 sps:$4 sm:$0xff]  }
 0x3fa   :  { %v730_v5 = vpop.permute.xlu1 %729  ;;  %1168 = vmatprep.subr.bf16.mxu0 %v3574_v20 }
 0x3fb   :  { %v752_v27 = vmul.f32 %v730_v5, %v712_v21  ;;  %v3575_v21 = vld [vmem:[%s5104_s9 + $0x20] ss:$16 sps:$4 sm:$0xff]  }
 0x3fc   :  { %v684_v8 = vpop.permute.xlu0 %683 }
 0x3fd   :  { %v705_v37 = vmul.f32 %v3634_v16, %v684_v8 }
 0x3fe   :  { %v686_v12 = vpop.permute.xlu1 %685 }
 0x3ff   :  { %v706_v38 = vmul.f32 %v3638_v23, %v686_v12  ;;  %v3578_v23 = vld [vmem:[%s5104_s9 + $0x28] ss:$16 sps:$4 sm:$0xff]  }
 0x400   :  { %v680_v18 = vpop.permute.xlu0 %679 }
 0x401   :  { %v703_v22 = vmul.f32 %v3628_v9, %v680_v18  ;;  %v3571_v18 = vld [vmem:[%s5104_s9 + $0x4] ss:$16 sps:$4 sm:$0xff]  }
 0x402   :  { %v682_v25 = vpop.permute.xlu1 %681  ;;  %1095 = vmatprep.subr.bf16.mxu1 %v3571_v18 }
 0x403   :  { %v704_v28 = vmul.f32 %v3630_v10, %v682_v25  ;;  %v759_v32 = vadd.f32 %v751_v26, %v703_v22  ;;  %1096 = vmatpush1.bf16.msra.mxu1 %v3569_v17  ;;  %v3577_v22 = vld [vmem:[%s5104_s9 + $0x24] ss:$16 sps:$4 sm:$0xff]   ;;  %v3270_v25 = vld [vmem:[#allocation7 + $0x1] ss:$0 sm:$0xff] }
 0x404   :  { %v732_v31 = vpop.permute.xlu0 %731  ;;  %1097 = vmatprep.subr.bf16.mxu1 %v3577_v22 }
 0x405   :  { %v760_v33 = vadd.f32 %v752_v27, %v704_v28  ;;  %v753_v34 = vmul.f32 %v732_v31, %v713_v29  ;;  %v4419_v28 = vld [vmem:[%s5106_s11 + $0x4] ss:$8 sps:$4 sm:$0xff]  }
 0x406   :  { %v734_v36 = vpop.permute.xlu1 %733 }
 0x407   :  { %v767_v39 = vpack.c.bf16 %v760_v33, %v759_v32  ;;  %v754_v40 = vmul.f32 %v734_v36, %v714_v35  ;;  %v761_v42 = vadd.f32 %v753_v34, %v705_v37  ;;  %1098 = vmatpush1.bf16.msra.mxu1 %v3575_v21 }
 0x408   :  { %v736_v41 = vpop.permute.xlu0 %735  ;;  %1286 = vmatprep.subr.bf16.mxu1 %v4419_v28 }
 0x409   :  { %v762_v43 = vadd.f32 %v754_v40, %v706_v38  ;;  %3486 = vmatprep.mubr.msk.bf16.mxu0 %vm438_vm11, %v767_v39  ;;  %v755_v61 = vmul.f32 %v736_v41, %v715_v56 }
 0x40a   :  { %v738_v44 = vpop.permute.xlu1 %737 }
 0x40b   :  { %v768_v46 = vpack.c.bf16 %v762_v43, %v761_v42  ;;  %v756_v62 = vmul.f32 %v738_v44, %v716_v57 }
 0x40c   :  { %v692_v49 = vpop.permute.xlu0 %691 }
 0x40d   :  { %3487 = vmatmul.mubr.msk.bf16.vlgmr.msra.gmra.mrb[12].mxu0 %vm438_vm11, %v768_v46  ;;  %v709_v8 = vmul.f32 %v3644_v54, %v692_v49 }
 0x40e   :  { %v694_v52 = vpop.permute.xlu1 %693  ;;  %1169 = vmatpush1.bf16.msra.mxu0 %v3572_v19 }
 0x40f   :  { %v710_v9 = vmul.f32 %v3646_v59, %v694_v52  ;;  %1170 = vmatprep.subr.bf16.mxu0 %v3580_v24 }
 0x410   :  { %v688_v55 = vpop.permute.xlu0 %687 }
 0x411   :  { %v707_v58 = vmul.f32 %v3640_v48, %v688_v55 }
 0x412   :  { %v690_v60 = vpop.permute.xlu1 %689  ;;  %1171 = vmatpush1.bf16.msra.mxu0 %v3578_v23 }
 0x413   :  { %v708_v63 = vmul.f32 %v3642_v50, %v690_v60  ;;  %v763_v3 = vadd.f32 %v755_v61, %v707_v58  ;;  %1365 = vmatprep.subr.bf16.mxu0 %v4419_v28 }
 0x414   :  { %v740_v2 = vpop.permute.xlu0 %739 }
 0x415   :  { %v764_v4 = vadd.f32 %v756_v62, %v708_v63  ;;  %v757_v5 = vmul.f32 %v740_v2, %v717_v1 }
 0x416   :  { %v742_v7 = vpop.permute.xlu1 %741 }
 0x417   :  { %v769_v10 = vpack.c.bf16 %v764_v4, %v763_v3  ;;  %v758_v11 = vmul.f32 %v742_v7, %v718_v6  ;;  %v765_v12 = vadd.f32 %v757_v5, %v709_v8 }
 0x419   :  { %v766_v13 = vadd.f32 %v758_v11, %v710_v9  ;;  %3490 = vmatprep.mubr.msk.bf16.mxu0 %vm438_vm11, %v769_v10 }
 0x41b   :  { %v770_v16 = vpack.c.bf16 %v766_v13, %v765_v12 }
 0x41d   :  { %3491 = vmatmul.mubr.msk.bf16.gmra.mrb[16].mxu0 %vm438_vm11, %v770_v16 }
 0x41e   :  { %1200 = vmatprep.mubr.bf16.mxu0 %v4080_v0 }
 0x4e0   :  { %v3488_v26 = vpop.f32.mrb[12].mxu0 }
 0x4e1   :  { %v835_v27 = vpop.f32.mrb[13].mxu0  ;;  %v844_v33 = vadd.f32 %v3488_v26, %v3270_v25 }
 0x4e2   :  { %v836_v29 = vadd.f32 %v3270_v25, %v835_v27  ;;  %v3489_v30 = vpop.f32.mrb[14].mxu0 }
 0x4e3   :  { %v838_v31 = vpop.f32.mrb[15].mxu0  ;;  %v847_v35 = vadd.f32 %v3489_v30, %v3270_v25  ;;  %v916_v37 = vmax.f32 %v844_v33, 0.0  ;;  %v3279_v57 = vmul.f32 -1.442695, %v844_v33 }
 0x4e4   :  { %v839_v32 = vadd.f32 %v3270_v25, %v838_v31  ;;  %978 = vrot.lane.b32.xlu0 %v836_v29, %s4074_s26  ;;  %v914_v34 = vmax.f32 %v836_v29, 0.0  ;;  %v3277_v55 = vmul.f32 -1.442695, %v836_v29 }
 0x4e5   :  { %v917_v38 = vmax.f32 %v847_v35, 0.0  ;;  %v3280_v58 = vmul.f32 -1.442695, %v847_v35 }
 0x4e6   :  { %980 = vrot.lane.b32.xlu1 %v839_v32, %s4074_s26  ;;  %v915_v36 = vmax.f32 %v839_v32, 0.0  ;;  %v3278_v56 = vmul.f32 -1.442695, %v839_v32  ;;  %3647 = vpow2.f32 %v3277_v55 }
 0x4e8   :  { %930 = vrot.lane.b32.xlu0 %v914_v34, %s4083_s8  ;;  %3649 = vpow2.f32 %v3278_v56 }
 0x4e9   :  { %3651 = vpow2.f32 %v3279_v57 }
 0x4ea   :  { %932 = vrot.lane.b32.xlu1 %v915_v36, %s4083_s8  ;;  %3653 = vpow2.f32 %v3280_v58  ;;  %v4442_v36 = vld [vmem:[%s5106_s11] ss:$8 sps:$4 sm:$0xff]  }
 0x4ec   :  { %934 = vrot.lane.b32.xlu0 %v916_v37, %s4083_s8 }
 0x4ee   :  { %936 = vrot.lane.b32.xlu1 %v917_v38, %s4083_s8 }
 0x4f0   :  { %v3492_v39 = vpop.f32.mrb[16].mxu0  ;;  %982 = vrot.lane.b32.xlu0 %v844_v33, %s4074_s26  ;;  %v3648_v59 = vpop.eup %3647 }
 0x4f1   :  { %v851_v40 = vpop.f32.mrb[17].mxu0  ;;  %v860_v46 = vadd.f32 %v3492_v39, %v3270_v25  ;;  %v890_v61 = vadd.f32 1.0, %v3648_v59  ;;  %v4447_v39 = vld [vmem:[%s5106_s11 + $0x14] ss:$8 sps:$4 sm:$0xff]  }
 0x4f2   :  { %v852_v41 = vadd.f32 %v3270_v25, %v851_v40  ;;  %v3493_v42 = vpop.f32.mrb[18].mxu0  ;;  %984 = vrot.lane.b32.xlu1 %v847_v35, %s4074_s26  ;;  %v3650_v60 = vpop.eup %3649 }
 0x4f3   :  { %v854_v43 = vpop.f32.mrb[19].mxu0  ;;  %v863_v49 = vadd.f32 %v3493_v42, %v3270_v25  ;;  %v920_v52 = vmax.f32 %v860_v46, 0.0  ;;  %v891_v1 = vadd.f32 1.0, %v3650_v60  ;;  %3655 = vrcp.f32 %v890_v61  ;;  %v3652_v2 = vpop.eup %3651  ;;  %v4472_v61 = vld [vmem:[%s5106_s11 + $0x20] ss:$8 sps:$4 sm:$0xff]  }
 0x4f4   :  { %v855_v44 = vadd.f32 %v3270_v25, %v854_v43  ;;  %986 = vrot.lane.b32.xlu0 %v852_v41, %s4074_s26  ;;  %v918_v48 = vmax.f32 %v852_v41, 0.0  ;;  %v3281_v62 = vmul.f32 -1.442695, %v852_v41  ;;  %v3654_v3 = vpop.eup %3653  ;;  %v3283_v4 = vmul.f32 -1.442695, %v860_v46 }
 0x4f5   :  { %v921_v54 = vmax.f32 %v863_v49, 0.0  ;;  %v892_v5 = vadd.f32 1.0, %v3652_v2  ;;  %v3284_v6 = vmul.f32 -1.442695, %v863_v49  ;;  %v893_v7 = vadd.f32 1.0, %v3654_v3 }
 0x4f6   :  { %988 = vrot.lane.b32.xlu1 %v855_v44, %s4074_s26  ;;  %v919_v50 = vmax.f32 %v855_v44, 0.0  ;;  %v3282_v63 = vmul.f32 -1.442695, %v855_v44  ;;  %3657 = vpow2.f32 %v3281_v62 }
 0x4f8   :  { %938 = vrot.lane.b32.xlu0 %v918_v48, %s4083_s8  ;;  %3659 = vpow2.f32 %v3282_v63  ;;  %v4477_v63 = vld [vmem:[%s5106_s11 + $0x34] ss:$8 sps:$4 sm:$0xff]  }
 0x4f9   :  { %3661 = vrcp.f32 %v891_v1 }
 0x4fa   :  { %940 = vrot.lane.b32.xlu1 %v919_v50, %s4083_s8  ;;  %3663 = vpow2.f32 %v3283_v4 }
 0x4fb   :  { %3665 = vrcp.f32 %v892_v5 }
 0x4fc   :  { %942 = vrot.lane.b32.xlu0 %v920_v52, %s4083_s8  ;;  %3667 = vpow2.f32 %v3284_v6  ;;  %v4463_v52 = vld [vmem:[%s5106_s11 + $0x24] ss:$8 sps:$4 sm:$0xff]  }
 0x4fd   :  { %v3656_v8 = vpop.eup %3655  ;;  %3669 = vrcp.f32 %v893_v7 }
 0x4fe   :  { %944 = vrot.lane.b32.xlu1 %v921_v54, %s4083_s8  ;;  %v962_v19 = vsub.f32 1.0, %v3656_v8 }
 0x500   :  { %990 = vrot.lane.b32.xlu0 %v860_v46, %s4074_s26  ;;  %v3658_v9 = vpop.eup %3657  ;;  %v4456_v46 = vld [vmem:[%s5106_s11 + $0x10] ss:$8 sps:$4 sm:$0xff]  }
 0x501   :  { %v894_v16 = vadd.f32 1.0, %v3658_v9 }
 0x502   :  { %992 = vrot.lane.b32.xlu1 %v863_v49, %s4074_s26  ;;  %v3660_v11 = vpop.eup %3659 }
 0x503   :  { %v3662_v12 = vpop.eup %3661  ;;  %v895_v17 = vadd.f32 1.0, %v3660_v11  ;;  %3671 = vrcp.f32 %v894_v16 }
 0x504   :  { %v963_v20 = vsub.f32 1.0, %v3662_v12  ;;  %v3664_v23 = vpop.eup %3663 }
 0x505   :  { %v3666_v27 = vpop.eup %3665  ;;  %3673 = vrcp.f32 %v895_v17  ;;  %v896_v34 = vadd.f32 1.0, %v3664_v23 }
 0x506   :  { %v3668_v30 = vpop.eup %3667  ;;  %v964_v38 = vsub.f32 1.0, %v3666_v27 }
 0x507   :  { %v3670_v33 = vpop.eup %3669  ;;  %v897_v40 = vadd.f32 1.0, %v3668_v30  ;;  %3675 = vrcp.f32 %v896_v34  ;;  %v1024_v30 = vshrl.u32 %v208_v15, 7 }
 0x508   :  { %v965_v43 = vsub.f32 1.0, %v3670_v33 }
 0x509   :  { %3677 = vrcp.f32 %v897_v40  ;;  %v1025_v34 = vsub.s32 0, %v1024_v30 }
 0x50d   :  { %v3672_v55 = vpop.eup %3671 }
 0x50e   :  { %v966_v1 = vsub.f32 1.0, %v3672_v55 }
 0x50f   :  { %v3674_v58 = vpop.eup %3673 }
 0x510   :  { %v967_v2 = vsub.f32 1.0, %v3674_v58 }
 0x511   :  { %v3676_v9 = vpop.eup %3675 }
 0x556   :  { %v979_v10 = vpop.permute.xlu0 %978 }
 0x557   :  { %v1002_v24 = vmul.f32 %v979_v10, %v962_v19 }
 0x558   :  { %v981_v13 = vpop.permute.xlu1 %980 }
 0x559   :  { %v1003_v25 = vmul.f32 %v981_v13, %v963_v20  ;;  %v3678_v13 = vpop.eup %3677 }
 0x55a   :  { %v931_v18 = vpop.permute.xlu0 %930 }
 0x55b   :  { %v954_v21 = vmul.f32 %v3656_v8, %v931_v18  ;;  %v4488_v8 = vld [vmem:[%s5106_s11 + $0x30] ss:$8 sps:$4 sm:$0xff]   ;;  %v968_v18 = vsub.f32 1.0, %v3676_v9 }
 0x55c   :  { %v933_v22 = vpop.permute.xlu1 %932 }
 0x55d   :  { %v955_v26 = vmul.f32 %v3662_v12, %v933_v22  ;;  %v1010_v31 = vadd.f32 %v1002_v24, %v954_v21  ;;  %v969_v21 = vsub.f32 1.0, %v3678_v13 }
 0x55e   :  { %v935_v29 = vpop.permute.xlu0 %934 }
 0x55f   :  { %v1011_v32 = vadd.f32 %v1003_v25, %v955_v26  ;;  %v956_v48 = vmul.f32 %v3666_v27, %v935_v29 }
 0x560   :  { %v937_v35 = vpop.permute.xlu1 %936 }
 0x561   :  { %v1018_v37 = vpack.c.bf16 %v1011_v32, %v1010_v31  ;;  %v957_v49 = vmul.f32 %v3670_v33, %v937_v35  ;;  %v1033_v31 = vsub.s32 2, %v1024_v30  ;;  %v159_v32 = vld [vmem:[#allocation8] sm:$0xf]  ;;  %v1037_v33 = vsub.s32 3, %v1024_v30 }
 0x562   :  { %v983_v41 = vpop.permute.xlu0 %982 }
 0x563   :  { %v1004_v42 = vmul.f32 %v983_v41, %v964_v38  ;;  %3293 = vmatmul.mubr.msk.bf16.vlgmr.msra.gmra.mrb[16].mxu1 %vm438_vm11, %v1018_v37  ;;  %3297 = vmatmul.mubr.msk.bf16.vlgmr.msra.gmra.mrb[20].mxu0 %vm438_vm11, %v1018_v37  ;;  %v4517_v35 = vrot.slane %v159_v32, %v1033_v31  ;;  %v1029_v37 = vsub.s32 1, %v1024_v30  ;;  %v4519_v38 = vrot.slane %v159_v32, %v1037_v33 }
 0x564   :  { %1287 = vmatpush1.bf16.msra.mxu1 %v4442_v36  ;;  %v985_v44 = vpop.permute.xlu1 %984  ;;  %1137 = vmatprep.mubr.bf16.mxu1 %v4080_v0 }
 0x565   :  { %v1005_v50 = vmul.f32 %v985_v44, %v965_v43  ;;  %1210 = vmatprep.mubr.bf16.mxu0 %v4080_v0  ;;  %1288 = vmatprep.subr.bf16.mxu1 %v4447_v39  ;;  %v1012_v56 = vadd.f32 %v1004_v42, %v956_v48  ;;  %v4521_v42 = vrot.slane %v159_v32, %v1025_v34 }
 0x566   :  { %v987_v54 = vpop.permute.xlu0 %986  ;;  %1366 = vmatpush1.bf16.msra.mxu0 %v4442_v36 }
 0x567   :  { %v1013_v57 = vadd.f32 %v1005_v50, %v957_v49  ;;  %1367 = vmatprep.subr.bf16.mxu0 %v4447_v39  ;;  %v1006_v5 = vmul.f32 %v987_v54, %v966_v1  ;;  %v4526_v49 = vrot.slane %v159_v32, %v1029_v37 }
 0x568   :  { %v989_v59 = vpop.permute.xlu1 %988  ;;  %1289 = vmatpush1.bf16.msra.mxu1 %v4456_v46 }
 0x569   :  { %v1019_v60 = vpack.c.bf16 %v1013_v57, %v1012_v56  ;;  %1290 = vmatprep.subr.bf16.mxu1 %v4463_v52  ;;  %v1007_v6 = vmul.f32 %v989_v59, %v967_v2 }
 0x56a   :  { %v939_v62 = vpop.permute.xlu0 %938  ;;  %1368 = vmatpush1.bf16.msra.mxu0 %v4456_v46 }
 0x56b   :  { %v958_v3 = vmul.f32 %v3672_v55, %v939_v62  ;;  %3294 = vmatmul.mubr.msk.bf16.gmra.mrb[20].mxu1 %vm438_vm11, %v1019_v60  ;;  %3298 = vmatmul.mubr.msk.bf16.gmra.mrb[24].mxu0 %vm438_vm11, %v1019_v60 }
 0x56c   :  { %v941_v4 = vpop.permute.xlu1 %940  ;;  %1147 = vmatprep.mubr.bf16.mxu1 %v4080_v0  ;;  %1220 = vmatprep.mubr.bf16.mxu0 %v4080_v0 }
 0x56d   :  { %v959_v7 = vmul.f32 %v3674_v58, %v941_v4  ;;  %1291 = vmatpush1.bf16.msra.mxu1 %v4472_v61  ;;  %1369 = vmatprep.subr.bf16.mxu0 %v4463_v52  ;;  %v1014_v11 = vadd.f32 %v1006_v5, %v958_v3 }
 0x56e   :  { %v943_v10 = vpop.permute.xlu0 %942  ;;  %1292 = vmatprep.subr.bf16.mxu1 %v4477_v63  ;;  %1370 = vmatpush1.bf16.msra.mxu0 %v4472_v61 }
 0x56f   :  { %v1015_v12 = vadd.f32 %v1007_v6, %v959_v7  ;;  %1371 = vmatprep.subr.bf16.mxu0 %v4477_v63  ;;  %v960_v23 = vmul.f32 %v3676_v9, %v943_v10 }
 0x570   :  { %v945_v16 = vpop.permute.xlu1 %944 }
 0x571   :  { %v1020_v17 = vpack.c.bf16 %v1015_v12, %v1014_v11  ;;  %1293 = vmatpush1.bf16.msra.mxu1 %v4488_v8  ;;  %v961_v24 = vmul.f32 %v3678_v13, %v945_v16 }
 0x572   :  { %v991_v19 = vpop.permute.xlu0 %990  ;;  %1372 = vmatpush1.bf16.msra.mxu0 %v4488_v8  ;;  %1444 = vmatprep.subr.bf16.mxu1 %v4419_v28 }
 0x573   :  { %v1008_v20 = vmul.f32 %v991_v19, %v968_v18  ;;  %3295 = vmatmul.mubr.msk.bf16.gmra.mrb[24].mxu1 %vm438_vm11, %v1020_v17  ;;  %3299 = vmatmul.mubr.msk.bf16.gmra.mrb[28].mxu0 %vm438_vm11, %v1020_v17 }
 0x574   :  { %v993_v22 = vpop.permute.xlu1 %992  ;;  %1157 = vmatprep.mubr.bf16.mxu1 %v4080_v0  ;;  %1230 = vmatprep.mubr.bf16.mxu0 %v4080_v0 }
 0x575   :  { %v1009_v25 = vmul.f32 %v993_v22, %v969_v21  ;;  %1523 = vmatprep.subr.bf16.mxu0 %v4419_v28  ;;  %v1016_v26 = vadd.f32 %v1008_v20, %v960_v23 }
 0x577   :  { %v1017_v27 = vadd.f32 %v1009_v25, %v961_v24 }
 0x579   :  { %v1021_v29 = vpack.c.bf16 %v1017_v27, %v1016_v26 }
 0x57b   :  { %3296 = vmatmul.mubr.msk.bf16.gmra.mrb[28].mxu1 %vm438_vm11, %v1021_v29  ;;  %3300 = vmatmul.mubr.msk.bf16.gmra.mrb[32].mxu0 %vm438_vm11, %v1021_v29 }
 0x57c   :  { %1318 = vmatprep.mubr.bf16.mxu1 %v4080_v0  ;;  %1397 = vmatprep.mubr.bf16.mxu0 %v4080_v0 }
 0x583   :  { %1319 = vmatmul.mubr.bf16.vlgmr.msra.gmra.mrb[32].mxu1 %v4080_v0 }
 0x584   :  { %1445 = vmatpush1.bf16.msra.mxu1 %v4442_v36  ;;  %1476 = vmatprep.mubr.bf16.mxu1 %v4080_v0 }
 0x585   :  { %1446 = vmatprep.subr.bf16.mxu1 %v4447_v39 }
 0x588   :  { %1447 = vmatpush1.bf16.msra.mxu1 %v4456_v46 }
 0x589   :  { %1448 = vmatprep.subr.bf16.mxu1 %v4463_v52 }
 0x58c   :  { %1449 = vmatpush1.bf16.msra.mxu1 %v4472_v61 }
 0x58d   :  { %1450 = vmatprep.subr.bf16.mxu1 %v4477_v63 }
 0x590   :  { %1451 = vmatpush1.bf16.msra.mxu1 %v4488_v8 }
 0x591   :  { %1602 = vmatprep.subr.bf16.mxu1 %v4419_v28 }
 0x636   :  { %v1129_v40 = vpop.f32.mrb[16].mxu1  ;;  %v1202_v41 = vpop.f32.mrb[20].mxu0 }
 0x637   :  { %v4524_v43 = vadd.f32 %v1202_v41, %v4517_v35  ;;  %v1131_v44 = vpop.f32.mrb[17].mxu1  ;;  %v1204_v48 = vpop.f32.mrb[21].mxu0 }
 0x638   :  { %v4529_v15 = vadd.f32 %v1204_v48, %v4519_v38  ;;  %v1133_v50 = vpop.f32.mrb[18].mxu1  ;;  %v1206_v54 = vpop.f32.mrb[22].mxu0 }
 0x639   :  { %v1134_v55 = vadd.f32 %v1133_v50, %v4521_v42  ;;  %v1207_v56 = vadd.f32 %v1206_v54, %v4517_v35  ;;  %v1135_v57 = vpop.f32.mrb[19].mxu1  ;;  %v1208_v58 = vpop.f32.mrb[23].mxu0 }
 0x63a   :  { %v1136_v59 = vadd.f32 %v1135_v57, %v4526_v49  ;;  %v1209_v60 = vadd.f32 %v1208_v58, %v4519_v38 }
 0x63e   :  { %v1139_v62 = vpop.f32.mrb[20].mxu1  ;;  %v1212_v1 = vpop.f32.mrb[24].mxu0 }
 0x63f   :  { %v1140_v2 = vadd.f32 %v1139_v62, %v4521_v42  ;;  %v1213_v3 = vadd.f32 %v1212_v1, %v4517_v35  ;;  %v1141_v4 = vpop.f32.mrb[21].mxu1  ;;  %v1214_v5 = vpop.f32.mrb[25].mxu0 }
 0x640   :  { %v1142_v6 = vadd.f32 %v1141_v4, %v4526_v49  ;;  %v1215_v7 = vadd.f32 %v1214_v5, %v4519_v38  ;;  %v1143_v9 = vpop.f32.mrb[22].mxu1  ;;  %v1216_v10 = vpop.f32.mrb[26].mxu0 }
 0x641   :  { %v1144_v11 = vadd.f32 %v1143_v9, %v4521_v42  ;;  %v1217_v12 = vadd.f32 %v1216_v10, %v4517_v35  ;;  %v1145_v13 = vpop.f32.mrb[23].mxu1  ;;  %v1218_v16 = vpop.f32.mrb[27].mxu0 }
 0x642   :  { %v1146_v17 = vadd.f32 %v1145_v13, %v4526_v49  ;;  %v1219_v18 = vadd.f32 %v1218_v16, %v4519_v38  ;;  %v1130_v13 = vadd.f32 %v1129_v40, %v4521_v42  ;;  %v1132_v16 = vadd.f32 %v1131_v44, %v4526_v49 }
 0x646   :  { %v1149_v19 = vpop.f32.mrb[24].mxu1  ;;  %v1222_v20 = vpop.f32.mrb[28].mxu0 }
 0x647   :  { %v1150_v21 = vadd.f32 %v1149_v19, %v4521_v42  ;;  %v1223_v22 = vadd.f32 %v1222_v20, %v4517_v35  ;;  %v1151_v23 = vpop.f32.mrb[25].mxu1  ;;  %v1224_v24 = vpop.f32.mrb[29].mxu0 }
 0x648   :  { %v1152_v25 = vadd.f32 %v1151_v23, %v4526_v49  ;;  %v1225_v26 = vadd.f32 %v1224_v24, %v4519_v38  ;;  %v1153_v27 = vpop.f32.mrb[26].mxu1  ;;  %v1226_v29 = vpop.f32.mrb[30].mxu0 }
 0x649   :  { %v1154_v30 = vadd.f32 %v1153_v27, %v4521_v42  ;;  %v1227_v31 = vadd.f32 %v1226_v29, %v4517_v35  ;;  %v1155_v32 = vpop.f32.mrb[27].mxu1  ;;  %v1228_v33 = vpop.f32.mrb[31].mxu0  ;;  %v4549_v34 = vadd.f32 %v1223_v22, %v1144_v11  ;;  %v4551_v37 = vadd.f32 %v1217_v12, %v1150_v21 }
 0x64a   :  { %v1156_v41 = vadd.f32 %v1155_v32, %v4526_v49  ;;  %v1229_v48 = vadd.f32 %v1228_v33, %v4519_v38  ;;  %v4555_v50 = vadd.f32 %v1225_v26, %v1146_v17  ;;  %v4557_v54 = vadd.f32 %v1219_v18, %v1152_v25 }
 0x64b   :  { %v4559_v57 = vadd.f32 %v1227_v31, %v1140_v2  ;;  %v4561_v58 = vadd.f32 %v1213_v3, %v1154_v30 }
 0x64c   :  { %v4563_v62 = vadd.f32 %v1229_v48, %v1142_v6  ;;  %v4565_v1 = vadd.f32 %v1215_v7, %v1156_v41 }
 0x64e   :  { %v1159_v4 = vpop.f32.mrb[28].mxu1  ;;  %v1232_v5 = vpop.f32.mrb[32].mxu0 }
 0x64f   :  { %v1160_v9 = vadd.f32 %v1159_v4, %v4521_v42  ;;  %v1233_v10 = vadd.f32 %v1232_v5, %v4517_v35  ;;  %v1161_v11 = vpop.f32.mrb[29].mxu1  ;;  %v1234_v12 = vpop.f32.mrb[33].mxu0 }
 0x650   :  { %v1162_v2 = vadd.f32 %v1161_v11, %v4526_v49  ;;  %v1235_v3 = vadd.f32 %v1234_v12, %v4519_v38  ;;  %v1163_v6 = vpop.f32.mrb[30].mxu1  ;;  %v1236_v17 = vpop.f32.mrb[34].mxu0 }
 0x651   :  { %v1164_v7 = vadd.f32 %v1163_v6, %v4521_v42  ;;  %v1237_v18 = vadd.f32 %v1236_v17, %v4517_v35  ;;  %v1165_v19 = vpop.f32.mrb[31].mxu1  ;;  %v1238_v20 = vpop.f32.mrb[35].mxu0  ;;  %v1359_v21 = vadd.f32 %v1233_v10, %v1134_v55  ;;  %v4575_v22 = vadd.f32 %v1207_v56, %v1160_v9 }
 0x652   :  { %v1166_v23 = vadd.f32 %v1165_v19, %v4526_v49  ;;  %v1239_v40 = vadd.f32 %v1238_v20, %v4519_v38  ;;  %v1360_v44 = vadd.f32 %v1235_v3, %v1136_v59  ;;  %v4579_v24 = vadd.f32 %v1209_v60, %v1162_v2 }
 0x653   :  { %v1241_v25 = vadd.f32 %v1237_v18, %v1130_v13  ;;  %v4582_v26 = vadd.f32 %v4524_v43, %v1164_v7 }
 0x654   :  { %v1242_v27 = vadd.f32 %v1239_v40, %v1132_v16  ;;  %v4585_v42 = vadd.f32 %v4529_v15, %v1166_v23 }
 0x656   :  { %v1320_v35 = vpop.f32.mrb[32].mxu1 }
 0x657   :  { %v1327_v29 = vadd.f32 %v1320_v35, %v1241_v25  ;;  %v1322_v55 = vpop.f32.mrb[33].mxu1 }
 0x658   :  { %v1328_v56 = vadd.f32 %v1322_v55, %v1242_v27  ;;  %v1324_v30 = vpop.f32.mrb[34].mxu1 }
 0x659   :  { %v1325_v31 = vpop.f32.mrb[35].mxu1  ;;  %v3309_v38 = vmul.f32 -1.442695, %v1327_v29 }
 0x65a   :  { %3679 = vtanh.f32 %v1328_v56  ;;  %v3310_v5 = vmul.f32 -1.442695, %v1328_v56 }
 0x65b   :  { %3681 = vpow2.f32 %v3309_v38 }
 0x664   :  { %v3680_v49 = vpop.eup %3679 }
 0x665   :  { %1344 = vrot.lane.b32.xlu0 %v3680_v49, %s4074_s26  ;;  %v3682_v59 = vpop.eup %3681 }
 0x666   :  { %v1335_v60 = vadd.f32 1.0, %v3682_v59 }
 0x668   :  { %3683 = vrcp.f32 %v1335_v60 }
 0x672   :  { %v3684_v43 = vpop.eup %3683 }
 0x673   :  { %v1342_v15 = vmul.f32 0.0, %v3684_v43 }
 0x6d7   :  { %v1345_v32 = vpop.permute.xlu0 %1344 }
 0x6d8   :  { %v1347_v33 = vmul.f32 %v3684_v43, %v1345_v32 }
 0x6da   :  { %1349 = vrot.lane.b32.xlu1 %v1347_v33, %s4074_s26 }
 0x74c   :  { %v1350_v41 = vpop.permute.xlu1 %1349 }
 0x74d   :  { %v1352_v48 = vadd.f32 %v1350_v41, %v1342_v15 }
 0x74f   :  { %3685 = vtanh.f32 %v1352_v48 }
 0x750   :  { %3687 = vpow2.f32 %v3310_v5 }
 0x759   :  { %v3686_v4 = vpop.eup %3685 }
 0x75a   :  { %1355 = vrot.lane.b32.xlu0 %v3686_v4, %s4074_s26  ;;  %v3688_v9 = vpop.eup %3687 }
 0x75b   :  { %v1336_v10 = vadd.f32 1.0, %v3688_v9 }
 0x75d   :  { %3689 = vrcp.f32 %v1336_v10 }
 0x767   :  { %v3690_v11 = vpop.eup %3689 }
 0x7cc   :  { %v1356_v12 = vpop.permute.xlu0 %1355 }
 0x7cd   :  { %v1358_v13 = vmul.f32 %v3690_v11, %v1356_v12 }
 0x7cf   :  { %v1361_v16 = vpack.c.bf16 %v1358_v13, %v1358_v13 }
 0x7d1   :  { %3311 = vmatmul.mubr.msk.bf16.vlgmr.msra.gmra.mrb[36].mxu0 %vm286_vm4, %v1361_v16 }
 0x7d2   :  { %1524 = vmatpush1.bf16.msra.mxu0 %v4442_v36  ;;  %1555 = vmatprep.mubr.bf16.mxu0 %v4080_v0 }
 0x7d3   :  { %1525 = vmatprep.subr.bf16.mxu0 %v4447_v39 }
 0x7d6   :  { %1526 = vmatpush1.bf16.msra.mxu0 %v4456_v46 }
 0x7d7   :  { %1527 = vmatprep.subr.bf16.mxu0 %v4463_v52 }
 0x7da   :  { %1528 = vmatpush1.bf16.msra.mxu0 %v4472_v61 }
 0x7db   :  { %1529 = vmatprep.subr.bf16.mxu0 %v4477_v63 }
 0x7de   :  { %1530 = vmatpush1.bf16.msra.mxu0 %v4488_v8 }
 0x7df   :  { %1681 = vmatprep.subr.bf16.mxu0 %v4419_v28 }
 0x8a4   :  { %v1399_v2 = vpop.f32.mrb[36].mxu0 }
 0x8a5   :  { %v1406_v3 = vadd.f32 %v1399_v2, %v1359_v21  ;;  %v1401_v6 = vpop.f32.mrb[37].mxu0 }
 0x8a6   :  { %v1407_v17 = vadd.f32 %v1401_v6, %v1360_v44  ;;  %v1403_v7 = vpop.f32.mrb[38].mxu0 }
 0x8a7   :  { %v1404_v18 = vpop.f32.mrb[39].mxu0  ;;  %v3312_v20 = vmul.f32 -1.442695, %v1406_v3 }
 0x8a8   :  { %3691 = vtanh.f32 %v1407_v17  ;;  %v3313_v56 = vmul.f32 -1.442695, %v1407_v17 }
 0x8a9   :  { %3693 = vpow2.f32 %v3312_v20 }
 0x8b2   :  { %v3692_v19 = vpop.eup %3691 }
 0x8b3   :  { %1423 = vrot.lane.b32.xlu1 %v3692_v19, %s4074_s26  ;;  %v3694_v23 = vpop.eup %3693 }
 0x8b4   :  { %v1414_v40 = vadd.f32 1.0, %v3694_v23 }
 0x8b6   :  { %3695 = vrcp.f32 %v1414_v40 }
 0x8c0   :  { %v3696_v25 = vpop.eup %3695 }
 0x8c1   :  { %v1421_v29 = vmul.f32 %v3696_v25, %v1352_v48 }
 0x925   :  { %v1424_v27 = vpop.permute.xlu1 %1423 }
 0x926   :  { %v1426_v35 = vmul.f32 %v3696_v25, %v1424_v27 }
 0x928   :  { %1428 = vrot.lane.b32.xlu0 %v1426_v35, %s4074_s26 }
 0x99a   :  { %v1429_v21 = vpop.permute.xlu0 %1428 }
 0x99b   :  { %v1431_v55 = vadd.f32 %v1429_v21, %v1421_v29 }
 0x99d   :  { %3697 = vtanh.f32 %v1431_v55 }
 0x99e   :  { %3699 = vpow2.f32 %v3313_v56 }
 0x9a7   :  { %v3698_v44 = vpop.eup %3697 }
 0x9a8   :  { %1434 = vrot.lane.b32.xlu1 %v3698_v44, %s4074_s26  ;;  %v3700_v30 = vpop.eup %3699 }
 0x9a9   :  { %v1415_v31 = vadd.f32 1.0, %v3700_v30 }
 0x9ab   :  { %3701 = vrcp.f32 %v1415_v31 }
 0x9b5   :  { %v3702_v49 = vpop.eup %3701 }
 0xa1a   :  { %v1435_v38 = vpop.permute.xlu1 %1434 }
 0xa1b   :  { %v1437_v59 = vmul.f32 %v3702_v49, %v1435_v38 }
 0xa1d   :  { %v1440_v60 = vpack.c.bf16 %v1437_v59, %v1437_v59 }
 0xa1f   :  { %3314 = vmatmul.mubr.msk.bf16.vlgmr.msra.gmra.mrb[36].mxu1 %vm286_vm4, %v1440_v60 }
 0xa20   :  { %1603 = vmatpush1.bf16.msra.mxu1 %v4442_v36  ;;  %1634 = vmatprep.mubr.bf16.mxu1 %v4080_v0 }
 0xa21   :  { %1604 = vmatprep.subr.bf16.mxu1 %v4447_v39 }
 0xa24   :  { %1605 = vmatpush1.bf16.msra.mxu1 %v4456_v46 }
 0xa25   :  { %1606 = vmatprep.subr.bf16.mxu1 %v4463_v52 }
 0xa28   :  { %1607 = vmatpush1.bf16.msra.mxu1 %v4472_v61 }
 0xa29   :  { %1608 = vmatprep.subr.bf16.mxu1 %v4477_v63 }
 0xa2c   :  { %1609 = vmatpush1.bf16.msra.mxu1 %v4488_v8 }
 0xa2d   :  { %1760 = vmatprep.subr.bf16.mxu1 %v4419_v28 }
 0xaf2   :  { %v1478_v43 = vpop.f32.mrb[36].mxu1 }
 0xaf3   :  { %v1485_v32 = vadd.f32 %v1478_v43, %v4559_v57  ;;  %v1480_v33 = vpop.f32.mrb[37].mxu1 }
 0xaf4   :  { %v1486_v15 = vadd.f32 %v1480_v33, %v4563_v62  ;;  %v1482_v41 = vpop.f32.mrb[38].mxu1 }
 0xaf5   :  { %v1483_v48 = vpop.f32.mrb[39].mxu1  ;;  %v3315_v5 = vmul.f32 -1.442695, %v1485_v32 }
 0xaf6   :  { %3703 = vtanh.f32 %v1486_v15  ;;  %v3316_v3 = vmul.f32 -1.442695, %v1486_v15 }
 0xaf7   :  { %3705 = vpow2.f32 %v3315_v5 }
 0xb00   :  { %v3704_v4 = vpop.eup %3703 }
 0xb01   :  { %1502 = vrot.lane.b32.xlu0 %v3704_v4, %s4074_s26  ;;  %v3706_v9 = vpop.eup %3705 }
 0xb02   :  { %v1493_v10 = vadd.f32 1.0, %v3706_v9 }
 0xb04   :  { %3707 = vrcp.f32 %v1493_v10 }
 0xb0e   :  { %v3708_v11 = vpop.eup %3707 }
 0xb0f   :  { %v1500_v57 = vmul.f32 %v3708_v11, %v1431_v55 }
 0xb73   :  { %v1503_v12 = vpop.permute.xlu0 %1502 }
 0xb74   :  { %v1505_v13 = vmul.f32 %v3708_v11, %v1503_v12 }
 0xb76   :  { %1507 = vrot.lane.b32.xlu1 %v1505_v13, %s4074_s26 }
 0xbe8   :  { %v1508_v16 = vpop.permute.xlu1 %1507 }
 0xbe9   :  { %v1510_v2 = vadd.f32 %v1508_v16, %v1500_v57 }
 0xbeb   :  { %3709 = vtanh.f32 %v1510_v2 }
 0xbec   :  { %3711 = vpow2.f32 %v3316_v3 }
 0xbf5   :  { %v3710_v62 = vpop.eup %3709 }
 0xbf6   :  { %1513 = vrot.lane.b32.xlu0 %v3710_v62, %s4074_s26  ;;  %v3712_v6 = vpop.eup %3711 }
 0xbf7   :  { %v1494_v17 = vadd.f32 1.0, %v3712_v6 }
 0xbf9   :  { %3713 = vrcp.f32 %v1494_v17 }
 0xc03   :  { %v3714_v7 = vpop.eup %3713 }
 0xc68   :  { %v1514_v18 = vpop.permute.xlu0 %1513 }
 0xc69   :  { %v1516_v19 = vmul.f32 %v3714_v7, %v1514_v18 }
 0xc6b   :  { %v1519_v20 = vpack.c.bf16 %v1516_v19, %v1516_v19 }
 0xc6d   :  { %3317 = vmatmul.mubr.msk.bf16.vlgmr.msra.gmra.mrb[40].mxu0 %vm286_vm4, %v1519_v20 }
 0xc6e   :  { %1682 = vmatpush1.bf16.msra.mxu0 %v4442_v36  ;;  %1713 = vmatprep.mubr.bf16.mxu0 %v4080_v0 }
 0xc6f   :  { %1683 = vmatprep.subr.bf16.mxu0 %v4447_v39 }
 0xc72   :  { %1684 = vmatpush1.bf16.msra.mxu0 %v4456_v46 }
 0xc73   :  { %1685 = vmatprep.subr.bf16.mxu0 %v4463_v52 }
 0xc76   :  { %1686 = vmatpush1.bf16.msra.mxu0 %v4472_v61 }
 0xc77   :  { %1687 = vmatprep.subr.bf16.mxu0 %v4477_v63 }
 0xc7a   :  { %1688 = vmatpush1.bf16.msra.mxu0 %v4488_v8 }
 0xc7b   :  { %1839 = vmatprep.subr.bf16.mxu0 %v4419_v28 }
 0xd40   :  { %v1557_v23 = vpop.f32.mrb[40].mxu0 }
 0xd41   :  { %v1564_v40 = vadd.f32 %v1557_v23, %v4549_v34  ;;  %v1559_v25 = vpop.f32.mrb[41].mxu0 }
 0xd42   :  { %v1565_v27 = vadd.f32 %v1559_v25, %v4555_v50  ;;  %v1561_v35 = vpop.f32.mrb[42].mxu0 }
 0xd43   :  { %v1562_v29 = vpop.f32.mrb[43].mxu0  ;;  %v3318_v55 = vmul.f32 -1.442695, %v1564_v40 }
 0xd44   :  { %3715 = vtanh.f32 %v1565_v27  ;;  %v3319_v59 = vmul.f32 -1.442695, %v1565_v27 }
 0xd45   :  { %3717 = vpow2.f32 %v3318_v55 }
 0xd4e   :  { %v3716_v21 = vpop.eup %3715 }
 0xd4f   :  { %1581 = vrot.lane.b32.xlu1 %v3716_v21, %s4074_s26  ;;  %v3718_v44 = vpop.eup %3717 }
 0xd50   :  { %v1572_v56 = vadd.f32 1.0, %v3718_v44 }
 0xd52   :  { %3719 = vrcp.f32 %v1572_v56 }
 0xd5c   :  { %v3720_v30 = vpop.eup %3719 }
 0xd5d   :  { %v1579_v34 = vmul.f32 %v3720_v30, %v1510_v2 }
 0xdc1   :  { %v1582_v31 = vpop.permute.xlu1 %1581 }
 0xdc2   :  { %v1584_v28 = vmul.f32 %v3720_v30, %v1582_v31 }
 0xdc4   :  { %1586 = vrot.lane.b32.xlu0 %v1584_v28, %s4074_s26 }
 0xe36   :  { %v1587_v49 = vpop.permute.xlu0 %1586 }
 0xe37   :  { %v1589_v38 = vadd.f32 %v1587_v49, %v1579_v34 }
 0xe39   :  { %3721 = vtanh.f32 %v1589_v38 }
 0xe3a   :  { %3723 = vpow2.f32 %v3319_v59 }
 0xe43   :  { %v3722_v50 = vpop.eup %3721 }
 0xe44   :  { %1592 = vrot.lane.b32.xlu1 %v3722_v50, %s4074_s26  ;;  %v3724_v60 = vpop.eup %3723 }
 0xe45   :  { %v1573_v43 = vadd.f32 1.0, %v3724_v60 }
 0xe47   :  { %3725 = vrcp.f32 %v1573_v43 }
 0xe51   :  { %v3726_v32 = vpop.eup %3725 }
 0xeb6   :  { %v1593_v33 = vpop.permute.xlu1 %1592 }
 0xeb7   :  { %v1595_v15 = vmul.f32 %v3726_v32, %v1593_v33 }
 0xeb9   :  { %v1598_v41 = vpack.c.bf16 %v1595_v15, %v1595_v15 }
 0xebb   :  { %3320 = vmatmul.mubr.msk.bf16.vlgmr.msra.gmra.mrb[40].mxu1 %vm286_vm4, %v1598_v41 }
 0xebc   :  { %1761 = vmatpush1.bf16.msra.mxu1 %v4442_v36  ;;  %1792 = vmatprep.mubr.bf16.mxu1 %v4080_v0 }
 0xebd   :  { %1762 = vmatprep.subr.bf16.mxu1 %v4447_v39 }
 0xec0   :  { %1763 = vmatpush1.bf16.msra.mxu1 %v4456_v46 }
 0xec1   :  { %1764 = vmatprep.subr.bf16.mxu1 %v4463_v52 }
 0xec4   :  { %1765 = vmatpush1.bf16.msra.mxu1 %v4472_v61 }
 0xec5   :  { %1766 = vmatprep.subr.bf16.mxu1 %v4477_v63 }
 0xec8   :  { %1767 = vmatpush1.bf16.msra.mxu1 %v4488_v8 }
 0xec9   :  { %3494 = vmatprep.subr.bf16.mxu1 %v4081_v14 }
 0xf8e   :  { %v1636_v48 = vpop.f32.mrb[40].mxu1 }
 0xf8f   :  { %v1643_v4 = vadd.f32 %v1636_v48, %v4551_v37  ;;  %v1638_v5 = vpop.f32.mrb[41].mxu1 }
 0xf90   :  { %v1644_v9 = vadd.f32 %v1638_v5, %v4557_v54  ;;  %v1640_v10 = vpop.f32.mrb[42].mxu1 }
 0xf91   :  { %v1641_v11 = vpop.f32.mrb[43].mxu1  ;;  %v3321_v13 = vmul.f32 -1.442695, %v1643_v4 }
 0xf92   :  { %3727 = vtanh.f32 %v1644_v9  ;;  %v3322_v7 = vmul.f32 -1.442695, %v1644_v9 }
 0xf93   :  { %3729 = vpow2.f32 %v3321_v13 }
 0xf9c   :  { %v3728_v12 = vpop.eup %3727 }
 0xf9d   :  { %1660 = vrot.lane.b32.xlu0 %v3728_v12, %s4074_s26  ;;  %v3730_v57 = vpop.eup %3729 }
 0xf9e   :  { %v1651_v16 = vadd.f32 1.0, %v3730_v57 }
 0xfa0   :  { %3731 = vrcp.f32 %v1651_v16 }
 0xfaa   :  { %v3732_v2 = vpop.eup %3731 }
 0xfab   :  { %v1658_v37 = vmul.f32 %v3732_v2, %v1589_v38 }
0x100f   :  { %v1661_v62 = vpop.permute.xlu0 %1660 }
0x1010   :  { %v1663_v3 = vmul.f32 %v3732_v2, %v1661_v62 }
0x1012   :  { %1665 = vrot.lane.b32.xlu1 %v1663_v3, %s4074_s26 }
0x1084   :  { %v1666_v6 = vpop.permute.xlu1 %1665 }
0x1085   :  { %v1668_v17 = vadd.f32 %v1666_v6, %v1658_v37 }
0x1087   :  { %3733 = vtanh.f32 %v1668_v17 }
0x1088   :  { %3735 = vpow2.f32 %v3322_v7 }
0x1091   :  { %v3734_v54 = vpop.eup %3733 }
0x1092   :  { %1671 = vrot.lane.b32.xlu0 %v3734_v54, %s4074_s26  ;;  %v3736_v18 = vpop.eup %3735 }
0x1093   :  { %v1652_v19 = vadd.f32 1.0, %v3736_v18 }
0x1095   :  { %3737 = vrcp.f32 %v1652_v19 }
0x109f   :  { %v3738_v20 = vpop.eup %3737 }
0x1104   :  { %v1672_v23 = vpop.permute.xlu0 %1671 }
0x1105   :  { %v1674_v40 = vmul.f32 %v3738_v20, %v1672_v23 }
0x1107   :  { %v1677_v25 = vpack.c.bf16 %v1674_v40, %v1674_v40 }
0x1109   :  { %3323 = vmatmul.mubr.msk.bf16.vlgmr.msra.gmra.mrb[44].mxu0 %vm286_vm4, %v1677_v25 }
0x110a   :  { %1840 = vmatpush1.bf16.msra.mxu0 %v4442_v36  ;;  %1871 = vmatprep.mubr.bf16.mxu0 %v4080_v0 }
0x110b   :  { %1841 = vmatprep.subr.bf16.mxu0 %v4447_v39 }
0x110e   :  { %1842 = vmatpush1.bf16.msra.mxu0 %v4456_v46 }
0x110f   :  { %1843 = vmatprep.subr.bf16.mxu0 %v4463_v52 }
0x1112   :  { %1844 = vmatpush1.bf16.msra.mxu0 %v4472_v61 }
0x1113   :  { %1845 = vmatprep.subr.bf16.mxu0 %v4477_v63 }
0x1116   :  { %1846 = vmatpush1.bf16.msra.mxu0 %v4488_v8 }
0x1117   :  { %3506 = vmatprep.subr.bf16.mxu0 %v4081_v14 }
0x11dc   :  { %v1715_v27 = vpop.f32.mrb[44].mxu0 }
0x11dd   :  { %v1722_v35 = vadd.f32 %v1715_v27, %v4561_v58  ;;  %v1717_v36 = vpop.f32.mrb[45].mxu0 }
0x11de   :  { %v1723_v29 = vadd.f32 %v1717_v36, %v4565_v1  ;;  %v1719_v21 = vpop.f32.mrb[46].mxu0 }
0x11df   :  { %v1720_v39 = vpop.f32.mrb[47].mxu0  ;;  %v3324_v52 = vmul.f32 -1.442695, %v1722_v35 }
0x11e0   :  { %3739 = vtanh.f32 %v1723_v29  ;;  %v3325_v31 = vmul.f32 -1.442695, %v1723_v29  ;;  %v3595_v39 = vld [vmem:[%s5107_s12 + $0x10] sm:$0xff]  }
0x11e1   :  { %3741 = vpow2.f32 %v3324_v52 }
0x11ea   :  { %v3740_v46 = vpop.eup %3739 }
0x11eb   :  { %1739 = vrot.lane.b32.xlu1 %v3740_v46, %s4074_s26  ;;  %v3742_v61 = vpop.eup %3741 }
0x11ec   :  { %v1730_v63 = vadd.f32 1.0, %v3742_v61 }
0x11ee   :  { %3743 = vrcp.f32 %v1730_v63  ;;  %v3596_v63 = vld [vmem:[%s5107_s12 + $0x18] sm:$0xff]  }
0x11f8   :  { %v3744_v8 = vpop.eup %3743 }
0x11f9   :  { %v1737_v58 = vmul.f32 %v3744_v8, %v1668_v17 }
0x125d   :  { %v1740_v55 = vpop.permute.xlu1 %1739 }
0x125e   :  { %v1742_v44 = vmul.f32 %v3744_v8, %v1740_v55 }
0x1260   :  { %1744 = vrot.lane.b32.xlu0 %v1742_v44, %s4074_s26 }
0x12d2   :  { %v1745_v56 = vpop.permute.xlu0 %1744 }
0x12d3   :  { %v1747_v30 = vadd.f32 %v1745_v56, %v1737_v58 }
0x12d5   :  { %3745 = vtanh.f32 %v1747_v30 }
0x12d6   :  { %3747 = vpow2.f32 %v3325_v31 }
0x12df   :  { %v3746_v1 = vpop.eup %3745 }
0x12e0   :  { %1750 = vrot.lane.b32.xlu1 %v3746_v1, %s4074_s26  ;;  %v3748_v28 = vpop.eup %3747 }
0x12e1   :  { %v1731_v34 = vadd.f32 1.0, %v3748_v28  ;;  %v3332_v28 = vld [vmem:[%s5108_s13] ss:$0 sm:$0xff]  ;;  %s4084_s13 = smov 112  }
0x12e3   :  { %3749 = vrcp.f32 %v1731_v34 }
0x12ed   :  { %v3750_v49 = vpop.eup %3749 }
0x1352   :  { %v1751_v38 = vpop.permute.xlu1 %1750 }
0x1353   :  { %v1753_v50 = vmul.f32 %v3750_v49, %v1751_v38 }
0x1355   :  { %v1756_v59 = vpack.c.bf16 %v1753_v50, %v1753_v50 }
0x1357   :  { %3326 = vmatmul.mubr.msk.bf16.vlgmr.msra.gmra.mrb[44].mxu1 %vm286_vm4, %v1756_v59 }
0x1358   :  { %3502 = vmatprep.mubr.msk.bf16.mxu1 %vm4082_vm9, %v4081_v14 }
0x142a   :  { %v1794_v60 = vpop.f32.mrb[44].mxu1 }
0x142b   :  { %v1801_v43 = vadd.f32 %v1794_v60, %v4575_v22  ;;  %v1796_v32 = vpop.f32.mrb[45].mxu1 }
0x142c   :  { %v1802_v33 = vadd.f32 %v1796_v32, %v4579_v24  ;;  %v1798_v15 = vpop.f32.mrb[46].mxu1  ;;  %v3597_v32 = vld [vmem:[%s5110_s15] sm:$0xff]  }
0x142d   :  { %v1799_v41 = vpop.f32.mrb[47].mxu1  ;;  %v3327_v4 = vmul.f32 -1.442695, %v1801_v43 }
0x142e   :  { %3751 = vtanh.f32 %v1802_v33  ;;  %v3328_v16 = vmul.f32 -1.442695, %v1802_v33  ;;  %v3598_v33 = vld [vmem:[%s5110_s15 + $0x8] sm:$0xff]   ;;  %v3599_v41 = vld [vmem:[%s5109_s14] sm:$0xff]  }
0x142f   :  { %3753 = vpow2.f32 %v3327_v4 }
0x1438   :  { %v3752_v48 = vpop.eup %3751 }
0x1439   :  { %1818 = vrot.lane.b32.xlu0 %v3752_v48, %s4074_s26  ;;  %v3754_v5 = vpop.eup %3753  ;;  %v1986_v48 = vld [vmem:[%s5149_s30] sm:$0xff] }
0x143a   :  { %v1809_v9 = vadd.f32 1.0, %v3754_v5 }
0x143c   :  { %3755 = vrcp.f32 %v1809_v9 }
0x1446   :  { %v3756_v10 = vpop.eup %3755 }
0x1447   :  { %v1816_v22 = vmul.f32 %v3756_v10, %v1747_v30 }
0x14ab   :  { %v1819_v11 = vpop.permute.xlu0 %1818 }
0x14ac   :  { %v1821_v12 = vmul.f32 %v3756_v10, %v1819_v11  ;;  %v3907_v10 = vld [vmem:[%s5147_s29] sm:$0xff] }
0x14ae   :  { %1823 = vrot.lane.b32.xlu1 %v1821_v12, %s4074_s26 }
0x1520   :  { %v1824_v13 = vpop.permute.xlu1 %1823 }
0x1521   :  { %v1826_v57 = vadd.f32 %v1824_v13, %v1816_v22  ;;  %v3600_v22 = vld [vmem:[%s5109_s14 + $0x8] sm:$0xff]  }
0x1523   :  { %3757 = vtanh.f32 %v1826_v57 }
0x1524   :  { %3759 = vpow2.f32 %v3328_v16 }
0x152d   :  { %v3758_v24 = vpop.eup %3757 }
0x152e   :  { %1829 = vrot.lane.b32.xlu0 %v3758_v24, %s4074_s26  ;;  %v3760_v2 = vpop.eup %3759 }
0x152f   :  { %v1810_v62 = vadd.f32 1.0, %v3760_v2 }
0x1531   :  { %3761 = vrcp.f32 %v1810_v62 }
0x153b   :  { %v3762_v3 = vpop.eup %3761 }
0x15a0   :  { %v1830_v37 = vpop.permute.xlu0 %1829 }
0x15a1   :  { %v1832_v6 = vmul.f32 %v3762_v3, %v1830_v37 }
0x15a3   :  { %v1835_v17 = vpack.c.bf16 %v1832_v6, %v1832_v6 }
0x15a5   :  { %3329 = vmatmul.mubr.msk.bf16.vlgmr.msra.gmra.mrb[48].mxu0 %vm286_vm4, %v1835_v17 }
0x15a6   :  { %3510 = vmatprep.mubr.msk.bf16.mxu0 %vm4082_vm9, %v4081_v14  ;;  %3507 = vmatpush3.bf16.msra.mxu0 %v3597_v32 }
0x15a7   :  { %3508 = vmatprep.subr.bf16.mxu0 %v4081_v14 }
0x15aa   :  { %3509 = vmatpush3.bf16.msra.mxu0 %v3598_v33 }
0x15ab   :  { %3514 = vmatprep.subr.bf16.mxu0 %v3599_v41 }
0x1678   :  { %v1873_v54 = vpop.f32.mrb[48].mxu0 }
0x1679   :  { %v1880_v7 = vadd.f32 %v1873_v54, %v4582_v26  ;;  %v1875_v18 = vpop.f32.mrb[49].mxu0  ;;  %v3593_v26 = vld [vmem:[%s5107_s12] sm:$0xff]  }
0x167a   :  { %v1881_v19 = vadd.f32 %v1875_v18, %v4585_v42  ;;  %v1877_v20 = vpop.f32.mrb[50].mxu0  ;;  %3495 = vmatpush3.bf16.msra.mxu1 %v3593_v26  ;;  %v3594_v42 = vld [vmem:[%s5107_s12 + $0x8] sm:$0xff]  }
0x167b   :  { %v1878_v23 = vpop.f32.mrb[51].mxu0  ;;  %v3330_v25 = vmul.f32 -1.442695, %v1880_v7  ;;  %3496 = vmatprep.subr.bf16.mxu1 %v4081_v14 }
0x167c   :  { %3763 = vtanh.f32 %v1881_v19  ;;  %v3331_v55 = vmul.f32 -1.442695, %v1881_v19 }
0x167d   :  { %3765 = vpow2.f32 %v3330_v25 }
0x167e   :  { %3497 = vmatpush3.bf16.msra.mxu1 %v3594_v42 }
0x167f   :  { %3498 = vmatprep.subr.bf16.mxu1 %v4081_v14 }
0x1682   :  { %3499 = vmatpush3.bf16.msra.mxu1 %v3595_v39 }
0x1683   :  { %3500 = vmatprep.subr.bf16.mxu1 %v4081_v14 }
0x1686   :  { %v3764_v40 = vpop.eup %3763  ;;  %3501 = vmatpush3.bf16.msra.mxu1 %v3596_v63  ;;  %v4765_v63 = vld [vmem:[%s5112_s17] ss:$8 sps:$4 sm:$0xff]  }
0x1687   :  { %1897 = vrot.lane.b32.xlu1 %v3764_v40, %s4074_s26  ;;  %v3766_v27 = vpop.eup %3765 }
0x1688   :  { %v1888_v35 = vadd.f32 1.0, %v3766_v27 }
0x168a   :  { %3767 = vrcp.f32 %v1888_v35 }
0x1694   :  { %v3768_v36 = vpop.eup %3767 }
0x1695   :  { %v1895_v46 = vmul.f32 %v3768_v36, %v1826_v57 }
0x16f9   :  { %v1898_v29 = vpop.permute.xlu1 %1897 }
0x16fa   :  { %v1900_v21 = vmul.f32 %v3768_v36, %v1898_v29 }
0x16fc   :  { %1902 = vrot.lane.b32.xlu0 %v1900_v21, %s4074_s26 }
0x176e   :  { %v1903_v52 = vpop.permute.xlu0 %1902 }
0x176f   :  { %v1905_v61 = vadd.f32 %v1903_v52, %v1895_v46 }
0x1771   :  { %3769 = vtanh.f32 %v1905_v61  ;;  %v4760_v61 = vld [vmem:[%s5112_s17 + $0x4] ss:$8 sps:$4 sm:$0xff]  }
0x1772   :  { %3771 = vpow2.f32 %v3331_v55  ;;  %2243 = vmatprep.subr.bf16.mxu1 %v4760_v61  ;;  %v4778_v55 = vld [vmem:[%s5112_s17 + $0x10] ss:$8 sps:$4 sm:$0xff]  }
0x177b   :  { %v3770_v8 = vpop.eup %3769 }
0x177c   :  { %1908 = vrot.lane.b32.xlu1 %v3770_v8, %s4074_s26  ;;  %v3772_v44 = vpop.eup %3771  ;;  %v4770_v8 = vld [vmem:[%s5112_s17 + $0x14] ss:$8 sps:$4 sm:$0xff]  }
0x177d   :  { %v1889_v58 = vadd.f32 1.0, %v3772_v44  ;;  %v4785_v44 = vld [vmem:[%s5112_s17 + $0x24] ss:$8 sps:$4 sm:$0xff]  }
0x177f   :  { %3773 = vrcp.f32 %v1889_v58  ;;  %v4792_v58 = vld [vmem:[%s5112_s17 + $0x20] ss:$8 sps:$4 sm:$0xff]  }
0x1789   :  { %v3774_v56 = vpop.eup %3773 }
0x17ee   :  { %v1909_v30 = vpop.permute.xlu1 %1908 }
0x17ef   :  { %v1911_v1 = vmul.f32 %v3774_v56, %v1909_v30  ;;  %v4799_v56 = vld [vmem:[%s5112_s17 + $0x34] ss:$8 sps:$4 sm:$0xff]  }
0x17f1   :  { %v1912_v31 = vpack.c.bf16 %v1911_v1, %v1911_v1  ;;  %v4810_v1 = vld [vmem:[%s5112_s17 + $0x30] ss:$8 sps:$4 sm:$0xff]  }
0x17f3   :  { %3503 = vmatmul.mubr.msk.bf16.vlgmr.msra.gmra.mrb[48].mxu1 %vm286_vm4, %v1912_v31 }
0x17f4   :  { %2275 = vmatprep.mubr.bf16.mxu1 %v4080_v0  ;;  %2244 = vmatpush1.bf16.msra.mxu1 %v4765_v63 }
0x17f5   :  { %2245 = vmatprep.subr.bf16.mxu1 %v4770_v8 }
0x17f8   :  { %2246 = vmatpush1.bf16.msra.mxu1 %v4778_v55 }
0x17f9   :  { %2247 = vmatprep.subr.bf16.mxu1 %v4785_v44 }
0x17fc   :  { %2248 = vmatpush1.bf16.msra.mxu1 %v4792_v58 }
0x17fd   :  { %2249 = vmatprep.subr.bf16.mxu1 %v4799_v56 }
0x1800   :  { %2250 = vmatpush1.bf16.msra.mxu1 %v4810_v1 }
0x1801   :  { %2457 = vmatprep.subr.bf16.mxu1 %v4760_v61 }
0x18c6   :  { %v1980_v34 = vpop.f32.mrb[48].mxu1 }
0x18c7   :  { %v4699_v49 = vadd.f32 %v3332_v28, %v1980_v34  ;;  %v3504_v38 = vpop.f32.mrb[49].mxu1 }
0x18c8   :  { %v1983_v50 = vpop.f32.mrb[50].mxu1 }
0x18c9   :  { %v1987_v59 = vmul.f32 0.5, %v4699_v49  ;;  %v3505_v60 = vpop.f32.mrb[51].mxu1 }
0x18cb   :  { %v1988_v43 = vmul.f32 1.442695, %v1987_v59  ;;  %v4831_v59 = vld [vmem:[%s5113_s18] ss:$0 sm:$0xff] }
0x18cd   :  { %3775 = vpow2.f32 %v1988_v43 }
0x18d7   :  { %v3776_v15 = vpop.eup %3775 }
0x18d8   :  { %1991 = vrot.lane.b32.xlu0 %v3776_v15, %s4084_s13 }
0x194a   :  { %v1992_v4 = vpop.permute.xlu0 %1991 }
0x194b   :  { %v1994_v5 = vmul.f32 %v1992_v4, %v1986_v48 }
0x194d   :  { %v1995_v9 = vadd.f32 %v1994_v5, %v4699_v49 }
0x194f   :  { %2026 = vrot.lane.b32.xlu1 %v1995_v9, %s4077_s28 }
0x19c1   :  { %v2027_v14 = vpop.permute.xlu1 %2026 }
0x19c2   :  { %v2029_v11 = vsel %vm378_vm10, %v3907_v10, %v2027_v14 }
0x19c3   :  { %v2030_v12 = vpack.c.bf16 %v2029_v11, %v2029_v11 }
0x19c5   :  { %3511 = vmatmul.mubr.msk.bf16.vlgmr.msra.gmra.mrb[52].mxu0 %vm438_vm11, %v2030_v12 }
0x19c6   :  { %3515 = vmatpush3.bf16.msra.mxu0 %v3599_v41  ;;  %3518 = vmatprep.mubr.msk.bf16.mxu0 %vm438_vm11, %v4343_v47  ;;  %v3338_v47 = vld [vmem:[%s5111_s16] ss:$0 sm:$0xff]  ;;  %s4085_s16 = smov 32  }
0x19c7   :  { %3516 = vmatprep.subr.bf16.mxu0 %v3600_v22 }
0x19ca   :  { %3517 = vmatpush3.bf16.msra.mxu0 %v3600_v22 }
0x19cb   :  { %2353 = vmatprep.subr.bf16.mxu0 %v4760_v61 }
0x19cd   :  { %3519 = vmatmul.mubr.msk.bf16.vlgmr.msra.gmra.mrb[56].mxu0 %vm438_vm11, %v4341_v45 }
0x19ce   :  { %3522 = vmatprep.mubr.msk.bf16.mxu0 %vm438_vm11, %v4351_v53  ;;  %2354 = vmatpush1.bf16.msra.mxu0 %v4765_v63 }
0x19cf   :  { %2355 = vmatprep.subr.bf16.mxu0 %v4770_v8 }
0x19d2   :  { %2356 = vmatpush1.bf16.msra.mxu0 %v4778_v55 }
0x19d3   :  { %2357 = vmatprep.subr.bf16.mxu0 %v4785_v44 }
0x19d5   :  { %3523 = vmatmul.mubr.msk.bf16.gmra.mrb[60].mxu0 %vm438_vm11, %v4349_v51 }
0x19d6   :  { %2385 = vmatprep.mubr.bf16.mxu0 %v4080_v0  ;;  %2358 = vmatpush1.bf16.msra.mxu0 %v4792_v58 }
0x19d7   :  { %2359 = vmatprep.subr.bf16.mxu0 %v4799_v56 }
0x19da   :  { %2360 = vmatpush1.bf16.msra.mxu0 %v4810_v1 }
0x19db   :  { %2561 = vmatprep.subr.bf16.mxu0 %v4760_v61 }
0x1a98   :  { %v2086_v13 = vpop.f32.mrb[52].mxu0 }
0x1a99   :  { %v3512_v57 = vpop.f32.mrb[53].mxu0  ;;  %v2087_v2 = vadd.f32 %v3338_v47, %v2086_v13 }
0x1a9a   :  { %v2089_v24 = vpop.f32.mrb[54].mxu0 }
0x1a9b   :  { %v3513_v16 = vpop.f32.mrb[55].mxu0 }
0x1aa0   :  { %v3520_v62 = vpop.f32.mrb[56].mxu0 }
0x1aa1   :  { %v4738_v3 = vadd.f32 %v3520_v62, %v2087_v2  ;;  %v2138_v45 = vpop.f32.mrb[57].mxu0 }
0x1aa2   :  { %v2139_v37 = vadd.f32 %v2138_v45, %v2087_v2  ;;  %v3521_v53 = vpop.f32.mrb[58].mxu0 }
0x1aa3   :  { %v4740_v6 = vadd.f32 %v3521_v53, %v2087_v2  ;;  %v2141_v51 = vpop.f32.mrb[59].mxu0 }
0x1aa4   :  { %3777 = vtanh.f32 %v2139_v37  ;;  %v4742_v17 = vadd.f32 %v2141_v51, %v2087_v2  ;;  %v3348_v35 = vmul.f32 -1.442695, %v2139_v37 }
0x1aa6   :  { %3779 = vpow2.f32 %v3348_v35 }
0x1aa8   :  { %v3524_v54 = vpop.f32.mrb[60].mxu0 }
0x1aa9   :  { %v4744_v7 = vadd.f32 %v3524_v54, %v2087_v2  ;;  %v2154_v18 = vpop.f32.mrb[61].mxu0 }
0x1aaa   :  { %v4746_v19 = vadd.f32 %v2154_v18, %v2087_v2  ;;  %v3525_v20 = vpop.f32.mrb[62].mxu0 }
0x1aab   :  { %v4748_v23 = vadd.f32 %v3525_v20, %v2087_v2  ;;  %v2157_v40 = vpop.f32.mrb[63].mxu0 }
0x1aac   :  { %v4750_v25 = vadd.f32 %v2157_v40, %v2087_v2 }
0x1aae   :  { %v3778_v27 = vpop.eup %3777 }
0x1aaf   :  { %2179 = vrot.lane.b32.xlu0 %v3778_v27, %s4085_s16 }
0x1ab0   :  { %v3780_v36 = vpop.eup %3779 }
0x1ab1   :  { %v2173_v29 = vadd.f32 1.0, %v3780_v36 }
0x1ab3   :  { %3781 = vrcp.f32 %v2173_v29 }
0x1abd   :  { %v3782_v21 = vpop.eup %3781 }
0x1abe   :  { %v2177_v39 = vmul.f32 0.0, %v3782_v21 }
0x1b21   :  { %v2180_v26 = vpop.permute.xlu0 %2179 }
0x1b22   :  { %v2182_v42 = vmul.f32 %v3782_v21, %v2180_v26 }
0x1b24   :  { %2184 = vrot.lane.b32.xlu1 %v2182_v42, %s4085_s16 }
0x1b96   :  { %v2185_v46 = vpop.permute.xlu1 %2184 }
0x1b97   :  { %v4754_v52 = vadd.f32 %v2185_v46, %v2177_v39 }
0x1b99   :  { %3783 = vtanh.f32 %v4754_v52 }
0x1ba3   :  { %v3784_v30 = vpop.eup %3783 }
0x1ba4   :  { %2190 = vrot.lane.b32.xlu0 %v3784_v30, %s4085_s16 }
0x1c16   :  { %v2191_v31 = vpop.permute.xlu0 %2190 }
0x1c17   :  { %v2193_v28 = vmul.f32 %v3782_v21, %v2191_v31 }
0x1c19   :  { %2195 = vrot.lane.b32.xlu1 %v2193_v28, %s4074_s26 }
0x1c8b   :  { %v2196_v34 = vpop.permute.xlu1 %2195 }
0x1c8c   :  { %v2198_v38 = vsel %vm438_vm11, %v2196_v34, 0.0 }
0x1c8d   :  { %v2199_v50 = vpack.c.bf16 %v2198_v38, %v2198_v38 }
0x1c8f   :  { %3357 = vmatmul.mubr.msk.bf16.vlgmr.msra.gmra.mrb[52].mxu1 %vm286_vm4, %v2199_v50 }
0x1c90   :  { %2458 = vmatpush1.bf16.msra.mxu1 %v4765_v63  ;;  %2489 = vmatprep.mubr.bf16.mxu1 %v4080_v0 }
0x1c91   :  { %2459 = vmatprep.subr.bf16.mxu1 %v4770_v8 }
0x1c94   :  { %2460 = vmatpush1.bf16.msra.mxu1 %v4778_v55 }
0x1c95   :  { %2461 = vmatprep.subr.bf16.mxu1 %v4785_v44 }
0x1c98   :  { %2462 = vmatpush1.bf16.msra.mxu1 %v4792_v58 }
0x1c99   :  { %2463 = vmatprep.subr.bf16.mxu1 %v4799_v56 }
0x1c9c   :  { %2464 = vmatpush1.bf16.msra.mxu1 %v4810_v1 }
0x1c9d   :  { %2665 = vmatprep.subr.bf16.mxu1 %v4760_v61 }
0x1d62   :  { %v2277_v60 = vpop.f32.mrb[52].mxu1 }
0x1d63   :  { %v2290_v43 = vadd.f32 %v4831_v59, %v2277_v60  ;;  %v2279_v32 = vpop.f32.mrb[53].mxu1 }
0x1d64   :  { %v2315_v33 = vadd.f32 %v2279_v32, %v4742_v17  ;;  %v2281_v15 = vpop.f32.mrb[54].mxu1 }
0x1d65   :  { %3785 = vtanh.f32 %v2290_v43  ;;  %v2282_v41 = vpop.f32.mrb[55].mxu1  ;;  %v3359_v5 = vmul.f32 -1.442695, %v2290_v43 }
0x1d66   :  { %3787 = vtanh.f32 %v2315_v33  ;;  %v3360_v9 = vmul.f32 -1.442695, %v2315_v33 }
0x1d67   :  { %3789 = vpow2.f32 %v3359_v5 }
0x1d68   :  { %3791 = vpow2.f32 %v3360_v9 }
0x1d6f   :  { %v3786_v48 = vpop.eup %3785 }
0x1d70   :  { %v3788_v4 = vpop.eup %3787  ;;  %2300 = vrot.lane.b32.xlu0 %v3786_v48, %s4085_s16 }
0x1d71   :  { %2325 = vrot.lane.b32.xlu1 %v3788_v4, %s4085_s16  ;;  %v3790_v14 = vpop.eup %3789 }
0x1d72   :  { %v3792_v10 = vpop.eup %3791  ;;  %v2294_v11 = vadd.f32 1.0, %v3790_v14 }
0x1d73   :  { %v2319_v12 = vadd.f32 1.0, %v3792_v10 }
0x1d74   :  { %3793 = vrcp.f32 %v2294_v11 }
0x1d75   :  { %3795 = vrcp.f32 %v2319_v12 }
0x1d7e   :  { %v3794_v22 = vpop.eup %3793 }
0x1d7f   :  { %v3796_v57 = vpop.eup %3795  ;;  %v2298_v2 = vmul.f32 0.0, %v3794_v22 }
0x1d80   :  { %v2323_v45 = vmul.f32 %v3796_v57, %v4754_v52 }
0x1de2   :  { %v2301_v13 = vpop.permute.xlu0 %2300 }
0x1de3   :  { %v2303_v24 = vmul.f32 %v3794_v22, %v2301_v13  ;;  %v2326_v16 = vpop.permute.xlu1 %2325 }
0x1de4   :  { %v2328_v47 = vmul.f32 %v3796_v57, %v2326_v16 }
0x1de5   :  { %2305 = vrot.lane.b32.xlu0 %v2303_v24, %s4085_s16 }
0x1de6   :  { %2330 = vrot.lane.b32.xlu1 %v2328_v47, %s4085_s16 }
0x1e57   :  { %v2306_v62 = vpop.permute.xlu0 %2305 }
0x1e58   :  { %v2308_v37 = vadd.f32 %v2306_v62, %v2298_v2  ;;  %v2331_v53 = vpop.permute.xlu1 %2330 }
0x1e59   :  { %v2333_v51 = vadd.f32 %v2331_v53, %v2323_v45 }
0x1e5a   :  { %3797 = vtanh.f32 %v2308_v37 }
0x1e5b   :  { %3799 = vtanh.f32 %v2333_v51 }
0x1e64   :  { %v3798_v17 = vpop.eup %3797 }
0x1e65   :  { %v3800_v54 = vpop.eup %3799  ;;  %2311 = vrot.lane.b32.xlu0 %v3798_v17, %s4085_s16 }
0x1e66   :  { %2336 = vrot.lane.b32.xlu1 %v3800_v54, %s4085_s16 }
0x1ed7   :  { %v2312_v18 = vpop.permute.xlu0 %2311 }
0x1ed8   :  { %v4842_v20 = vmul.f32 %v3794_v22, %v2312_v18  ;;  %v2337_v40 = vpop.permute.xlu1 %2336 }
0x1ed9   :  { %v2339_v27 = vmul.f32 %v3796_v57, %v2337_v40 }
0x1eda   :  { %2345 = vrot.lane.b32.xlu1 %v4842_v20, %s4083_s8 }
0x1edb   :  { %2341 = vrot.lane.b32.xlu0 %v2339_v27, %s4074_s26 }
0x1f4c   :  { %v2346_v35 = vpop.permute.xlu1 %2345 }
0x1f4d   :  { %v2342_v36 = vpop.permute.xlu0 %2341 }
0x1f4e   :  { %v2348_v29 = vsel %vm438_vm11, %v2342_v36, %v2346_v35 }
0x1f4f   :  { %v2349_v21 = vpack.c.bf16 %v2348_v29, %v2348_v29 }
0x1f51   :  { %3361 = vmatmul.mubr.msk.bf16.vlgmr.msra.gmra.mrb[64].mxu0 %vm286_vm4, %v2349_v21 }
0x1f52   :  { %2562 = vmatpush1.bf16.msra.mxu0 %v4765_v63  ;;  %2593 = vmatprep.mubr.bf16.mxu0 %v4080_v0 }
0x1f53   :  { %2563 = vmatprep.subr.bf16.mxu0 %v4770_v8 }
0x1f56   :  { %2564 = vmatpush1.bf16.msra.mxu0 %v4778_v55 }
0x1f57   :  { %2565 = vmatprep.subr.bf16.mxu0 %v4785_v44 }
0x1f5a   :  { %2566 = vmatpush1.bf16.msra.mxu0 %v4792_v58 }
0x1f5b   :  { %2567 = vmatprep.subr.bf16.mxu0 %v4799_v56 }
0x1f5e   :  { %2568 = vmatpush1.bf16.msra.mxu0 %v4810_v1 }
0x1f5f   :  { %2769 = vmatprep.subr.bf16.mxu0 %v4760_v61 }
0x2024   :  { %v2387_v26 = vpop.f32.mrb[64].mxu0 }
0x2025   :  { %v2394_v42 = vadd.f32 %v4831_v59, %v2387_v26  ;;  %v2389_v39 = vpop.f32.mrb[65].mxu0 }
0x2026   :  { %v2419_v46 = vadd.f32 %v2389_v39, %v4738_v3  ;;  %v2391_v52 = vpop.f32.mrb[66].mxu0 }
0x2027   :  { %3801 = vtanh.f32 %v2394_v42  ;;  %v2392_v30 = vpop.f32.mrb[67].mxu0  ;;  %v3362_v34 = vmul.f32 -1.442695, %v2394_v42 }
0x2028   :  { %3803 = vtanh.f32 %v2419_v46  ;;  %v3363_v38 = vmul.f32 -1.442695, %v2419_v46 }
0x2029   :  { %3805 = vpow2.f32 %v3362_v34 }
0x202a   :  { %3807 = vpow2.f32 %v3363_v38 }
0x2031   :  { %v3802_v31 = vpop.eup %3801 }
0x2032   :  { %v3804_v28 = vpop.eup %3803  ;;  %2404 = vrot.lane.b32.xlu0 %v3802_v31, %s4085_s16 }
0x2033   :  { %2429 = vrot.lane.b32.xlu1 %v3804_v28, %s4085_s16  ;;  %v3806_v50 = vpop.eup %3805 }
0x2034   :  { %v3808_v60 = vpop.eup %3807  ;;  %v2398_v43 = vadd.f32 1.0, %v3806_v50 }
0x2035   :  { %v2423_v32 = vadd.f32 1.0, %v3808_v60 }
0x2036   :  { %3809 = vrcp.f32 %v2398_v43 }
0x2037   :  { %3811 = vrcp.f32 %v2423_v32 }
0x2040   :  { %v3810_v3 = vpop.eup %3809 }
0x2041   :  { %v3812_v15 = vpop.eup %3811  ;;  %v2402_v5 = vmul.f32 %v3810_v3, %v2308_v37 }
0x2042   :  { %v2427_v14 = vmul.f32 %v3812_v15, %v2333_v51 }
0x20a4   :  { %v2405_v33 = vpop.permute.xlu0 %2404 }
0x20a5   :  { %v2407_v41 = vmul.f32 %v3810_v3, %v2405_v33  ;;  %v2430_v48 = vpop.permute.xlu1 %2429 }
0x20a6   :  { %v2432_v4 = vmul.f32 %v3812_v15, %v2430_v48 }
0x20a7   :  { %2409 = vrot.lane.b32.xlu0 %v2407_v41, %s4085_s16 }
0x20a8   :  { %2434 = vrot.lane.b32.xlu1 %v2432_v4, %s4085_s16 }
0x2119   :  { %v2410_v9 = vpop.permute.xlu0 %2409 }
0x211a   :  { %v2412_v10 = vadd.f32 %v2410_v9, %v2402_v5  ;;  %v2435_v11 = vpop.permute.xlu1 %2434 }
0x211b   :  { %v2437_v12 = vadd.f32 %v2435_v11, %v2427_v14 }
0x211c   :  { %3813 = vtanh.f32 %v2412_v10 }
0x211d   :  { %3815 = vtanh.f32 %v2437_v12 }
0x2126   :  { %v3814_v22 = vpop.eup %3813 }
0x2127   :  { %v3816_v13 = vpop.eup %3815  ;;  %2415 = vrot.lane.b32.xlu0 %v3814_v22, %s4085_s16 }
0x2128   :  { %2440 = vrot.lane.b32.xlu1 %v3816_v13, %s4085_s16 }
0x2199   :  { %v2416_v57 = vpop.permute.xlu0 %2415 }
0x219a   :  { %v4866_v24 = vmul.f32 %v3810_v3, %v2416_v57  ;;  %v2441_v16 = vpop.permute.xlu1 %2440 }
0x219b   :  { %v2443_v47 = vmul.f32 %v3812_v15, %v2441_v16 }
0x219c   :  { %2449 = vrot.lane.b32.xlu1 %v4866_v24, %s4083_s8 }
0x219d   :  { %2445 = vrot.lane.b32.xlu0 %v2443_v47, %s4074_s26 }
0x220e   :  { %v2450_v2 = vpop.permute.xlu1 %2449 }
0x220f   :  { %v2446_v62 = vpop.permute.xlu0 %2445 }
0x2210   :  { %v2452_v45 = vsel %vm438_vm11, %v2446_v62, %v2450_v2 }
0x2211   :  { %v2453_v37 = vpack.c.bf16 %v2452_v45, %v2452_v45 }
0x2213   :  { %3364 = vmatmul.mubr.msk.bf16.vlgmr.msra.gmra.mrb[56].mxu1 %vm286_vm4, %v2453_v37 }
0x2214   :  { %2666 = vmatpush1.bf16.msra.mxu1 %v4765_v63  ;;  %2697 = vmatprep.mubr.bf16.mxu1 %v4080_v0 }
0x2215   :  { %2667 = vmatprep.subr.bf16.mxu1 %v4770_v8 }
0x2218   :  { %2668 = vmatpush1.bf16.msra.mxu1 %v4778_v55 }
0x2219   :  { %2669 = vmatprep.subr.bf16.mxu1 %v4785_v44 }
0x221c   :  { %2670 = vmatpush1.bf16.msra.mxu1 %v4792_v58 }
0x221d   :  { %2671 = vmatprep.subr.bf16.mxu1 %v4799_v56 }
0x2220   :  { %2672 = vmatpush1.bf16.msra.mxu1 %v4810_v1 }
0x2221   :  { %2873 = vmatprep.subr.bf16.mxu1 %v4760_v61 }
0x22e6   :  { %v2491_v53 = vpop.f32.mrb[56].mxu1 }
0x22e7   :  { %v2498_v51 = vadd.f32 %v4831_v59, %v2491_v53  ;;  %v2493_v17 = vpop.f32.mrb[57].mxu1 }
0x22e8   :  { %v2523_v54 = vadd.f32 %v2493_v17, %v4740_v6  ;;  %v2495_v18 = vpop.f32.mrb[58].mxu1 }
0x22e9   :  { %3817 = vtanh.f32 %v2498_v51  ;;  %v2496_v40 = vpop.f32.mrb[59].mxu1  ;;  %v3365_v36 = vmul.f32 -1.442695, %v2498_v51 }
0x22ea   :  { %3819 = vtanh.f32 %v2523_v54  ;;  %v3366_v29 = vmul.f32 -1.442695, %v2523_v54 }
0x22eb   :  { %3821 = vpow2.f32 %v3365_v36 }
0x22ec   :  { %3823 = vpow2.f32 %v3366_v29 }
0x22f3   :  { %v3818_v27 = vpop.eup %3817 }
0x22f4   :  { %v3820_v35 = vpop.eup %3819  ;;  %2508 = vrot.lane.b32.xlu0 %v3818_v27, %s4085_s16 }
0x22f5   :  { %2533 = vrot.lane.b32.xlu1 %v3820_v35, %s4085_s16  ;;  %v3822_v21 = vpop.eup %3821 }
0x22f6   :  { %v3824_v26 = vpop.eup %3823  ;;  %v2502_v42 = vadd.f32 1.0, %v3822_v21 }
0x22f7   :  { %v2527_v39 = vadd.f32 1.0, %v3824_v26 }
0x22f8   :  { %3825 = vrcp.f32 %v2502_v42 }
0x22f9   :  { %3827 = vrcp.f32 %v2527_v39 }
0x2302   :  { %v3826_v6 = vpop.eup %3825 }
0x2303   :  { %v3828_v52 = vpop.eup %3827  ;;  %v2506_v34 = vmul.f32 %v3826_v6, %v2412_v10 }
0x2304   :  { %v2531_v50 = vmul.f32 %v3828_v52, %v2437_v12 }
0x2366   :  { %v2509_v46 = vpop.permute.xlu0 %2508 }
0x2367   :  { %v2511_v30 = vmul.f32 %v3826_v6, %v2509_v46  ;;  %v2534_v31 = vpop.permute.xlu1 %2533 }
0x2368   :  { %v2536_v28 = vmul.f32 %v3828_v52, %v2534_v31 }
0x2369   :  { %2513 = vrot.lane.b32.xlu0 %v2511_v30, %s4085_s16 }
0x236a   :  { %2538 = vrot.lane.b32.xlu1 %v2536_v28, %s4085_s16 }
0x23db   :  { %v2514_v38 = vpop.permute.xlu0 %2513 }
0x23dc   :  { %v2516_v60 = vadd.f32 %v2514_v38, %v2506_v34  ;;  %v2539_v43 = vpop.permute.xlu1 %2538 }
0x23dd   :  { %v2541_v32 = vadd.f32 %v2539_v43, %v2531_v50 }
0x23de   :  { %3829 = vtanh.f32 %v2516_v60 }
0x23df   :  { %3831 = vtanh.f32 %v2541_v32 }
0x23e8   :  { %v3830_v3 = vpop.eup %3829 }
0x23e9   :  { %v3832_v33 = vpop.eup %3831  ;;  %2519 = vrot.lane.b32.xlu0 %v3830_v3, %s4085_s16 }
0x23ea   :  { %2544 = vrot.lane.b32.xlu1 %v3832_v33, %s4085_s16 }
0x245b   :  { %v2520_v15 = vpop.permute.xlu0 %2519 }
0x245c   :  { %v4890_v41 = vmul.f32 %v3826_v6, %v2520_v15  ;;  %v2545_v48 = vpop.permute.xlu1 %2544 }
0x245d   :  { %v2547_v4 = vmul.f32 %v3828_v52, %v2545_v48 }
0x245e   :  { %2553 = vrot.lane.b32.xlu1 %v4890_v41, %s4083_s8 }
0x245f   :  { %2549 = vrot.lane.b32.xlu0 %v2547_v4, %s4074_s26 }
0x24d0   :  { %v2554_v5 = vpop.permute.xlu1 %2553 }
0x24d1   :  { %v2550_v9 = vpop.permute.xlu0 %2549 }
0x24d2   :  { %v2556_v14 = vsel %vm438_vm11, %v2550_v9, %v2554_v5 }
0x24d3   :  { %v2557_v10 = vpack.c.bf16 %v2556_v14, %v2556_v14 }
0x24d5   :  { %3367 = vmatmul.mubr.msk.bf16.vlgmr.msra.gmra.mrb[68].mxu0 %vm286_vm4, %v2557_v10 }
0x24d6   :  { %2770 = vmatpush1.bf16.msra.mxu0 %v4765_v63  ;;  %2801 = vmatprep.mubr.bf16.mxu0 %v4080_v0 }
0x24d7   :  { %2771 = vmatprep.subr.bf16.mxu0 %v4770_v8 }
0x24da   :  { %2772 = vmatpush1.bf16.msra.mxu0 %v4778_v55 }
0x24db   :  { %2773 = vmatprep.subr.bf16.mxu0 %v4785_v44 }
0x24de   :  { %2774 = vmatpush1.bf16.msra.mxu0 %v4792_v58 }
0x24df   :  { %2775 = vmatprep.subr.bf16.mxu0 %v4799_v56 }
0x24e2   :  { %2776 = vmatpush1.bf16.msra.mxu0 %v4810_v1 }
0x24e3   :  { %2977 = vmatprep.subr.bf16.mxu0 %v4760_v61 }
0x25a8   :  { %v2595_v11 = vpop.f32.mrb[68].mxu0 }
0x25a9   :  { %v2602_v12 = vadd.f32 %v4831_v59, %v2595_v11  ;;  %v2597_v22 = vpop.f32.mrb[69].mxu0 }
0x25aa   :  { %v2627_v13 = vadd.f32 %v2597_v22, %v4746_v19  ;;  %v2599_v57 = vpop.f32.mrb[70].mxu0 }
0x25ab   :  { %3833 = vtanh.f32 %v2602_v12  ;;  %v2600_v16 = vpop.f32.mrb[71].mxu0  ;;  %v3368_v62 = vmul.f32 -1.442695, %v2602_v12 }
0x25ac   :  { %3835 = vtanh.f32 %v2627_v13  ;;  %v3369_v45 = vmul.f32 -1.442695, %v2627_v13 }
0x25ad   :  { %3837 = vpow2.f32 %v3368_v62 }
0x25ae   :  { %3839 = vpow2.f32 %v3369_v45 }
0x25b5   :  { %v3834_v47 = vpop.eup %3833 }
0x25b6   :  { %v3836_v2 = vpop.eup %3835  ;;  %2612 = vrot.lane.b32.xlu0 %v3834_v47, %s4085_s16 }
0x25b7   :  { %2637 = vrot.lane.b32.xlu1 %v3836_v2, %s4085_s16  ;;  %v3838_v61 = vpop.eup %3837 }
0x25b8   :  { %v3840_v37 = vpop.eup %3839  ;;  %v2606_v53 = vadd.f32 1.0, %v3838_v61 }
0x25b9   :  { %v2631_v51 = vadd.f32 1.0, %v3840_v37 }
0x25ba   :  { %3841 = vrcp.f32 %v2606_v53 }
0x25bb   :  { %3843 = vrcp.f32 %v2631_v51 }
0x25c4   :  { %v3842_v19 = vpop.eup %3841 }
0x25c5   :  { %v3844_v54 = vpop.eup %3843  ;;  %v2610_v35 = vmul.f32 %v3842_v19, %v2516_v60 }
0x25c6   :  { %v2635_v29 = vmul.f32 %v3844_v54, %v2541_v32 }
0x2628   :  { %v2613_v17 = vpop.permute.xlu0 %2612 }
0x2629   :  { %v2615_v18 = vmul.f32 %v3842_v19, %v2613_v17  ;;  %v2638_v40 = vpop.permute.xlu1 %2637 }
0x262a   :  { %v2640_v27 = vmul.f32 %v3844_v54, %v2638_v40 }
0x262b   :  { %2617 = vrot.lane.b32.xlu0 %v2615_v18, %s4085_s16 }
0x262c   :  { %2642 = vrot.lane.b32.xlu1 %v2640_v27, %s4085_s16 }
0x269d   :  { %v2618_v36 = vpop.permute.xlu0 %2617 }
0x269e   :  { %v2620_v21 = vadd.f32 %v2618_v36, %v2610_v35  ;;  %v2643_v26 = vpop.permute.xlu1 %2642 }
0x269f   :  { %v2645_v42 = vadd.f32 %v2643_v26, %v2635_v29 }
0x26a0   :  { %3845 = vtanh.f32 %v2620_v21 }
0x26a1   :  { %3847 = vtanh.f32 %v2645_v42 }
0x26aa   :  { %v3846_v39 = vpop.eup %3845 }
0x26ab   :  { %v3848_v6 = vpop.eup %3847  ;;  %2623 = vrot.lane.b32.xlu0 %v3846_v39, %s4085_s16 }
0x26ac   :  { %2648 = vrot.lane.b32.xlu1 %v3848_v6, %s4085_s16 }
0x271d   :  { %v2624_v46 = vpop.permute.xlu0 %2623 }
0x271e   :  { %v4914_v52 = vmul.f32 %v3842_v19, %v2624_v46  ;;  %v2649_v30 = vpop.permute.xlu1 %2648 }
0x271f   :  { %v2651_v31 = vmul.f32 %v3844_v54, %v2649_v30 }
0x2720   :  { %2657 = vrot.lane.b32.xlu1 %v4914_v52, %s4083_s8 }
0x2721   :  { %2653 = vrot.lane.b32.xlu0 %v2651_v31, %s4074_s26 }
0x2792   :  { %v2658_v28 = vpop.permute.xlu1 %2657 }
0x2793   :  { %v2654_v34 = vpop.permute.xlu0 %2653 }
0x2794   :  { %v2660_v38 = vsel %vm438_vm11, %v2654_v34, %v2658_v28 }
0x2795   :  { %v2661_v50 = vpack.c.bf16 %v2660_v38, %v2660_v38 }
0x2797   :  { %3370 = vmatmul.mubr.msk.bf16.vlgmr.msra.gmra.mrb[60].mxu1 %vm286_vm4, %v2661_v50 }
0x2798   :  { %2874 = vmatpush1.bf16.msra.mxu1 %v4765_v63  ;;  %2905 = vmatprep.mubr.bf16.mxu1 %v4080_v0 }
0x2799   :  { %2875 = vmatprep.subr.bf16.mxu1 %v4770_v8 }
0x279c   :  { %2876 = vmatpush1.bf16.msra.mxu1 %v4778_v55 }
0x279d   :  { %2877 = vmatprep.subr.bf16.mxu1 %v4785_v44 }
0x27a0   :  { %2878 = vmatpush1.bf16.msra.mxu1 %v4792_v58 }
0x27a1   :  { %2879 = vmatprep.subr.bf16.mxu1 %v4799_v56 }
0x27a4   :  { %2880 = vmatpush1.bf16.msra.mxu1 %v4810_v1 }
0x286a   :  { %v2699_v60 = vpop.f32.mrb[60].mxu1 }
0x286b   :  { %v2706_v43 = vadd.f32 %v4831_v59, %v2699_v60  ;;  %v2701_v32 = vpop.f32.mrb[61].mxu1 }
0x286c   :  { %v2731_v3 = vadd.f32 %v2701_v32, %v4750_v25  ;;  %v2703_v33 = vpop.f32.mrb[62].mxu1 }
0x286d   :  { %3849 = vtanh.f32 %v2706_v43  ;;  %v2704_v15 = vpop.f32.mrb[63].mxu1  ;;  %v3371_v5 = vmul.f32 -1.442695, %v2706_v43 }
0x286e   :  { %3851 = vtanh.f32 %v2731_v3  ;;  %v3372_v9 = vmul.f32 -1.442695, %v2731_v3 }
0x286f   :  { %3853 = vpow2.f32 %v3371_v5 }
0x2870   :  { %3855 = vpow2.f32 %v3372_v9 }
0x2877   :  { %v3850_v48 = vpop.eup %3849 }
0x2878   :  { %v3852_v4 = vpop.eup %3851  ;;  %2716 = vrot.lane.b32.xlu0 %v3850_v48, %s4085_s16 }
0x2879   :  { %2741 = vrot.lane.b32.xlu1 %v3852_v4, %s4085_s16  ;;  %v3854_v14 = vpop.eup %3853 }
0x287a   :  { %v3856_v10 = vpop.eup %3855  ;;  %v2710_v11 = vadd.f32 1.0, %v3854_v14 }
0x287b   :  { %v2735_v12 = vadd.f32 1.0, %v3856_v10 }
0x287c   :  { %3857 = vrcp.f32 %v2710_v11 }
0x287d   :  { %3859 = vrcp.f32 %v2735_v12 }
0x2886   :  { %v3858_v25 = vpop.eup %3857 }
0x2887   :  { %v3860_v13 = vpop.eup %3859  ;;  %v2714_v2 = vmul.f32 %v3858_v25, %v2620_v21 }
0x2888   :  { %v2739_v45 = vmul.f32 %v3860_v13, %v2645_v42 }
0x28ea   :  { %v2717_v22 = vpop.permute.xlu0 %2716 }
0x28eb   :  { %v2719_v57 = vmul.f32 %v3858_v25, %v2717_v22  ;;  %v2742_v16 = vpop.permute.xlu1 %2741 }
0x28ec   :  { %v2744_v47 = vmul.f32 %v3860_v13, %v2742_v16 }
0x28ed   :  { %2721 = vrot.lane.b32.xlu0 %v2719_v57, %s4085_s16 }
0x28ee   :  { %2746 = vrot.lane.b32.xlu1 %v2744_v47, %s4085_s16 }
0x295f   :  { %v2722_v62 = vpop.permute.xlu0 %2721 }
0x2960   :  { %v2724_v61 = vadd.f32 %v2722_v62, %v2714_v2  ;;  %v2747_v37 = vpop.permute.xlu1 %2746 }
0x2961   :  { %v2749_v53 = vadd.f32 %v2747_v37, %v2739_v45 }
0x2962   :  { %3861 = vtanh.f32 %v2724_v61 }
0x2963   :  { %3863 = vtanh.f32 %v2749_v53 }
0x296c   :  { %v3862_v51 = vpop.eup %3861 }
0x296d   :  { %v3864_v19 = vpop.eup %3863  ;;  %2727 = vrot.lane.b32.xlu0 %v3862_v51, %s4085_s16 }
0x296e   :  { %2752 = vrot.lane.b32.xlu1 %v3864_v19, %s4085_s16 }
0x29df   :  { %v2728_v17 = vpop.permute.xlu0 %2727 }
0x29e0   :  { %v4937_v54 = vmul.f32 %v3858_v25, %v2728_v17  ;;  %v2753_v18 = vpop.permute.xlu1 %2752 }
0x29e1   :  { %v2755_v40 = vmul.f32 %v3860_v13, %v2753_v18 }
0x29e2   :  { %2761 = vrot.lane.b32.xlu1 %v4937_v54, %s4083_s8 }
0x29e3   :  { %2757 = vrot.lane.b32.xlu0 %v2755_v40, %s4074_s26 }
0x2a54   :  { %v2762_v27 = vpop.permute.xlu1 %2761 }
0x2a55   :  { %v2758_v35 = vpop.permute.xlu0 %2757 }
0x2a56   :  { %v2764_v36 = vsel %vm438_vm11, %v2758_v35, %v2762_v27 }
0x2a57   :  { %v2765_v29 = vpack.c.bf16 %v2764_v36, %v2764_v36 }
0x2a59   :  { %3373 = vmatmul.mubr.msk.bf16.vlgmr.msra.gmra.mrb[72].mxu0 %vm286_vm4, %v2765_v29 }
0x2a5a   :  { %2978 = vmatpush1.bf16.msra.mxu0 %v4765_v63  ;;  %3009 = vmatprep.mubr.bf16.mxu0 %v4080_v0 }
0x2a5b   :  { %2979 = vmatprep.subr.bf16.mxu0 %v4770_v8 }
0x2a5e   :  { %2980 = vmatpush1.bf16.msra.mxu0 %v4778_v55 }
0x2a5f   :  { %2981 = vmatprep.subr.bf16.mxu0 %v4785_v44 }
0x2a62   :  { %2982 = vmatpush1.bf16.msra.mxu0 %v4792_v58 }
0x2a63   :  { %2983 = vmatprep.subr.bf16.mxu0 %v4799_v56 }
0x2a66   :  { %2984 = vmatpush1.bf16.msra.mxu0 %v4810_v1 }
0x2b2c   :  { %v2803_v21 = vpop.f32.mrb[72].mxu0 }
0x2b2d   :  { %v2810_v26 = vadd.f32 %v4831_v59, %v2803_v21  ;;  %v2805_v42 = vpop.f32.mrb[73].mxu0 }
0x2b2e   :  { %v2835_v63 = vadd.f32 %v2805_v42, %v4744_v7  ;;  %v2807_v39 = vpop.f32.mrb[74].mxu0 }
0x2b2f   :  { %3865 = vtanh.f32 %v2810_v26  ;;  %v2808_v0 = vpop.f32.mrb[75].mxu0  ;;  %v3374_v44 = vmul.f32 -1.442695, %v2810_v26 }
0x2b30   :  { %3867 = vtanh.f32 %v2835_v63  ;;  %v3375_v58 = vmul.f32 -1.442695, %v2835_v63 }
0x2b31   :  { %3869 = vpow2.f32 %v3374_v44 }
0x2b32   :  { %3871 = vpow2.f32 %v3375_v58 }
0x2b39   :  { %v3866_v8 = vpop.eup %3865 }
0x2b3a   :  { %v3868_v55 = vpop.eup %3867  ;;  %2820 = vrot.lane.b32.xlu0 %v3866_v8, %s4085_s16 }
0x2b3b   :  { %2845 = vrot.lane.b32.xlu1 %v3868_v55, %s4085_s16  ;;  %v3870_v56 = vpop.eup %3869 }
0x2b3c   :  { %v3872_v1 = vpop.eup %3871  ;;  %v2814_v6 = vadd.f32 1.0, %v3870_v56 }
0x2b3d   :  { %v2839_v46 = vadd.f32 1.0, %v3872_v1 }
0x2b3e   :  { %3873 = vrcp.f32 %v2814_v6 }
0x2b3f   :  { %3875 = vrcp.f32 %v2839_v46 }
0x2b48   :  { %v3874_v7 = vpop.eup %3873 }
0x2b49   :  { %v3876_v31 = vpop.eup %3875  ;;  %v2818_v50 = vmul.f32 %v3874_v7, %v2724_v61 }
0x2b4a   :  { %v2843_v43 = vmul.f32 %v3876_v31, %v2749_v53 }
0x2bac   :  { %v2821_v30 = vpop.permute.xlu0 %2820 }
0x2bad   :  { %v2823_v28 = vmul.f32 %v3874_v7, %v2821_v30  ;;  %v2846_v34 = vpop.permute.xlu1 %2845 }
0x2bae   :  { %v2848_v38 = vmul.f32 %v3876_v31, %v2846_v34 }
0x2baf   :  { %2825 = vrot.lane.b32.xlu0 %v2823_v28, %s4085_s16 }
0x2bb0   :  { %2850 = vrot.lane.b32.xlu1 %v2848_v38, %s4085_s16 }
0x2c21   :  { %v2826_v60 = vpop.permute.xlu0 %2825 }
0x2c22   :  { %v2828_v32 = vadd.f32 %v2826_v60, %v2818_v50  ;;  %v2851_v3 = vpop.permute.xlu1 %2850 }
0x2c23   :  { %v2853_v33 = vadd.f32 %v2851_v3, %v2843_v43 }
0x2c24   :  { %3877 = vtanh.f32 %v2828_v32 }
0x2c25   :  { %3879 = vtanh.f32 %v2853_v33 }
0x2c2e   :  { %v3878_v15 = vpop.eup %3877 }
0x2c2f   :  { %v3880_v48 = vpop.eup %3879  ;;  %2831 = vrot.lane.b32.xlu0 %v3878_v15, %s4085_s16 }
0x2c30   :  { %2856 = vrot.lane.b32.xlu1 %v3880_v48, %s4085_s16  ;;  %v3613_v48 = vld [vmem:[%s5114_s19] sm:$0xff]  }
0x2c31   :  { %3526 = vmatprep.subr.bf16.mxu1 %v3613_v48 }
0x2ca1   :  { %v2832_v4 = vpop.permute.xlu0 %2831 }
0x2ca2   :  { %v4960_v5 = vmul.f32 %v3874_v7, %v2832_v4  ;;  %v2857_v9 = vpop.permute.xlu1 %2856 }
0x2ca3   :  { %v2859_v14 = vmul.f32 %v3876_v31, %v2857_v9  ;;  %v1996_v9 = vmul.f32 %v4699_v49, %v4699_v49 }
0x2ca4   :  { %2865 = vrot.lane.b32.xlu1 %v4960_v5, %s4083_s8  ;;  %v3044_v4 = vpack.c.bf16 %v4960_v5, %v4937_v54  ;;  %v3043_v5 = vpack.c.bf16 %v4914_v52, %v4890_v41 }
0x2ca5   :  { %2861 = vrot.lane.b32.xlu0 %v2859_v14, %s4074_s26 }
0x2d16   :  { %v2866_v10 = vpop.permute.xlu1 %2865 }
0x2d17   :  { %v2862_v11 = vpop.permute.xlu0 %2861 }
0x2d18   :  { %v2868_v12 = vsel %vm438_vm11, %v2862_v11, %v2866_v10  ;;  %v3614_v10 = vld [vmem:[%s5114_s19 + $0x8] sm:$0xff]   ;;  %s4086_s19 = smov [#allocation11]  }
0x2d19   :  { %v2869_v25 = vpack.c.bf16 %v2868_v12, %v2868_v12  ;;  %v2002_v12 = vmul.f32 1.442695, %v4699_v49 }
0x2d1b   :  { %3376 = vmatmul.mubr.msk.bf16.vlgmr.msra.gmra.mrb[64].mxu1 %vm286_vm4, %v2869_v25 }
0x2d1c   :  { %3527 = vmatpush3.bf16.msra.mxu1 %v3613_v48 }
0x2d1d   :  { %3528 = vmatprep.subr.bf16.mxu1 %v3614_v10 }
0x2d20   :  { %3529 = vmatpush3.bf16.msra.mxu1 %v3614_v10 }
0x2dee   :  { %v2907_v22 = vpop.f32.mrb[64].mxu1 }
0x2def   :  { %v2914_v13 = vadd.f32 %v4831_v59, %v2907_v22  ;;  %v2909_v57 = vpop.f32.mrb[65].mxu1 }
0x2df0   :  { %v2939_v16 = vadd.f32 %v2909_v57, %v4748_v23  ;;  %v2911_v47 = vpop.f32.mrb[66].mxu1 }
0x2df1   :  { %3881 = vtanh.f32 %v2914_v13  ;;  %v2912_v2 = vpop.f32.mrb[67].mxu1  ;;  %v3377_v61 = vmul.f32 -1.442695, %v2914_v13 }
0x2df2   :  { %3883 = vtanh.f32 %v2939_v16  ;;  %v3378_v37 = vmul.f32 -1.442695, %v2939_v16 }
0x2df3   :  { %3885 = vpow2.f32 %v3377_v61 }
0x2df4   :  { %3887 = vpow2.f32 %v3378_v37 }
0x2dfb   :  { %v3882_v62 = vpop.eup %3881 }
0x2dfc   :  { %v3884_v45 = vpop.eup %3883  ;;  %2924 = vrot.lane.b32.xlu0 %v3882_v62, %s4085_s16 }
0x2dfd   :  { %2949 = vrot.lane.b32.xlu1 %v3884_v45, %s4085_s16  ;;  %v3886_v53 = vpop.eup %3885 }
0x2dfe   :  { %v3888_v51 = vpop.eup %3887  ;;  %v2918_v19 = vadd.f32 1.0, %v3886_v53 }
0x2dff   :  { %v2943_v17 = vadd.f32 1.0, %v3888_v51 }
0x2e00   :  { %3889 = vrcp.f32 %v2918_v19 }
0x2e01   :  { %3891 = vrcp.f32 %v2943_v17 }
0x2e0a   :  { %v3890_v23 = vpop.eup %3889 }
0x2e0b   :  { %v3892_v40 = vpop.eup %3891  ;;  %v2922_v29 = vmul.f32 %v3890_v23, %v2828_v32 }
0x2e0c   :  { %v2947_v26 = vmul.f32 %v3892_v40, %v2853_v33 }
0x2e6e   :  { %v2925_v18 = vpop.permute.xlu0 %2924 }
0x2e6f   :  { %v2927_v27 = vmul.f32 %v3890_v23, %v2925_v18  ;;  %v2950_v35 = vpop.permute.xlu1 %2949 }
0x2e70   :  { %v2952_v36 = vmul.f32 %v3892_v40, %v2950_v35 }
0x2e71   :  { %2929 = vrot.lane.b32.xlu0 %v2927_v27, %s4085_s16 }
0x2e72   :  { %2954 = vrot.lane.b32.xlu1 %v2952_v36, %s4085_s16 }
0x2ee3   :  { %v2930_v21 = vpop.permute.xlu0 %2929 }
0x2ee4   :  { %v2932_v42 = vadd.f32 %v2930_v21, %v2922_v29  ;;  %v2955_v63 = vpop.permute.xlu1 %2954 }
0x2ee5   :  { %v4973_v39 = vadd.f32 %v2955_v63, %v2947_v26 }
0x2ee6   :  { %3893 = vtanh.f32 %v2932_v42 }
0x2ee7   :  { %3895 = vtanh.f32 %v4973_v39 }
0x2ef0   :  { %v3894_v0 = vpop.eup %3893 }
0x2ef1   :  { %v3896_v8 = vpop.eup %3895  ;;  %2935 = vrot.lane.b32.xlu0 %v3894_v0, %s4085_s16 }
0x2ef2   :  { %2960 = vrot.lane.b32.xlu1 %v3896_v8, %s4085_s16 }
0x2f63   :  { %v2936_v55 = vpop.permute.xlu0 %2935 }
0x2f64   :  { %v2938_v44 = vmul.f32 %v3890_v23, %v2936_v55  ;;  %v2961_v58 = vpop.permute.xlu1 %2960 }
0x2f65   :  { %v2963_v56 = vmul.f32 %v3892_v40, %v2961_v58 }
0x2f66   :  { %2969 = vrot.lane.b32.xlu1 %v2938_v44, %s4083_s8 }
0x2f67   :  { %2965 = vrot.lane.b32.xlu0 %v2963_v56, %s4074_s26 }
0x2fd8   :  { %v2970_v1 = vpop.permute.xlu1 %2969 }
0x2fd9   :  { %v2966_v6 = vpop.permute.xlu0 %2965 }
0x2fda   :  { %v2972_v46 = vsel %vm438_vm11, %v2966_v6, %v2970_v1  ;;  %3166 = vst.msk [vmem:[#allocation10] sm:$0x3] %vm3165_vm12, %v2966_v6 }
0x2fdb   :  { %v2973_v7 = vpack.c.bf16 %v2972_v46, %v2972_v46 }
0x2fdd   :  { %3379 = vmatmul.mubr.msk.bf16.vlgmr.msra.gmra.mrb[76].mxu0 %vm286_vm4, %v2973_v7 }
0x30b0   :  { %v3011_v30 = vpop.f32.mrb[76].mxu0 }
0x30b1   :  { %v3017_v31 = vadd.f32 %v4831_v59, %v3011_v30  ;;  %v3013_v28 = vpop.f32.mrb[77].mxu0  ;;  %v3042_v59 = vpack.c.bf16 %v4866_v24, %v4842_v20 }
0x30b2   :  { %v3014_v34 = vpop.f32.mrb[78].mxu0 }
0x30b3   :  { %3897 = vtanh.f32 %v3017_v31  ;;  %v3015_v38 = vpop.f32.mrb[79].mxu0  ;;  %v3380_v60 = vmul.f32 -1.442695, %v3017_v31 }
0x30b5   :  { %3899 = vpow2.f32 %v3380_v60 }
0x30bd   :  { %v3898_v50 = vpop.eup %3897 }
0x30be   :  { %3027 = vrot.lane.b32.xlu0 %v3898_v50, %s4085_s16 }
0x30bf   :  { %v3900_v43 = vpop.eup %3899 }
0x30c0   :  { %v3021_v32 = vadd.f32 1.0, %v3900_v43 }
0x30c2   :  { %3901 = vrcp.f32 %v3021_v32 }
0x30cc   :  { %v3902_v3 = vpop.eup %3901 }
0x30cd   :  { %v3025_v14 = vmul.f32 %v3902_v3, %v2932_v42 }
0x3130   :  { %v3028_v33 = vpop.permute.xlu0 %3027 }
0x3131   :  { %v3030_v15 = vmul.f32 %v3902_v3, %v3028_v33 }
0x3133   :  { %3032 = vrot.lane.b32.xlu1 %v3030_v15, %s4085_s16 }
0x3137   :  { %3056 = vrot.lane.b32.xlu1 %v3042_v59, %s4074_s26 }
0x313b   :  { %3060 = vrot.lane.b32.xlu1 %v3044_v4, %s4074_s26 }
0x313f   :  { %1998 = vrot.lane.b32.xlu1 %v1996_v9, %s4077_s28  ;;  %s3197_s28 = sshll.u32 %s4086_s19, 4  ;;  %s3198_s28 = int_to_ptr.vmem [resolvable:$true] %s3197_s28 }
0x3140   :  { %p4001_p5 = scmp.lt.s32.totalorder %s3198_s28, %s3198_s28 }
0x31a5   :  { %v3033_v20 = vpop.permute.xlu1 %3032 }
0x31a6   :  { %v3035_v24 = vadd.f32 %v3033_v20, %v3025_v14 }
0x31a8   :  { %3903 = vtanh.f32 %v3035_v24 }
0x31a9   :  { %v3057_v11 = vpop.permute.xlu1 %3056  ;;  %3905 = vpow2.f32 %v2002_v12 }
0x31aa   :  { %3530 = vmatprep.mubr.msk.bf16.mxu1 %vm438_vm11, %v3057_v11 }
0x31ad   :  { %v3061_v25 = vpop.permute.xlu1 %3060 }
0x31b1   :  { %v1999_v22 = vpop.permute.xlu1 %1998 }
0x31b2   :  { %v3904_v54 = vpop.eup %3903  ;;  %v2001_v13 = vsub.f32 %v4699_v49, %v1999_v22 }
0x31b3   :  { %3038 = vrot.lane.b32.xlu0 %v3904_v54, %s4085_s16  ;;  %v3906_v47 = vpop.eup %3905 }
0x31b4   :  { %v2004_v2 = vsub.f32 %v2001_v13, %v3906_v47 }
0x31b6   :  { %v2005_v41 = vadd.f32 1.0, %v2004_v2 }
0x31b7   :  { %3058 = vrot.lane.b32.xlu0 %v3043_v5, %s4074_s26 }
0x3225   :  { %v3039_v57 = vpop.permute.xlu0 %3038 }
0x3226   :  { %v3041_v16 = vmul.f32 %v3902_v3, %v3039_v57 }
0x3228   :  { %v3045_v62 = vpack.c.bf16 %v3041_v16, %v2938_v44 }
0x3229   :  { %v3059_v45 = vpop.permute.xlu0 %3058 }
0x322a   :  { %3062 = vrot.lane.b32.xlu0 %v3045_v62, %s4074_s26  ;;  %3531 = vmatmul.mubr.msk.bf16.vlgmr.msra.gmra.mrb[68].mxu1 %vm438_vm11, %v3059_v45 }
0x322b   :  { %3534 = vmatprep.mubr.msk.bf16.mxu1 %vm438_vm11, %v3061_v25 }
0x322e   :  { %2007 = vrot.lane.b32.xlu0 %v2005_v41, %s4084_s13 }
0x3232   :  { %3170 = vrot.lane.b32.xlu0 %v4973_v39, %s4083_s8 }
0x3236   :  { %3172 = vrot.lane.b32.xlu0 %v3035_v24, %s4083_s8 }
0x323a   :  { %3162 = vrot.lane.b32.xlu0 %v3041_v16, %s4074_s26  ;;  %s3996_s26 = scalar_lea.vmem %s3198_s28, 64 }
0x323b   :  { %p3997_p4 = scmp.ne.s32.totalorder %s3198_s28, %s3996_s26  ;;  %p4002_p6 = scmp.lt.s32.totalorder %s3996_s26, %s3996_s26 }
0x323d   :  { %p4003_p7 = por %p4002_p6, %p4001_p5 }
0x323f   :  { %p4004_p8 = pnand %p4003_p7, %p3997_p4 }
0x329c   :  { %v3063_v49 = vpop.permute.xlu0 %3062 }
0x329d   :  { %3535 = vmatmul.mubr.msk.bf16.gmra.mrb[72].mxu1 %vm438_vm11, %v3063_v49 }
0x32a0   :  { %v2008_v52 = vpop.permute.xlu0 %2007 }
0x32a1   :  { %v2011_v61 = vsel %vm2010_vm13, %v2008_v52, 0.0 }
0x32a2   :  { %2012 = vadd.xlane.f32.xlu1 %v2011_v61 }
0x32a4   :  { %v3171_v37 = vpop.permute.xlu0 %3170 }
0x32a5   :  { %3176 = vst.msk [vmem:[#allocation11] sm:$0x3] %vm3165_vm12, %v3171_v37 }
0x32a8   :  { %v3173_v53 = vpop.permute.xlu0 %3172 }
0x32a9   :  { %3177 = vst.msk [vmem:[#allocation11 + $0x2] sm:$0x3] %vm3165_vm12, %v3173_v53 }
0x32ac   :  { %v3163_v51 = vpop.permute.xlu0 %3162 }
0x32ad   :  { %3167 = vst.msk [vmem:[#allocation10 + $0x2] sm:$0x3] %vm3165_vm12, %v3163_v51 }
0x32ae   :  { %4007 = shalt.err (!%p4004_p8)
}
0x32af   :  { %s4008_s5 = scalar_lea.hbm %s5118_s23, 64 }
0x32b0   :  { %p4009_p9 = scmp.ne.s32.totalorder %s5118_s23, %s4008_s5  ;;  %p4012_p10 = scmp.lt.u32.totalorder %s4008_s5, %s5118_s23 }
0x32b2   :  { %p4014_p11 = pnand %p4012_p10, %p4009_p9 }
0x32b4   :  { %4017 = shalt.err (!%p4014_p11)
}
0x32b5   :  { %s4087_s7 = smov 2   ;;  %s4088_s25 = smov [#allocation10]  }
0x32b6   :  { %3203 = dma.vmem_to_hbm [thread:$0]  %s3198_s28, 64, %s5118_s23, [#allocation12], %s4085_s16, %s4085_s16, %s4087_s7  }
0x32b7   :  { %s3185_s27 = sshll.u32 %s4088_s25, 4  ;;  %s3186_s27 = int_to_ptr.vmem [resolvable:$true] %s3185_s27 }
0x32b8   :  { %s4018_s4 = scalar_lea.vmem %s3186_s27, 64  ;;  %p4023_p13 = scmp.lt.s32.totalorder %s3186_s27, %s3186_s27 }
0x32b9   :  { %p4019_p12 = scmp.ne.s32.totalorder %s3186_s27, %s4018_s4  ;;  %p4024_p0 = scmp.lt.s32.totalorder %s4018_s4, %s4018_s4 }
0x32bb   :  { %p4025_p1 = por %p4024_p0, %p4023_p13 }
0x32bd   :  { %p4026_p2 = pnand %p4025_p1, %p4019_p12 }
0x32bf   :  { %4029 = shalt.err (!%p4026_p2)
}
0x32c0   :  { %s4030_s30 = scalar_lea.hbm %s5117_s22, 64 }
0x32c1   :  { %p4031_p3 = scmp.ne.s32.totalorder %s5117_s22, %s4030_s30  ;;  %p4034_p4 = scmp.lt.u32.totalorder %s4030_s30, %s5117_s22 }
0x32c3   :  { %p4036_p5 = pnand %p4034_p4, %p4031_p3 }
0x32c5   :  { %4039 = shalt.err (!%p4036_p5)
}
0x32c6   :  { %3191 = dma.vmem_to_hbm [thread:$0]  %s3186_s27, 64, %s5117_s22, [#allocation4], %s4085_s16, %s4085_s16, %s4087_s7   ;;  %vm2014_vm14 = vcmask 1041408   ;;  %vm2023_vm15 = vcmask 0  }
0x32c7   :  { %v3381_v19 = vld [vmem:[%s5115_s20] ss:$0 sm:$0xff]  ;;  %s5150_s28 = sld [smem:[#allocation28_spill]]  ;;  %s4089_s5 = smov [#allocation13]  }
0x32c8   :  { %s3210_s10 = sshll.u32 %s4089_s5, 4  ;;  %s3211_s10 = int_to_ptr.vmem [resolvable:$true] %s3210_s10 }
0x32c9   :  { %s4040_s24 = scalar_lea.vmem %s3211_s10, 16  ;;  %s4044_s6 = scalar_lea.vmem %s3211_s10, 32 }
0x32ca   :  { %p4041_p6 = scmp.ne.s32.totalorder %s3211_s10, %s4040_s24  ;;  %p4045_p7 = scmp.lt.s32.totalorder %s3211_s10, %s3211_s10 }
0x32cb   :  { %p4046_p8 = scmp.lt.s32.totalorder %s4044_s6, %s4040_s24 }
0x32cd   :  { %p4047_p9 = por %p4046_p8, %p4045_p7 }
0x32cf   :  { %p4048_p10 = pnand %p4047_p9, %p4041_p6 }
0x32fd   :  { %v3532_v17 = vpop.f32.mrb[68].mxu1 }
0x32fe   :  { %v3131_v23 = vadd.f32 %v3532_v17, %v3381_v19  ;;  %v3122_v18 = vpop.f32.mrb[69].mxu1 }
0x32ff   :  { %v3123_v40 = vadd.f32 %v3381_v19, %v3122_v18  ;;  %v3533_v27 = vpop.f32.mrb[70].mxu1 }
0x3300   :  { %3155 = vst.msk [vmem:[%s5150_s28 + $0x10] sm:$0xff] %vm286_vm4, %v3131_v23  ;;  %v3134_v35 = vadd.f32 %v3533_v27, %v3381_v19  ;;  %v3125_v36 = vpop.f32.mrb[71].mxu1 }
0x3301   :  { %3153 = vst.msk [vmem:[%s5150_s28] sm:$0xff] %vm286_vm4, %v3123_v40  ;;  %v3126_v29 = vadd.f32 %v3381_v19, %v3125_v36 }
0x3302   :  { %3156 = vst.msk [vmem:[%s5150_s28 + $0x18] sm:$0xff] %vm286_vm4, %v3134_v35 }
0x3303   :  { %3154 = vst.msk [vmem:[%s5150_s28 + $0x8] sm:$0xff] %vm286_vm4, %v3126_v29 }
0x332f   :  { %v2013_v21 = vpop.xlane.xlu1 %2012 }
0x3330   :  { %v2015_v26 = vsel %vm2014_vm14, %v2013_v21, 0.0 }
0x3331   :  { %v2016_v42 = vrot.slane %v2015_v26, 4 }
0x3333   :  { %v2017_v63 = vadd.f32 %v2016_v42, %v2015_v26 }
0x3335   :  { %v2018_v39 = vrot.slane %v2017_v63, 2 }
0x3337   :  { %v2019_v0 = vadd.f32 %v2018_v39, %v2017_v63 }
0x3339   :  { %v2020_v8 = vrot.slane %v2019_v0, 1 }
0x333b   :  { %v2021_v55 = vadd.f32 %v2020_v8, %v2019_v0 }
0x333d   :  { %v2022_v44 = vmul.f32 -0.25, %v2021_v55 }
0x333f   :  { %2024 = vst.msk [vmem:[#allocation13] sm:$0x1] %vm2023_vm15, %v2022_v44 }
0x3340   :  { %4051 = shalt.err (!%p4048_p10)
}
0x3341   :  { %s5151_s0 = sld [smem:[#allocation29_spill]] }
0x3347   :  { %s4052_s21 = scalar_lea.hbm %s5151_s0, 16 }
0x3348   :  { %p4053_p11 = scmp.ne.s32.totalorder %s5151_s0, %s4052_s21  ;;  %p4056_p12 = scmp.lt.u32.totalorder %s4052_s21, %s5151_s0 }
0x334a   :  { %p4058_p13 = pnand %p4056_p12, %p4053_p11 }
0x334c   :  { %4061 = shalt.err (!%p4058_p13)
}
0x334d   :  { %3213 = dma.vmem_to_hbm [thread:$0]  %s3211_s10, 16, %s5151_s0, [#allocation12]  }
0x3370   :  { %v3536_v58 = vpop.f32.mrb[72].mxu1 }
0x3371   :  { %v3147_v56 = vadd.f32 %v3536_v58, %v3381_v19  ;;  %v3138_v1 = vpop.f32.mrb[73].mxu1 }
0x3372   :  { %v3139_v6 = vadd.f32 %v3381_v19, %v3138_v1  ;;  %v3537_v46 = vpop.f32.mrb[74].mxu1 }
0x3373   :  { %3159 = vst.msk [vmem:[%s5150_s28 + $0x30] sm:$0xff] %vm286_vm4, %v3147_v56  ;;  %v3150_v7 = vadd.f32 %v3537_v46, %v3381_v19  ;;  %v3141_v30 = vpop.f32.mrb[75].mxu1 }
0x3374   :  { %3157 = vst.msk [vmem:[%s5150_s28 + $0x20] sm:$0xff] %vm286_vm4, %v3139_v6  ;;  %v3142_v31 = vadd.f32 %v3381_v19, %v3141_v30 }
0x3375   :  { %3160 = vst.msk [vmem:[%s5150_s28 + $0x38] sm:$0xff] %vm286_vm4, %v3150_v7 }
0x3376   :  { %3158 = vst.msk [vmem:[%s5150_s28 + $0x28] sm:$0xff] %vm286_vm4, %v3142_v31 }
0x3377   :  { %4068 = dma.done.wait [#allocation4], 64  }
0x3378   :  { %4069 = vsyncadd [#allocation4], 4294967232 }
0x3379   :  { %4070 = dma.done.wait [#allocation12], 80  }
0x337a   :  { %4071 = vsyncadd [#allocation12], 4294967216 }
0x337b   :  { %3225 = vsyncpa [#allocation3], 1 }
0x337c   :  { %3226 = vsyncpa [#allocation6], 1 }
0x337d   :  { %3227 = vsyncpa [#allocation9], 1 }
0x337e   :  { %3228 = vsyncpa [#allocation4], 1 }
0x337f   :  { %3229 = vsyncpa [#allocation12], 1 }

</bundles_post_ra>
